<compile_context>
chip_gen: v7x
topology: tpu7x:2x2x1
jax: 0.10.0
libtpu: 0.0.40
codegen_flags: <defaults>
</compile_context>

<pallas_src>
import functools
import math

import jax
import jax.numpy as jnp
from jax import lax
from jax.experimental import pallas as pl
from jax.experimental.pallas import tpu as pltpu


# Padding safety: the fused pre-activation must map 0 -> 0, otherwise the zero-padded halo
# would be activated to a non-zero value inside the kernel.
_ZERO_PRESERVING_ACTS = ("relu", "leakyrelu", "none")


def _apply_act(v, name):
    if name == "relu":
        return jnp.maximum(v, 0.0)
    if name == "leakyrelu":                           # PyTorch default negative_slope=0.01
        return jnp.where(v >= 0.0, v, 0.01 * v)
    if name == "none":
        return v
    raise NotImplementedError(name)


def _pick_d_tile(d, hp, target):
    """Largest D tile <= target that divides D and keeps the output block's second-minor
    dim (td * Hp) a multiple of 8 (falls back to the full-D block, which is exempt)."""
    for td in range(min(d, target), 0, -1):
        if d % td == 0 and (td * hp) % 8 == 0:
            return td
    return d


def _vmem_limit_bytes(needed):
    """Generation-aware VMEM cap: ~40 MiB on v7x (64 MiB physical), ~80 MiB on v5e/v6e."""
    try:
        cap = pltpu.get_tpu_info().vmem_capacity_bytes
    except Exception:                                  # pragma: no cover - info unavailable
        cap = 64 * 2 ** 20                             # assume the smallest (v7x) VMEM
    hi = int(0.625 * cap)
    return int(min(hi, max(32 * 2 ** 20, needed)))


def _conv3d_same_kernel(x_ref, w_ref, b_ref, o_ref, xact_ref, *,
                        k, rows, hp, win, pre_act, post_act):
    """One output tile = `rows` rows of the flattened padded (D, Hp) grid, each row holding
    the merged (W, Cout) lane axis:

      o[base + r, (w, co)] = post_act( bias[co] +
          sum_{kd,kh} act(x)[base + r + kd*Hp + kh, :] @ W_toeplitz[kd,kh] )
    """
    base = pl.multiple_of(pl.program_id(1) * rows, 8)     # sublane-aligned row offset

    # Pre-activate + cast the tile's superset window exactly once (not once per tap).
    xw = x_ref[0, pl.ds(base, win), :]
    xact_ref[...] = _apply_act(xw, pre_act).astype(xact_ref.dtype)

    # k^2 MXU matmuls with a wide contraction (Wp*Cin); register-carried accumulator,
    # initialized by the first tap (no zero-init, no per-tap VMEM RMW).
    acc = None
    for kd in range(k):
        for kh in range(k):
            off = kd * hp + kh                             # static slice offset
            xs = xact_ref[off:off + rows, :]               # (rows, Wp*Cin) bf16
            wk = w_ref[kd * k + kh]                        # (Wp*Cin, W*Cout) bf16, resident
            p = jnp.dot(xs, wk, preferred_element_type=jnp.float32)
            acc = p if acc is None else acc + p

    y = acc + b_ref[...]                                   # bias once, f32
    y = _apply_act(y, post_act)                            # fused next-layer pre-act
    o_ref[0] = y.astype(o_ref.dtype)                       # single store per tile


def conv3d_same(x, weight, bias, *, pre_act="none", post_act="none", d_tile=8):
    """post_act( Conv3d_same( pre_act(x) ) + bias ), channels-last.

    x:      (N, D, H, W, Cin)  float32
    weight: (Cout, Cin, k, k, k)   (PyTorch Conv3d layout)
    bias:   (Cout,) or None
    Returns (N, D, H, W, Cout).
    """
    assert pre_act in _ZERO_PRESERVING_ACTS, "fused pre-activation must satisfy act(0)==0"

    n, d, h, w_sp, cin = x.shape
    cout, cin_w, k0, k1, k2 = weight.shape
    assert cin_w == cin and k0 == k1 == k2, "cubic kernel expected"
    k = k0
    plo, phi = (k - 1) // 2, k // 2                        # PyTorch 'same', stride 1
    dp, hp, wp = d + k - 1, h + k - 1, w_sp + k - 1

    # Single pad.  One extra plane on the high-D side covers the (k-1)-row tail that the
    # last tile's superset window reads past the real padded volume (it only feeds rows
    # that are discarded afterwards).
    x_pad = jnp.pad(x, ((0, 0), (plo, phi + 1), (plo, phi), (plo, phi), (0, 0)))
    r_tot = (dp + 1) * hp
    cw = wp * cin                                          # contraction lane width
    co_lane = w_sp * cout                                  # output lane width
    x_rows = x_pad.reshape(n, r_tot, cw)                   # (N, rows, Wp*Cin)

    td = _pick_d_tile(d, hp, d_tile)
    rows = td * hp                                         # output rows per grid step
    n_tiles = d // td
    win = rows + (k - 1) * (hp + 1)                        # superset window per tile

    # Banded block-Toeplitz weight: fold (kw, Cin) into the contraction and (W, Cout) onto
    # lanes.  B[kd,kh, (w',ci), (w,co)] = weight[co,ci,kd,kh,w'-w] if 0 <= w'-w < k else 0.
    wt = jnp.transpose(weight, (2, 3, 4, 1, 0))            # (kd, kh, kw, ci, co)
    shift = jnp.arange(wp)[:, None] - jnp.arange(w_sp)[None, :]
    sel = jax.nn.one_hot(shift, k, dtype=wt.dtype)         # (Wp, W, k); 0 outside the band
    w_fold = jnp.einsum("pwk,dhkic->dhpiwc", sel, wt)
    w_fold = w_fold.reshape(k * k, cw, co_lane).astype(jnp.bfloat16)

    b = bias if bias is not None else jnp.zeros((cout,), x.dtype)
    b_fold = jnp.broadcast_to(b.reshape(1, cout), (w_sp, cout))
    b_fold = b_fold.reshape(1, co_lane).astype(jnp.float32)

    kernel = functools.partial(_conv3d_same_kernel, k=k, rows=rows, hp=hp, win=win,
                               pre_act=pre_act, post_act=post_act)

    # VMEM budget: count the default double-buffering of every pallas-managed block plus
    # the activated-window scratch, then clamp generation-aware.
    needed = (2 * (r_tot * cw * 4 + w_fold.size * 2 + b_fold.size * 4
                   + rows * co_lane * 4) + win * cw * 2)
    vmem_limit = _vmem_limit_bytes(int(needed * 1.25) + (2 << 20))

    cost = pl.CostEstimate(
        flops=int(2 * n * d * hp * (k * k) * cw * co_lane),
        transcendentals=0,
        bytes_accessed=int(4 * x_rows.size + 2 * w_fold.size + 4 * b_fold.size
                           + 4 * n * d * hp * co_lane),
    )

    out_flat = pl.pallas_call(
        kernel,
        out_shape=jax.ShapeDtypeStruct((n, d * hp, co_lane), x.dtype),
        grid_spec=pltpu.PrefetchScalarGridSpec(
            num_scalar_prefetch=0,
            grid=(n, n_tiles),
            in_specs=[
                # Whole padded, flattened sample: index map ignores the D-tile axis so it
                # is DMA'd once per batch element and stays resident across D tiles.
                pl.BlockSpec((1, r_tot, cw), lambda i, j: (i, 0, 0)),
                # Toeplitz-folded weights / bias resident across the entire grid.
                pl.BlockSpec((k * k, cw, co_lane), lambda i, j: (0, 0, 0)),
                pl.BlockSpec((1, co_lane), lambda i, j: (0, 0)),
            ],
            out_specs=pl.BlockSpec((1, rows, co_lane), lambda i, j: (i, j, 0)),
            scratch_shapes=[pltpu.VMEM((win, cw), jnp.bfloat16)],
        ),
        compiler_params=pltpu.CompilerParams(
            dimension_semantics=("parallel", "parallel"),
            vmem_limit_bytes=vmem_limit),
        cost_estimate=cost,
    )(x_rows, w_fold, b_fold)

    # Drop the H-padding rows that were computed alongside the valid ones.
    return out_flat.reshape(n, d, hp, w_sp, cout)[:, :, :h]


def projector_forward(x, params, *, act, output_act, d_tile=8):
    """Equivalent to Projector.forward(x, reshape=True) with channels-last x: each layer is
    act -> conv3d('same') (+ output act on the last layer).  The per-layer pre-activation
    is fused into the previous layer's epilogue so it is applied exactly once."""
    n_layers = len(params)
    for i, (w, b) in enumerate(params):
        pre = act if i == 0 else "none"                    # fused into previous epilogue
        if i < n_layers - 1:
            post = act                                     # next layer's pre-activation
        else:
            post = act if output_act else "none"           # module's output_act
        x = conv3d_same(x, w, b, pre_act=pre, post_act=post, d_tile=d_tile)
    return x


def projector_forward_ref(x, params, *, act, output_act):
    """Plain-JAX reference following the PyTorch module literally."""
    n_layers = len(params)
    for i, (w, b) in enumerate(params):
        x = _apply_act(x, act)
        k = w.shape[-1]
        plo, phi = (k - 1) // 2, k // 2
        w_dhwio = jnp.transpose(w, (2, 3, 4, 1, 0))
        x = lax.conv_general_dilated(
            x, w_dhwio, window_strides=(1, 1, 1),
            padding=[(plo, phi)] * 3,
            dimension_numbers=("NDHWC", "DHWIO", "NDHWC"),
            precision=lax.Precision.HIGHEST)
        if b is not None:
            x = x + b
        if output_act and i == n_layers - 1:
            x = _apply_act(x, act)
    return x


def init_projector_params(key, layers, in_channel, hidden_channel, out_channel,
                          kernel_size, init, bias):
    """Mirrors Projector.__init__ / weight_init ('ones' | 'dirac' | 'none')."""
    assert layers > 0
    if layers == 1:
        dims = [(in_channel, out_channel)]
    else:
        dims = ([(in_channel, hidden_channel)]
                + [(hidden_channel, hidden_channel)] * (layers - 2)
                + [(hidden_channel, out_channel)])
    k = kernel_size
    params = []
    for (cin, cout), kk in zip(dims, jax.random.split(key, len(dims))):
        kw_key, kb_key = jax.random.split(kk)
        fan_in = cin * k ** 3
        bound = 1.0 / math.sqrt(fan_in)
        if init == "ones":
            w = jnp.ones((cout, cin, k, k, k), jnp.float32)
        elif init == "dirac":
            w = jnp.zeros((cout, cin, k, k, k), jnp.float32)
            m = min(cin, cout)
            w = w.at[jnp.arange(m), jnp.arange(m), k // 2, k // 2, k // 2].set(1.0)
        elif init == "none":   # PyTorch Conv3d default init bound
            w = jax.random.uniform(kw_key, (cout, cin, k, k, k), jnp.float32,
                                   -bound, bound)
        else:
            raise NotImplementedError(init)
        b = (jax.random.uniform(kb_key, (cout,), jnp.float32, -bound, bound)
             if bias else None)
        params.append((w, b))
    return params


if __name__ == "__main__":
    key = jax.random.PRNGKey(0)
    k_x, k_p = jax.random.split(key)

    # Small Projector config: 3 layers, Conv3d k=3 'same', ReLU pre-activations.
    layers = 3
    in_channel, hidden_channel, out_channel = 4, 8, 4
    kernel_size = 3
    act = "relu"
    init = "none"
    bias = True
    output_act = False

    n, d, h, w = 2, 8, 8, 8                                  # x: (n, d, h, w, c)
    x = jax.random.normal(k_x, (n, d, h, w, in_channel), jnp.float32)

    params = init_projector_params(k_p, layers, in_channel, hidden_channel,
                                   out_channel, kernel_size, init, bias)

    fwd = jax.jit(functools.partial(projector_forward, act=act,
                                    output_act=output_act, d_tile=4))
    out = jax.block_until_ready(fwd(x, params))

    ref = projector_forward_ref(x, params, act=act, output_act=output_act)
    assert out.shape == (n, d, h, w, out_channel)
    max_err = float(jnp.max(jnp.abs(out - ref)))
    # bf16 MXU operands (f32 accumulation) over 3 conv layers -> slightly relaxed tolerance.
    assert jnp.allclose(out, ref, atol=2e-2, rtol=2e-2), max_err

    print("KERNEL_OK")
</pallas_src>

<mosaic_0001>
module attributes {stable_mosaic.version = 11 : i64} {
  func.func @_conv3d_same_kernel(%arg0: i32, %arg1: i32, %arg2: memref<1x110x40xf32, #tpu.memory_space<vmem>>, %arg3: memref<9x40x64xbf16, #tpu.memory_space<vmem>>, %arg4: memref<1x64xf32, #tpu.memory_space<vmem>>, %arg5: memref<1x40x64xf32, #tpu.memory_space<vmem>>, %arg6: memref<62x40xbf16, #tpu.memory_space<vmem>>) attributes {dimension_semantics = [#tpu.dimension_semantics<parallel>, #tpu.dimension_semantics<parallel>], iteration_bounds = array<i64: 2, 2>, scalar_prefetch = 0 : i64, scratch_operands = 1 : i64, tpu.core_type = #tpu.core_type<tc>, window_params = [{transform_indices = @transform_0, window_bounds = array<i64: 1, 110, 40>}, {pipeline_mode = #tpu.pipeline_mode<synchronous>, transform_indices = @transform_1, window_bounds = array<i64: 9, 40, 64>}, {pipeline_mode = #tpu.pipeline_mode<synchronous>, transform_indices = @transform_2, window_bounds = array<i64: 1, 64>}, {transform_indices = @transform_3, window_bounds = array<i64: 1, 40, 64>}]} {
    %c40_i32 = arith.constant 40 : i32
    %0 = arith.muli %arg1, %c40_i32 : i32
    %1 = tpu.assume_multiple %0, 8 : i32
    %c0 = arith.constant 0 : index
    %2 = arith.index_cast %1 : i32 to index
    %c0_0 = arith.constant 0 : index
    %3 = vector.load %arg2[%c0, %2, %c0_0] : memref<1x110x40xf32, #tpu.memory_space<vmem>>, vector<1x62x40xf32>
    %4 = vector.shape_cast %3 : vector<1x62x40xf32> to vector<62x40xf32>
    %cst = arith.constant 0.000000e+00 : f32
    %5 = vector.broadcast %cst : f32 to vector<62x40xf32>
    %6 = arith.maximumf %4, %5 : vector<62x40xf32>
    %7 = arith.truncf %6 : vector<62x40xf32> to vector<62x40xbf16>
    %c0_1 = arith.constant 0 : index
    %c0_2 = arith.constant 0 : index
    %8 = vector.load %arg6[%c0_1, %c0_2] : memref<62x40xbf16, #tpu.memory_space<vmem>>, vector<62x40xbf16>
    tpu.vector_store %arg6[%c0_1, %c0_2], %7 {strides = array<i32>} : memref<62x40xbf16, #tpu.memory_space<vmem>>, vector<62x40xbf16>,
    %c0_3 = arith.constant 0 : index
    %c0_4 = arith.constant 0 : index
    %9 = vector.load %arg6[%c0_3, %c0_4] : memref<62x40xbf16, #tpu.memory_space<vmem>>, vector<40x40xbf16>
    %c0_5 = arith.constant 0 : index
    %c0_6 = arith.constant 0 : index
    %c0_7 = arith.constant 0 : index
    %10 = vector.load %arg3[%c0_5, %c0_6, %c0_7] : memref<9x40x64xbf16, #tpu.memory_space<vmem>>, vector<1x40x64xbf16>
    %11 = vector.shape_cast %10 : vector<1x40x64xbf16> to vector<40x64xbf16>
    %cst_8 = arith.constant dense<0.000000e+00> : vector<40x64xf32>
    %12 = tpu.matmul %9, %11, %cst_8 {dimension_numbers = #tpu.dot_dimension_numbers<[1], [0], [0], [1], [0, 0, 1, 1], [], []>} : vector<40x40xbf16>, vector<40x64xbf16>, vector<40x64xf32> -> vector<40x64xf32>
    %c1 = arith.constant 1 : index
    %c0_9 = arith.constant 0 : index
    %13 = vector.load %arg6[%c1, %c0_9] : memref<62x40xbf16, #tpu.memory_space<vmem>>, vector<40x40xbf16>
    %c1_10 = arith.constant 1 : index
    %c0_11 = arith.constant 0 : index
    %c0_12 = arith.constant 0 : index
    %14 = vector.load %arg3[%c1_10, %c0_11, %c0_12] : memref<9x40x64xbf16, #tpu.memory_space<vmem>>, vector<1x40x64xbf16>
    %15 = vector.shape_cast %14 : vector<1x40x64xbf16> to vector<40x64xbf16>
    %cst_13 = arith.constant dense<0.000000e+00> : vector<40x64xf32>
    %16 = tpu.matmul %13, %15, %cst_13 {dimension_numbers = #tpu.dot_dimension_numbers<[1], [0], [0], [1], [0, 0, 1, 1], [], []>} : vector<40x40xbf16>, vector<40x64xbf16>, vector<40x64xf32> -> vector<40x64xf32>
    %17 = arith.addf %12, %16 : vector<40x64xf32>
    %c2 = arith.constant 2 : index
    %c0_14 = arith.constant 0 : index
    %18 = vector.load %arg6[%c2, %c0_14] : memref<62x40xbf16, #tpu.memory_space<vmem>>, vector<40x40xbf16>
    %c2_15 = arith.constant 2 : index
    %c0_16 = arith.constant 0 : index
    %c0_17 = arith.constant 0 : index
    %19 = vector.load %arg3[%c2_15, %c0_16, %c0_17] : memref<9x40x64xbf16, #tpu.memory_space<vmem>>, vector<1x40x64xbf16>
    %20 = vector.shape_cast %19 : vector<1x40x64xbf16> to vector<40x64xbf16>
    %cst_18 = arith.constant dense<0.000000e+00> : vector<40x64xf32>
    %21 = tpu.matmul %18, %20, %cst_18 {dimension_numbers = #tpu.dot_dimension_numbers<[1], [0], [0], [1], [0, 0, 1, 1], [], []>} : vector<40x40xbf16>, vector<40x64xbf16>, vector<40x64xf32> -> vector<40x64xf32>
    %22 = arith.addf %17, %21 : vector<40x64xf32>
    %c10 = arith.constant 10 : index
    %c0_19 = arith.constant 0 : index
    %23 = vector.load %arg6[%c10, %c0_19] : memref<62x40xbf16, #tpu.memory_space<vmem>>, vector<40x40xbf16>
    %c3 = arith.constant 3 : index
    %c0_20 = arith.constant 0 : index
    %c0_21 = arith.constant 0 : index
    %24 = vector.load %arg3[%c3, %c0_20, %c0_21] : memref<9x40x64xbf16, #tpu.memory_space<vmem>>, vector<1x40x64xbf16>
    %25 = vector.shape_cast %24 : vector<1x40x64xbf16> to vector<40x64xbf16>
    %cst_22 = arith.constant dense<0.000000e+00> : vector<40x64xf32>
    %26 = tpu.matmul %23, %25, %cst_22 {dimension_numbers = #tpu.dot_dimension_numbers<[1], [0], [0], [1], [0, 0, 1, 1], [], []>} : vector<40x40xbf16>, vector<40x64xbf16>, vector<40x64xf32> -> vector<40x64xf32>
    %27 = arith.addf %22, %26 : vector<40x64xf32>
    %c11 = arith.constant 11 : index
    %c0_23 = arith.constant 0 : index
    %28 = vector.load %arg6[%c11, %c0_23] : memref<62x40xbf16, #tpu.memory_space<vmem>>, vector<40x40xbf16>
    %c4 = arith.constant 4 : index
    %c0_24 = arith.constant 0 : index
    %c0_25 = arith.constant 0 : index
    %29 = vector.load %arg3[%c4, %c0_24, %c0_25] : memref<9x40x64xbf16, #tpu.memory_space<vmem>>, vector<1x40x64xbf16>
    %30 = vector.shape_cast %29 : vector<1x40x64xbf16> to vector<40x64xbf16>
    %cst_26 = arith.constant dense<0.000000e+00> : vector<40x64xf32>
    %31 = tpu.matmul %28, %30, %cst_26 {dimension_numbers = #tpu.dot_dimension_numbers<[1], [0], [0], [1], [0, 0, 1, 1], [], []>} : vector<40x40xbf16>, vector<40x64xbf16>, vector<40x64xf32> -> vector<40x64xf32>
    %32 = arith.addf %27, %31 : vector<40x64xf32>
    %c12 = arith.constant 12 : index
    %c0_27 = arith.constant 0 : index
    %33 = vector.load %arg6[%c12, %c0_27] : memref<62x40xbf16, #tpu.memory_space<vmem>>, vector<40x40xbf16>
    %c5 = arith.constant 5 : index
    %c0_28 = arith.constant 0 : index
    %c0_29 = arith.constant 0 : index
    %34 = vector.load %arg3[%c5, %c0_28, %c0_29] : memref<9x40x64xbf16, #tpu.memory_space<vmem>>, vector<1x40x64xbf16>
    %35 = vector.shape_cast %34 : vector<1x40x64xbf16> to vector<40x64xbf16>
    %cst_30 = arith.constant dense<0.000000e+00> : vector<40x64xf32>
    %36 = tpu.matmul %33, %35, %cst_30 {dimension_numbers = #tpu.dot_dimension_numbers<[1], [0], [0], [1], [0, 0, 1, 1], [], []>} : vector<40x40xbf16>, vector<40x64xbf16>, vector<40x64xf32> -> vector<40x64xf32>
    %37 = arith.addf %32, %36 : vector<40x64xf32>
    %c20 = arith.constant 20 : index
    %c0_31 = arith.constant 0 : index
    %38 = vector.load %arg6[%c20, %c0_31] : memref<62x40xbf16, #tpu.memory_space<vmem>>, vector<40x40xbf16>
    %c6 = arith.constant 6 : index
    %c0_32 = arith.constant 0 : index
    %c0_33 = arith.constant 0 : index
    %39 = vector.load %arg3[%c6, %c0_32, %c0_33] : memref<9x40x64xbf16, #tpu.memory_space<vmem>>, vector<1x40x64xbf16>
    %40 = vector.shape_cast %39 : vector<1x40x64xbf16> to vector<40x64xbf16>
    %cst_34 = arith.constant dense<0.000000e+00> : vector<40x64xf32>
    %41 = tpu.matmul %38, %40, %cst_34 {dimension_numbers = #tpu.dot_dimension_numbers<[1], [0], [0], [1], [0, 0, 1, 1], [], []>} : vector<40x40xbf16>, vector<40x64xbf16>, vector<40x64xf32> -> vector<40x64xf32>
    %42 = arith.addf %37, %41 : vector<40x64xf32>
    %c21 = arith.constant 21 : index
    %c0_35 = arith.constant 0 : index
    %43 = vector.load %arg6[%c21, %c0_35] : memref<62x40xbf16, #tpu.memory_space<vmem>>, vector<40x40xbf16>
    %c7 = arith.constant 7 : index
    %c0_36 = arith.constant 0 : index
    %c0_37 = arith.constant 0 : index
    %44 = vector.load %arg3[%c7, %c0_36, %c0_37] : memref<9x40x64xbf16, #tpu.memory_space<vmem>>, vector<1x40x64xbf16>
    %45 = vector.shape_cast %44 : vector<1x40x64xbf16> to vector<40x64xbf16>
    %cst_38 = arith.constant dense<0.000000e+00> : vector<40x64xf32>
    %46 = tpu.matmul %43, %45, %cst_38 {dimension_numbers = #tpu.dot_dimension_numbers<[1], [0], [0], [1], [0, 0, 1, 1], [], []>} : vector<40x40xbf16>, vector<40x64xbf16>, vector<40x64xf32> -> vector<40x64xf32>
    %47 = arith.addf %42, %46 : vector<40x64xf32>
    %c22 = arith.constant 22 : index
    %c0_39 = arith.constant 0 : index
    %48 = vector.load %arg6[%c22, %c0_39] : memref<62x40xbf16, #tpu.memory_space<vmem>>, vector<40x40xbf16>
    %c8 = arith.constant 8 : index
    %c0_40 = arith.constant 0 : index
    %c0_41 = arith.constant 0 : index
    %49 = vector.load %arg3[%c8, %c0_40, %c0_41] : memref<9x40x64xbf16, #tpu.memory_space<vmem>>, vector<1x40x64xbf16>
    %50 = vector.shape_cast %49 : vector<1x40x64xbf16> to vector<40x64xbf16>
    %cst_42 = arith.constant dense<0.000000e+00> : vector<40x64xf32>
    %51 = tpu.matmul %48, %50, %cst_42 {dimension_numbers = #tpu.dot_dimension_numbers<[1], [0], [0], [1], [0, 0, 1, 1], [], []>} : vector<40x40xbf16>, vector<40x64xbf16>, vector<40x64xf32> -> vector<40x64xf32>
    %52 = arith.addf %47, %51 : vector<40x64xf32>
    %c0_43 = arith.constant 0 : index
    %c0_44 = arith.constant 0 : index
    %53 = vector.load %arg4[%c0_43, %c0_44] : memref<1x64xf32, #tpu.memory_space<vmem>>, vector<1x64xf32>
    %54 = vector.broadcast %53 : vector<1x64xf32> to vector<40x64xf32>
    %55 = arith.addf %52, %54 : vector<40x64xf32>
    %cst_45 = arith.constant 0.000000e+00 : f32
    %56 = vector.broadcast %cst_45 : f32 to vector<40x64xf32>
    %57 = arith.maximumf %55, %56 : vector<40x64xf32>
    %c0_46 = arith.constant 0 : index
    %c0_47 = arith.constant 0 : index
    %c0_48 = arith.constant 0 : index
    %58 = vector.load %arg5[%c0_46, %c0_47, %c0_48] : memref<1x40x64xf32, #tpu.memory_space<vmem>>, vector<1x40x64xf32>
    %59 = vector.shape_cast %58 : vector<1x40x64xf32> to vector<40x64xf32>
    %60 = vector.shape_cast %57 : vector<40x64xf32> to vector<1x40x64xf32>
    tpu.vector_store %arg5[%c0_46, %c0_47, %c0_48], %60 {strides = array<i32>} : memref<1x40x64xf32, #tpu.memory_space<vmem>>, vector<1x40x64xf32>,
    return
  }
  func.func @transform_0(%arg0: i32, %arg1: i32) -> (i32, i32, i32) {
    %c0_i32 = arith.constant 0 : i32
    %c0_i32_0 = arith.constant 0 : i32
    %c0_i32_1 = arith.constant 0 : i32
    return %arg0, %c0_i32, %c0_i32_0 : i32, i32, i32
  }
  func.func @transform_1(%arg0: i32, %arg1: i32) -> (i32, i32, i32) {
    %c0_i32 = arith.constant 0 : i32
    %c0_i32_0 = arith.constant 0 : i32
    %c0_i32_1 = arith.constant 0 : i32
    %c0_i32_2 = arith.constant 0 : i32
    return %c0_i32, %c0_i32_0, %c0_i32_1 : i32, i32, i32
  }
  func.func @transform_2(%arg0: i32, %arg1: i32) -> (i32, i32) {
    %c0_i32 = arith.constant 0 : i32
    %c0_i32_0 = arith.constant 0 : i32
    %c0_i32_1 = arith.constant 0 : i32
    return %c0_i32, %c0_i32_0 : i32, i32
  }
  func.func @transform_3(%arg0: i32, %arg1: i32) -> (i32, i32, i32) {
    %c0_i32 = arith.constant 0 : i32
    %c0_i32_0 = arith.constant 0 : i32
    return %arg0, %arg1, %c0_i32 : i32, i32, i32
  }
}

module attributes {stable_mosaic.version = 11 : i64} {
  func.func @_conv3d_same_kernel(%arg0: i32, %arg1: i32, %arg2: memref<1x110x80xf32, #tpu.memory_space<vmem>>, %arg3: memref<9x80x64xbf16, #tpu.memory_space<vmem>>, %arg4: memref<1x64xf32, #tpu.memory_space<vmem>>, %arg5: memref<1x40x64xf32, #tpu.memory_space<vmem>>, %arg6: memref<62x80xbf16, #tpu.memory_space<vmem>>) attributes {dimension_semantics = [#tpu.dimension_semantics<parallel>, #tpu.dimension_semantics<parallel>], iteration_bounds = array<i64: 2, 2>, scalar_prefetch = 0 : i64, scratch_operands = 1 : i64, tpu.core_type = #tpu.core_type<tc>, window_params = [{transform_indices = @transform_0, window_bounds = array<i64: 1, 110, 80>}, {pipeline_mode = #tpu.pipeline_mode<synchronous>, transform_indices = @transform_1, window_bounds = array<i64: 9, 80, 64>}, {pipeline_mode = #tpu.pipeline_mode<synchronous>, transform_indices = @transform_2, window_bounds = array<i64: 1, 64>}, {transform_indices = @transform_3, window_bounds = array<i64: 1, 40, 64>}]} {
    %c40_i32 = arith.constant 40 : i32
    %0 = arith.muli %arg1, %c40_i32 : i32
    %1 = tpu.assume_multiple %0, 8 : i32
    %c0 = arith.constant 0 : index
    %2 = arith.index_cast %1 : i32 to index
    %c0_0 = arith.constant 0 : index
    %3 = vector.load %arg2[%c0, %2, %c0_0] : memref<1x110x80xf32, #tpu.memory_space<vmem>>, vector<1x62x80xf32>
    %4 = vector.shape_cast %3 : vector<1x62x80xf32> to vector<62x80xf32>
    %5 = arith.truncf %4 : vector<62x80xf32> to vector<62x80xbf16>
    %c0_1 = arith.constant 0 : index
    %c0_2 = arith.constant 0 : index
    %6 = vector.load %arg6[%c0_1, %c0_2] : memref<62x80xbf16, #tpu.memory_space<vmem>>, vector<62x80xbf16>
    tpu.vector_store %arg6[%c0_1, %c0_2], %5 {strides = array<i32>} : memref<62x80xbf16, #tpu.memory_space<vmem>>, vector<62x80xbf16>,
    %c0_3 = arith.constant 0 : index
    %c0_4 = arith.constant 0 : index
    %7 = vector.load %arg6[%c0_3, %c0_4] : memref<62x80xbf16, #tpu.memory_space<vmem>>, vector<40x80xbf16>
    %c0_5 = arith.constant 0 : index
    %c0_6 = arith.constant 0 : index
    %c0_7 = arith.constant 0 : index
    %8 = vector.load %arg3[%c0_5, %c0_6, %c0_7] : memref<9x80x64xbf16, #tpu.memory_space<vmem>>, vector<1x80x64xbf16>
    %9 = vector.shape_cast %8 : vector<1x80x64xbf16> to vector<80x64xbf16>
    %cst = arith.constant dense<0.000000e+00> : vector<40x64xf32>
    %10 = tpu.matmul %7, %9, %cst {dimension_numbers = #tpu.dot_dimension_numbers<[1], [0], [0], [1], [0, 0, 1, 1], [], []>} : vector<40x80xbf16>, vector<80x64xbf16>, vector<40x64xf32> -> vector<40x64xf32>
    %c1 = arith.constant 1 : index
    %c0_8 = arith.constant 0 : index
    %11 = vector.load %arg6[%c1, %c0_8] : memref<62x80xbf16, #tpu.memory_space<vmem>>, vector<40x80xbf16>
    %c1_9 = arith.constant 1 : index
    %c0_10 = arith.constant 0 : index
    %c0_11 = arith.constant 0 : index
    %12 = vector.load %arg3[%c1_9, %c0_10, %c0_11] : memref<9x80x64xbf16, #tpu.memory_space<vmem>>, vector<1x80x64xbf16>
    %13 = vector.shape_cast %12 : vector<1x80x64xbf16> to vector<80x64xbf16>
    %cst_12 = arith.constant dense<0.000000e+00> : vector<40x64xf32>
    %14 = tpu.matmul %11, %13, %cst_12 {dimension_numbers = #tpu.dot_dimension_numbers<[1], [0], [0], [1], [0, 0, 1, 1], [], []>} : vector<40x80xbf16>, vector<80x64xbf16>, vector<40x64xf32> -> vector<40x64xf32>
    %15 = arith.addf %10, %14 : vector<40x64xf32>
    %c2 = arith.constant 2 : index
    %c0_13 = arith.constant 0 : index
    %16 = vector.load %arg6[%c2, %c0_13] : memref<62x80xbf16, #tpu.memory_space<vmem>>, vector<40x80xbf16>
    %c2_14 = arith.constant 2 : index
    %c0_15 = arith.constant 0 : index
    %c0_16 = arith.constant 0 : index
    %17 = vector.load %arg3[%c2_14, %c0_15, %c0_16] : memref<9x80x64xbf16, #tpu.memory_space<vmem>>, vector<1x80x64xbf16>
    %18 = vector.shape_cast %17 : vector<1x80x64xbf16> to vector<80x64xbf16>
    %cst_17 = arith.constant dense<0.000000e+00> : vector<40x64xf32>
    %19 = tpu.matmul %16, %18, %cst_17 {dimension_numbers = #tpu.dot_dimension_numbers<[1], [0], [0], [1], [0, 0, 1, 1], [], []>} : vector<40x80xbf16>, vector<80x64xbf16>, vector<40x64xf32> -> vector<40x64xf32>
    %20 = arith.addf %15, %19 : vector<40x64xf32>
    %c10 = arith.constant 10 : index
    %c0_18 = arith.constant 0 : index
    %21 = vector.load %arg6[%c10, %c0_18] : memref<62x80xbf16, #tpu.memory_space<vmem>>, vector<40x80xbf16>
    %c3 = arith.constant 3 : index
    %c0_19 = arith.constant 0 : index
    %c0_20 = arith.constant 0 : index
    %22 = vector.load %arg3[%c3, %c0_19, %c0_20] : memref<9x80x64xbf16, #tpu.memory_space<vmem>>, vector<1x80x64xbf16>
    %23 = vector.shape_cast %22 : vector<1x80x64xbf16> to vector<80x64xbf16>
    %cst_21 = arith.constant dense<0.000000e+00> : vector<40x64xf32>
    %24 = tpu.matmul %21, %23, %cst_21 {dimension_numbers = #tpu.dot_dimension_numbers<[1], [0], [0], [1], [0, 0, 1, 1], [], []>} : vector<40x80xbf16>, vector<80x64xbf16>, vector<40x64xf32> -> vector<40x64xf32>
    %25 = arith.addf %20, %24 : vector<40x64xf32>
    %c11 = arith.constant 11 : index
    %c0_22 = arith.constant 0 : index
    %26 = vector.load %arg6[%c11, %c0_22] : memref<62x80xbf16, #tpu.memory_space<vmem>>, vector<40x80xbf16>
    %c4 = arith.constant 4 : index
    %c0_23 = arith.constant 0 : index
    %c0_24 = arith.constant 0 : index
    %27 = vector.load %arg3[%c4, %c0_23, %c0_24] : memref<9x80x64xbf16, #tpu.memory_space<vmem>>, vector<1x80x64xbf16>
    %28 = vector.shape_cast %27 : vector<1x80x64xbf16> to vector<80x64xbf16>
    %cst_25 = arith.constant dense<0.000000e+00> : vector<40x64xf32>
    %29 = tpu.matmul %26, %28, %cst_25 {dimension_numbers = #tpu.dot_dimension_numbers<[1], [0], [0], [1], [0, 0, 1, 1], [], []>} : vector<40x80xbf16>, vector<80x64xbf16>, vector<40x64xf32> -> vector<40x64xf32>
    %30 = arith.addf %25, %29 : vector<40x64xf32>
    %c12 = arith.constant 12 : index
    %c0_26 = arith.constant 0 : index
    %31 = vector.load %arg6[%c12, %c0_26] : memref<62x80xbf16, #tpu.memory_space<vmem>>, vector<40x80xbf16>
    %c5 = arith.constant 5 : index
    %c0_27 = arith.constant 0 : index
    %c0_28 = arith.constant 0 : index
    %32 = vector.load %arg3[%c5, %c0_27, %c0_28] : memref<9x80x64xbf16, #tpu.memory_space<vmem>>, vector<1x80x64xbf16>
    %33 = vector.shape_cast %32 : vector<1x80x64xbf16> to vector<80x64xbf16>
    %cst_29 = arith.constant dense<0.000000e+00> : vector<40x64xf32>
    %34 = tpu.matmul %31, %33, %cst_29 {dimension_numbers = #tpu.dot_dimension_numbers<[1], [0], [0], [1], [0, 0, 1, 1], [], []>} : vector<40x80xbf16>, vector<80x64xbf16>, vector<40x64xf32> -> vector<40x64xf32>
    %35 = arith.addf %30, %34 : vector<40x64xf32>
    %c20 = arith.constant 20 : index
    %c0_30 = arith.constant 0 : index
    %36 = vector.load %arg6[%c20, %c0_30] : memref<62x80xbf16, #tpu.memory_space<vmem>>, vector<40x80xbf16>
    %c6 = arith.constant 6 : index
    %c0_31 = arith.constant 0 : index
    %c0_32 = arith.constant 0 : index
    %37 = vector.load %arg3[%c6, %c0_31, %c0_32] : memref<9x80x64xbf16, #tpu.memory_space<vmem>>, vector<1x80x64xbf16>
    %38 = vector.shape_cast %37 : vector<1x80x64xbf16> to vector<80x64xbf16>
    %cst_33 = arith.constant dense<0.000000e+00> : vector<40x64xf32>
    %39 = tpu.matmul %36, %38, %cst_33 {dimension_numbers = #tpu.dot_dimension_numbers<[1], [0], [0], [1], [0, 0, 1, 1], [], []>} : vector<40x80xbf16>, vector<80x64xbf16>, vector<40x64xf32> -> vector<40x64xf32>
    %40 = arith.addf %35, %39 : vector<40x64xf32>
    %c21 = arith.constant 21 : index
    %c0_34 = arith.constant 0 : index
    %41 = vector.load %arg6[%c21, %c0_34] : memref<62x80xbf16, #tpu.memory_space<vmem>>, vector<40x80xbf16>
    %c7 = arith.constant 7 : index
    %c0_35 = arith.constant 0 : index
    %c0_36 = arith.constant 0 : index
    %42 = vector.load %arg3[%c7, %c0_35, %c0_36] : memref<9x80x64xbf16, #tpu.memory_space<vmem>>, vector<1x80x64xbf16>
    %43 = vector.shape_cast %42 : vector<1x80x64xbf16> to vector<80x64xbf16>
    %cst_37 = arith.constant dense<0.000000e+00> : vector<40x64xf32>
    %44 = tpu.matmul %41, %43, %cst_37 {dimension_numbers = #tpu.dot_dimension_numbers<[1], [0], [0], [1], [0, 0, 1, 1], [], []>} : vector<40x80xbf16>, vector<80x64xbf16>, vector<40x64xf32> -> vector<40x64xf32>
    %45 = arith.addf %40, %44 : vector<40x64xf32>
    %c22 = arith.constant 22 : index
    %c0_38 = arith.constant 0 : index
    %46 = vector.load %arg6[%c22, %c0_38] : memref<62x80xbf16, #tpu.memory_space<vmem>>, vector<40x80xbf16>
    %c8 = arith.constant 8 : index
    %c0_39 = arith.constant 0 : index
    %c0_40 = arith.constant 0 : index
    %47 = vector.load %arg3[%c8, %c0_39, %c0_40] : memref<9x80x64xbf16, #tpu.memory_space<vmem>>, vector<1x80x64xbf16>
    %48 = vector.shape_cast %47 : vector<1x80x64xbf16> to vector<80x64xbf16>
    %cst_41 = arith.constant dense<0.000000e+00> : vector<40x64xf32>
    %49 = tpu.matmul %46, %48, %cst_41 {dimension_numbers = #tpu.dot_dimension_numbers<[1], [0], [0], [1], [0, 0, 1, 1], [], []>} : vector<40x80xbf16>, vector<80x64xbf16>, vector<40x64xf32> -> vector<40x64xf32>
    %50 = arith.addf %45, %49 : vector<40x64xf32>
    %c0_42 = arith.constant 0 : index
    %c0_43 = arith.constant 0 : index
    %51 = vector.load %arg4[%c0_42, %c0_43] : memref<1x64xf32, #tpu.memory_space<vmem>>, vector<1x64xf32>
    %52 = vector.broadcast %51 : vector<1x64xf32> to vector<40x64xf32>
    %53 = arith.addf %50, %52 : vector<40x64xf32>
    %cst_44 = arith.constant 0.000000e+00 : f32
    %54 = vector.broadcast %cst_44 : f32 to vector<40x64xf32>
    %55 = arith.maximumf %53, %54 : vector<40x64xf32>
    %c0_45 = arith.constant 0 : index
    %c0_46 = arith.constant 0 : index
    %c0_47 = arith.constant 0 : index
    %56 = vector.load %arg5[%c0_45, %c0_46, %c0_47] : memref<1x40x64xf32, #tpu.memory_space<vmem>>, vector<1x40x64xf32>
    %57 = vector.shape_cast %56 : vector<1x40x64xf32> to vector<40x64xf32>
    %58 = vector.shape_cast %55 : vector<40x64xf32> to vector<1x40x64xf32>
    tpu.vector_store %arg5[%c0_45, %c0_46, %c0_47], %58 {strides = array<i32>} : memref<1x40x64xf32, #tpu.memory_space<vmem>>, vector<1x40x64xf32>,
    return
  }
  func.func @transform_0(%arg0: i32, %arg1: i32) -> (i32, i32, i32) {
    %c0_i32 = arith.constant 0 : i32
    %c0_i32_0 = arith.constant 0 : i32
    %c0_i32_1 = arith.constant 0 : i32
    return %arg0, %c0_i32, %c0_i32_0 : i32, i32, i32
  }
  func.func @transform_1(%arg0: i32, %arg1: i32) -> (i32, i32, i32) {
    %c0_i32 = arith.constant 0 : i32
    %c0_i32_0 = arith.constant 0 : i32
    %c0_i32_1 = arith.constant 0 : i32
    %c0_i32_2 = arith.constant 0 : i32
    return %c0_i32, %c0_i32_0, %c0_i32_1 : i32, i32, i32
  }
  func.func @transform_2(%arg0: i32, %arg1: i32) -> (i32, i32) {
    %c0_i32 = arith.constant 0 : i32
    %c0_i32_0 = arith.constant 0 : i32
    %c0_i32_1 = arith.constant 0 : i32
    return %c0_i32, %c0_i32_0 : i32, i32
  }
  func.func @transform_3(%arg0: i32, %arg1: i32) -> (i32, i32, i32) {
    %c0_i32 = arith.constant 0 : i32
    %c0_i32_0 = arith.constant 0 : i32
    return %arg0, %arg1, %c0_i32 : i32, i32, i32
  }
}

module attributes {stable_mosaic.version = 11 : i64} {
  func.func @_conv3d_same_kernel(%arg0: i32, %arg1: i32, %arg2: memref<1x110x80xf32, #tpu.memory_space<vmem>>, %arg3: memref<9x80x32xbf16, #tpu.memory_space<vmem>>, %arg4: memref<1x32xf32, #tpu.memory_space<vmem>>, %arg5: memref<1x40x32xf32, #tpu.memory_space<vmem>>, %arg6: memref<62x80xbf16, #tpu.memory_space<vmem>>) attributes {dimension_semantics = [#tpu.dimension_semantics<parallel>, #tpu.dimension_semantics<parallel>], iteration_bounds = array<i64: 2, 2>, scalar_prefetch = 0 : i64, scratch_operands = 1 : i64, tpu.core_type = #tpu.core_type<tc>, window_params = [{transform_indices = @transform_0, window_bounds = array<i64: 1, 110, 80>}, {pipeline_mode = #tpu.pipeline_mode<synchronous>, transform_indices = @transform_1, window_bounds = array<i64: 9, 80, 32>}, {pipeline_mode = #tpu.pipeline_mode<synchronous>, transform_indices = @transform_2, window_bounds = array<i64: 1, 32>}, {transform_indices = @transform_3, window_bounds = array<i64: 1, 40, 32>}]} {
    %c40_i32 = arith.constant 40 : i32
    %0 = arith.muli %arg1, %c40_i32 : i32
    %1 = tpu.assume_multiple %0, 8 : i32
    %c0 = arith.constant 0 : index
    %2 = arith.index_cast %1 : i32 to index
    %c0_0 = arith.constant 0 : index
    %3 = vector.load %arg2[%c0, %2, %c0_0] : memref<1x110x80xf32, #tpu.memory_space<vmem>>, vector<1x62x80xf32>
    %4 = vector.shape_cast %3 : vector<1x62x80xf32> to vector<62x80xf32>
    %5 = arith.truncf %4 : vector<62x80xf32> to vector<62x80xbf16>
    %c0_1 = arith.constant 0 : index
    %c0_2 = arith.constant 0 : index
    %6 = vector.load %arg6[%c0_1, %c0_2] : memref<62x80xbf16, #tpu.memory_space<vmem>>, vector<62x80xbf16>
    tpu.vector_store %arg6[%c0_1, %c0_2], %5 {strides = array<i32>} : memref<62x80xbf16, #tpu.memory_space<vmem>>, vector<62x80xbf16>,
    %c0_3 = arith.constant 0 : index
    %c0_4 = arith.constant 0 : index
    %7 = vector.load %arg6[%c0_3, %c0_4] : memref<62x80xbf16, #tpu.memory_space<vmem>>, vector<40x80xbf16>
    %c0_5 = arith.constant 0 : index
    %c0_6 = arith.constant 0 : index
    %c0_7 = arith.constant 0 : index
    %8 = vector.load %arg3[%c0_5, %c0_6, %c0_7] : memref<9x80x32xbf16, #tpu.memory_space<vmem>>, vector<1x80x32xbf16>
    %9 = vector.shape_cast %8 : vector<1x80x32xbf16> to vector<80x32xbf16>
    %cst = arith.constant dense<0.000000e+00> : vector<40x32xf32>
    %10 = tpu.matmul %7, %9, %cst {dimension_numbers = #tpu.dot_dimension_numbers<[1], [0], [0], [1], [0, 0, 1, 1], [], []>} : vector<40x80xbf16>, vector<80x32xbf16>, vector<40x32xf32> -> vector<40x32xf32>
    %c1 = arith.constant 1 : index
    %c0_8 = arith.constant 0 : index
    %11 = vector.load %arg6[%c1, %c0_8] : memref<62x80xbf16, #tpu.memory_space<vmem>>, vector<40x80xbf16>
    %c1_9 = arith.constant 1 : index
    %c0_10 = arith.constant 0 : index
    %c0_11 = arith.constant 0 : index
    %12 = vector.load %arg3[%c1_9, %c0_10, %c0_11] : memref<9x80x32xbf16, #tpu.memory_space<vmem>>, vector<1x80x32xbf16>
    %13 = vector.shape_cast %12 : vector<1x80x32xbf16> to vector<80x32xbf16>
    %cst_12 = arith.constant dense<0.000000e+00> : vector<40x32xf32>
    %14 = tpu.matmul %11, %13, %cst_12 {dimension_numbers = #tpu.dot_dimension_numbers<[1], [0], [0], [1], [0, 0, 1, 1], [], []>} : vector<40x80xbf16>, vector<80x32xbf16>, vector<40x32xf32> -> vector<40x32xf32>
    %15 = arith.addf %10, %14 : vector<40x32xf32>
    %c2 = arith.constant 2 : index
    %c0_13 = arith.constant 0 : index
    %16 = vector.load %arg6[%c2, %c0_13] : memref<62x80xbf16, #tpu.memory_space<vmem>>, vector<40x80xbf16>
    %c2_14 = arith.constant 2 : index
    %c0_15 = arith.constant 0 : index
    %c0_16 = arith.constant 0 : index
    %17 = vector.load %arg3[%c2_14, %c0_15, %c0_16] : memref<9x80x32xbf16, #tpu.memory_space<vmem>>, vector<1x80x32xbf16>
    %18 = vector.shape_cast %17 : vector<1x80x32xbf16> to vector<80x32xbf16>
    %cst_17 = arith.constant dense<0.000000e+00> : vector<40x32xf32>
    %19 = tpu.matmul %16, %18, %cst_17 {dimension_numbers = #tpu.dot_dimension_numbers<[1], [0], [0], [1], [0, 0, 1, 1], [], []>} : vector<40x80xbf16>, vector<80x32xbf16>, vector<40x32xf32> -> vector<40x32xf32>
    %20 = arith.addf %15, %19 : vector<40x32xf32>
    %c10 = arith.constant 10 : index
    %c0_18 = arith.constant 0 : index
    %21 = vector.load %arg6[%c10, %c0_18] : memref<62x80xbf16, #tpu.memory_space<vmem>>, vector<40x80xbf16>
    %c3 = arith.constant 3 : index
    %c0_19 = arith.constant 0 : index
    %c0_20 = arith.constant 0 : index
    %22 = vector.load %arg3[%c3, %c0_19, %c0_20] : memref<9x80x32xbf16, #tpu.memory_space<vmem>>, vector<1x80x32xbf16>
    %23 = vector.shape_cast %22 : vector<1x80x32xbf16> to vector<80x32xbf16>
    %cst_21 = arith.constant dense<0.000000e+00> : vector<40x32xf32>
    %24 = tpu.matmul %21, %23, %cst_21 {dimension_numbers = #tpu.dot_dimension_numbers<[1], [0], [0], [1], [0, 0, 1, 1], [], []>} : vector<40x80xbf16>, vector<80x32xbf16>, vector<40x32xf32> -> vector<40x32xf32>
    %25 = arith.addf %20, %24 : vector<40x32xf32>
    %c11 = arith.constant 11 : index
    %c0_22 = arith.constant 0 : index
    %26 = vector.load %arg6[%c11, %c0_22] : memref<62x80xbf16, #tpu.memory_space<vmem>>, vector<40x80xbf16>
    %c4 = arith.constant 4 : index
    %c0_23 = arith.constant 0 : index
    %c0_24 = arith.constant 0 : index
    %27 = vector.load %arg3[%c4, %c0_23, %c0_24] : memref<9x80x32xbf16, #tpu.memory_space<vmem>>, vector<1x80x32xbf16>
    %28 = vector.shape_cast %27 : vector<1x80x32xbf16> to vector<80x32xbf16>
    %cst_25 = arith.constant dense<0.000000e+00> : vector<40x32xf32>
    %29 = tpu.matmul %26, %28, %cst_25 {dimension_numbers = #tpu.dot_dimension_numbers<[1], [0], [0], [1], [0, 0, 1, 1], [], []>} : vector<40x80xbf16>, vector<80x32xbf16>, vector<40x32xf32> -> vector<40x32xf32>
    %30 = arith.addf %25, %29 : vector<40x32xf32>
    %c12 = arith.constant 12 : index
    %c0_26 = arith.constant 0 : index
    %31 = vector.load %arg6[%c12, %c0_26] : memref<62x80xbf16, #tpu.memory_space<vmem>>, vector<40x80xbf16>
    %c5 = arith.constant 5 : index
    %c0_27 = arith.constant 0 : index
    %c0_28 = arith.constant 0 : index
    %32 = vector.load %arg3[%c5, %c0_27, %c0_28] : memref<9x80x32xbf16, #tpu.memory_space<vmem>>, vector<1x80x32xbf16>
    %33 = vector.shape_cast %32 : vector<1x80x32xbf16> to vector<80x32xbf16>
    %cst_29 = arith.constant dense<0.000000e+00> : vector<40x32xf32>
    %34 = tpu.matmul %31, %33, %cst_29 {dimension_numbers = #tpu.dot_dimension_numbers<[1], [0], [0], [1], [0, 0, 1, 1], [], []>} : vector<40x80xbf16>, vector<80x32xbf16>, vector<40x32xf32> -> vector<40x32xf32>
    %35 = arith.addf %30, %34 : vector<40x32xf32>
    %c20 = arith.constant 20 : index
    %c0_30 = arith.constant 0 : index
    %36 = vector.load %arg6[%c20, %c0_30] : memref<62x80xbf16, #tpu.memory_space<vmem>>, vector<40x80xbf16>
    %c6 = arith.constant 6 : index
    %c0_31 = arith.constant 0 : index
    %c0_32 = arith.constant 0 : index
    %37 = vector.load %arg3[%c6, %c0_31, %c0_32] : memref<9x80x32xbf16, #tpu.memory_space<vmem>>, vector<1x80x32xbf16>
    %38 = vector.shape_cast %37 : vector<1x80x32xbf16> to vector<80x32xbf16>
    %cst_33 = arith.constant dense<0.000000e+00> : vector<40x32xf32>
    %39 = tpu.matmul %36, %38, %cst_33 {dimension_numbers = #tpu.dot_dimension_numbers<[1], [0], [0], [1], [0, 0, 1, 1], [], []>} : vector<40x80xbf16>, vector<80x32xbf16>, vector<40x32xf32> -> vector<40x32xf32>
    %40 = arith.addf %35, %39 : vector<40x32xf32>
    %c21 = arith.constant 21 : index
    %c0_34 = arith.constant 0 : index
    %41 = vector.load %arg6[%c21, %c0_34] : memref<62x80xbf16, #tpu.memory_space<vmem>>, vector<40x80xbf16>
    %c7 = arith.constant 7 : index
    %c0_35 = arith.constant 0 : index
    %c0_36 = arith.constant 0 : index
    %42 = vector.load %arg3[%c7, %c0_35, %c0_36] : memref<9x80x32xbf16, #tpu.memory_space<vmem>>, vector<1x80x32xbf16>
    %43 = vector.shape_cast %42 : vector<1x80x32xbf16> to vector<80x32xbf16>
    %cst_37 = arith.constant dense<0.000000e+00> : vector<40x32xf32>
    %44 = tpu.matmul %41, %43, %cst_37 {dimension_numbers = #tpu.dot_dimension_numbers<[1], [0], [0], [1], [0, 0, 1, 1], [], []>} : vector<40x80xbf16>, vector<80x32xbf16>, vector<40x32xf32> -> vector<40x32xf32>
    %45 = arith.addf %40, %44 : vector<40x32xf32>
    %c22 = arith.constant 22 : index
    %c0_38 = arith.constant 0 : index
    %46 = vector.load %arg6[%c22, %c0_38] : memref<62x80xbf16, #tpu.memory_space<vmem>>, vector<40x80xbf16>
    %c8 = arith.constant 8 : index
    %c0_39 = arith.constant 0 : index
    %c0_40 = arith.constant 0 : index
    %47 = vector.load %arg3[%c8, %c0_39, %c0_40] : memref<9x80x32xbf16, #tpu.memory_space<vmem>>, vector<1x80x32xbf16>
    %48 = vector.shape_cast %47 : vector<1x80x32xbf16> to vector<80x32xbf16>
    %cst_41 = arith.constant dense<0.000000e+00> : vector<40x32xf32>
    %49 = tpu.matmul %46, %48, %cst_41 {dimension_numbers = #tpu.dot_dimension_numbers<[1], [0], [0], [1], [0, 0, 1, 1], [], []>} : vector<40x80xbf16>, vector<80x32xbf16>, vector<40x32xf32> -> vector<40x32xf32>
    %50 = arith.addf %45, %49 : vector<40x32xf32>
    %c0_42 = arith.constant 0 : index
    %c0_43 = arith.constant 0 : index
    %51 = vector.load %arg4[%c0_42, %c0_43] : memref<1x32xf32, #tpu.memory_space<vmem>>, vector<1x32xf32>
    %52 = vector.broadcast %51 : vector<1x32xf32> to vector<40x32xf32>
    %53 = arith.addf %50, %52 : vector<40x32xf32>
    %c0_44 = arith.constant 0 : index
    %c0_45 = arith.constant 0 : index
    %c0_46 = arith.constant 0 : index
    %54 = vector.load %arg5[%c0_44, %c0_45, %c0_46] : memref<1x40x32xf32, #tpu.memory_space<vmem>>, vector<1x40x32xf32>
    %55 = vector.shape_cast %54 : vector<1x40x32xf32> to vector<40x32xf32>
    %56 = vector.shape_cast %53 : vector<40x32xf32> to vector<1x40x32xf32>
    tpu.vector_store %arg5[%c0_44, %c0_45, %c0_46], %56 {strides = array<i32>} : memref<1x40x32xf32, #tpu.memory_space<vmem>>, vector<1x40x32xf32>,
    return
  }
  func.func @transform_0(%arg0: i32, %arg1: i32) -> (i32, i32, i32) {
    %c0_i32 = arith.constant 0 : i32
    %c0_i32_0 = arith.constant 0 : i32
    %c0_i32_1 = arith.constant 0 : i32
    return %arg0, %c0_i32, %c0_i32_0 : i32, i32, i32
  }
  func.func @transform_1(%arg0: i32, %arg1: i32) -> (i32, i32, i32) {
    %c0_i32 = arith.constant 0 : i32
    %c0_i32_0 = arith.constant 0 : i32
    %c0_i32_1 = arith.constant 0 : i32
    %c0_i32_2 = arith.constant 0 : i32
    return %c0_i32, %c0_i32_0, %c0_i32_1 : i32, i32, i32
  }
  func.func @transform_2(%arg0: i32, %arg1: i32) -> (i32, i32) {
    %c0_i32 = arith.constant 0 : i32
    %c0_i32_0 = arith.constant 0 : i32
    %c0_i32_1 = arith.constant 0 : i32
    return %c0_i32, %c0_i32_0 : i32, i32
  }
  func.func @transform_3(%arg0: i32, %arg1: i32) -> (i32, i32, i32) {
    %c0_i32 = arith.constant 0 : i32
    %c0_i32_0 = arith.constant 0 : i32
    return %arg0, %arg1, %c0_i32 : i32, i32, i32
  }
}

</mosaic_0001>

<bundles_post_ra>
// kernel: projector_forward.3
= control target key start
LH: loop header
LB: loop body
LE: loop exit
PB: predicated region body
PF: predicated region fallthrough
CT: control target
= control target key end

     0   :  { %s1891_s12 = smov 0   ;;  %s1893_s13 = smov 0   ;;  %s2240_s0 = inlined_call_operand.vmem [shape: f32[2,110,40], index: 0, kind: input, shape index: {}]   ;;  %s2241_s1 = inlined_call_operand.vmem [shape: bf16[9,40,64], index: 1, kind: input, shape index: {}]   ;;  %s2242_s2 = inlined_call_operand.vmem [shape: f32[1,64], index: 2, kind: input, shape index: {}]   ;;  %s2243_s3 = inlined_call_operand.vmem [shape: f32[2,80,64], index: 3, kind: output, shape index: {}]  }
   0x1   :  { %s1895_s14 = smov 0   ;;  %s1897_s15 = smov 0  }
   0x2   :  { %s1899_s16 = smov 0  }
   0x3 LB: > { %s22_s17 = sadd.s32 1, %s1859_s14  ;;  %s25_s18 = sadd.s32 1, %s1863_s15  ;;  %s1867_s16 = sphi %s1899_s16, %s13_s16   ;;  %s1863_s15 = sphi %s1897_s15, %s2247_s15   ;;  %s1859_s14 = sphi %s1895_s14, %s2246_s14   ;;  %s1855_s13 = sphi %s1893_s13, %s2245_s13   ;;  %s1851_s12 = sphi %s1891_s12, %s2244_s12  }
   0x4   : > { %p23_p0 = scmp.ge.s32.totalorder %s22_s17, 2  ;;  %p1393_p1 = scmp.ge.s32.totalorder %s1867_s16, 1 }
   0x5   : > { %p151_p2 = scmp.lt.s32.totalorder %s1867_s16, 5 }
   0x6   : > { %s2249_s17 = smov (%p23_p0, %s22_s17), 0  ;;  %s2251_s18 = smov (!%p23_p0, %s25_s18), %s1863_s15 }
   0x7   : > { %p152_p3 = pnand %p1393_p1, %p151_p2  ;;  %p27_p4 = scmp.ge.s32.totalorder %s2251_s18, 2 }
   0x8   : > { %v1790_v0 = vld [vmem:[%s2241_s1 + $0x14] sm:$0xff] (!%p152_p3)   ;;  %v1869_v1 = vmov (!%p152_p3), 0.0   ;;  %v1791_v2 = vld [vmem:[%s2241_s1 + $0x1c] sm:$0xff] (!%p152_p3)   ;;  %p179_p5 = scmp.lt.s32.totalorder (!%p152_p3), %s1855_s13, 1  ;;  %v1792_v3 = vld [vmem:[%s2241_s1 + $0x24] ss:$0 sps:$4 sm:$0xff] (!%p152_p3)  }
   0x9   : > { %s2253_s18 = smov (%p27_p4, %s2251_s18), 0  ;;  %155 = sbr.rel (%p152_p3) target bundleno = 367 (0x16f), region = 32 }
   0xa   : > { %1740 = vmatprep.subr.bf16.mxu1 (!%p152_p3), %v1869_v1  ;;  %1578 = vmatprep.subr.bf16.mxu0 (!%p152_p3), %v1869_v1  ;;  %vm336_vm0 = vcmask (!%p152_p3), 1043456   ;;  %vm1870_vm1 = vmmov (!%p152_p3), 0   ;;  %s195_s25 = smul.u32 (!%p152_p3), 40, %s1851_s12  ;;  %vm245_vm2 = vcmask (!%p152_p3), 322560   ;;  %vm326_vm3 = vcmask (!%p152_p3), 326656   ;;  %v1794_v39 = vld [vmem:[%s2241_s1] sm:$0xff] (!%p152_p3)  }
   0xb   : > { %1743 = vmatpush3.bf16.msra.mxu1 (!%p152_p3), %v1790_v0  ;;  %1579 = vmatpush3.bf16.msra.mxu0 (!%p152_p3), %v1790_v0  ;;  %v338_v4 = vsel (!%p152_p3), %vm336_vm0, %v1792_v3, 0  ;;  %vm287_vm4 = vsmask.f32 (!%p152_p3), 7424  ;;  %v1797_v44 = vld [vmem:[%s2241_s1 + $0x28] sm:$0xff] (!%p152_p3)   ;;  %v1800_v48 = vld [vmem:[%s2241_s1 + $0x10] ss:$0 sps:$4 sm:$0xff] (!%p152_p3)  }
   0xc   : > { %1741 = vmatprep.subr.bf16.mxu1 (!%p152_p3), %v1869_v1  ;;  %1580 = vmatprep.subr.bf16.mxu0 (!%p152_p3), %v1869_v1  ;;  %v1798_v47 = vld [vmem:[%s2241_s1 + $0x8] sm:$0xff] (!%p152_p3)   ;;  %v1799_v49 = vld [vmem:[%s2241_s1 + $0x30] sm:$0xff] (!%p152_p3)   ;;  %v1801_v51 = vld [vmem:[%s2241_s1 + $0x38] ss:$0 sps:$4 sm:$0xff] (!%p152_p3)   ;;  %v420_v53 = vsel (!%p152_p3), %vm336_vm0, %v1800_v48, 0  ;;  %vm253_vm5 = vcmask (!%p152_p3), 321536  }
   0xd   : > { %1592 = vmatprep.mubr.msk.bf16.mxu1 (!%p152_p3), %vm1870_vm1, %v1869_v1  ;;  %1584 = vmatprep.mubr.msk.bf16.mxu0 (!%p152_p3), %vm1870_vm1, %v1869_v1  ;;  %v519_v57 = vsel (!%p152_p3), %vm336_vm0, %v1801_v51, 0  ;;  %v1802_v59 = vld [vmem:[%s2241_s1 + $0x3c] sm:$0xff] (!%p152_p3)   ;;  %vm488_vm6 = vcmask (!%p152_p3), 1046528   ;;  %v1805_v63 = vld [vmem:[%s2241_s1 + $0x44] sm:$0xff] (!%p152_p3)   ;;  %v1807_v0 = vld [vmem:[%s2241_s1 + $0x4c] ss:$0 sps:$4 sm:$0xff] (!%p152_p3)  }
   0xe   : > { %v1804_v3 = vld [vmem:[%s2241_s1 + $0x50] sm:$0xff] (!%p152_p3)   ;;  %vm712_vm7 = vsmask.f32 (!%p152_p3), 6400  ;;  %vm837_vm8 = vcmask (!%p152_p3), 1045504   ;;  %vm1061_vm9 = vsmask.f32 (!%p152_p3), 5376 }
   0xf   : > { %1744 = vmatpush3.bf16.msra.mxu1 (!%p152_p3), %v1791_v2  ;;  %1581 = vmatpush3.bf16.msra.mxu0 (!%p152_p3), %v1791_v2  ;;  %vm1186_vm10 = vcmask (!%p152_p3), 1044480   ;;  %s184_s19 = smul.u32 (!%p152_p3), 5, %s1851_s12  ;;  %vm1297_vm11 = vcmask (!%p152_p3), 523264  }
  0x10   : > { %s2255_s13 = smov (!%p179_p5, %s1855_s13), 1  ;;  %1742 = vmatprep.subr.bf16.mxu1 %v1869_v1  ;;  %1582 = vmatprep.subr.bf16.mxu0 %v1869_v1 }
  0x11   : > { %s1746_s26 = smul.u32 112, %s2255_s13  ;;  %p187_p6 = scmp.lt.s32.totalorder %s184_s19, 9 }
  0x12   : > { %s1747_s20 = smul.u32 10, %s2255_s13 }
  0x13   : > { %s183_s29 = scalar_lea.vmem %s2240_s0, %s1746_s26  ;;  %1745 = vmatpush3.bf16.msra.mxu1 %v338_v4  ;;  %1583 = vmatpush3.bf16.msra.mxu0 %v338_v4  ;;  %v639_v4 = vsel %vm336_vm0, %v1807_v0, 0  ;;  %s2257_s19 = smov (!%p187_p6, %s184_s19), 9 }
  0x14   : > { %s1954_s30 = scalar_lea.vmem %s183_s29, %s195_s25  ;;  %1596 = vmatprep.subr.bf16.mxu1 %v1869_v1  ;;  %1614 = vmatprep.subr.bf16.mxu0 %v1869_v1  ;;  %s190_s12 = sadd.s32 %s1747_s20, %s2257_s19 }
  0x15   : > { %v201_v5 = vld [vmem:[%s1954_s30 + $0x20] sm:$0xff]  ;;  %v202_v6 = vld [vmem:[%s1954_s30 + $0x28] sm:$0xff]  ;;  %v199_v11 = vld [vmem:[%s1954_s30 + $0x10] sm:$0xff]  ;;  %s1395_s23 = sshll.u32 %s190_s12, 3 }
  0x16   : > { %v197_v7 = vld [vmem:[%s1954_s30] sm:$0xff]  ;;  %v209_v8 = vmax.f32 %v201_v5, 0.0  ;;  %v210_v9 = vmax.f32 %v202_v6, 0.0  ;;  %v198_v10 = vld [vmem:[%s1954_s30 + $0x8] sm:$0xff]  ;;  %v200_v12 = vld [vmem:[%s1954_s30 + $0x18] sm:$0xff]  ;;  %v207_v15 = vmax.f32 %v199_v11, 0.0  ;;  %s2213_s25 = scalar_lea.vmem %s2243_s3, %s1395_s23 }
  0x17   : > { %v205_v13 = vmax.f32 %v197_v7, 0.0  ;;  %v206_v14 = vmax.f32 %v198_v10, 0.0  ;;  %v208_v16 = vmax.f32 %v200_v12, 0.0  ;;  %v203_v23 = vld [vmem:[%s1954_s30 + $0x30] sm:$0xff]  ;;  %v204_v56 = vld [vmem:[%s1954_s30 + $0x38] sm:$0x3f] }
  0x18   : > { %v1520_v17 = vpack.c.bf16 %v209_v8, %v209_v8  ;;  %v1521_v18 = vpack.c.bf16 %v210_v9, %v210_v9  ;;  %v1518_v21 = vpack.c.bf16 %v207_v15, %v207_v15  ;;  %v211_v24 = vmax.f32 %v203_v23, 0.0  ;;  %v1806_v6 = vld [vmem:[%s2241_s1 + $0x58] sm:$0xff]   ;;  %v1808_v7 = vld [vmem:[%s2241_s1 + $0x60] ss:$0 sps:$4 sm:$0xff]  }
  0x19   : > { %v1516_v19 = vpack.c.bf16 %v205_v13, %v205_v13  ;;  %v1517_v20 = vpack.c.bf16 %v206_v14, %v206_v14  ;;  %v1519_v22 = vpack.c.bf16 %v208_v16, %v208_v16  ;;  %v212_v58 = vmax.f32 %v204_v56, 0.0 }
  0x1a   : > { %250 = vst.msk [vmem:[#allocation2 + $0x10] sm:$0xf] %vm245_vm2, %v1520_v17  ;;  %251 = vst.msk [vmem:[#allocation2 + $0x14] sm:$0xf] %vm245_vm2, %v1521_v18  ;;  %v1522_v28 = vpack.c.bf16 %v211_v24, %v211_v24  ;;  %v764_v12 = vsel %vm336_vm0, %v1808_v7, 0 }
  0x1b   : > { %246 = vst.msk [vmem:[#allocation2] sm:$0xf] %vm245_vm2, %v1516_v19  ;;  %247 = vst.msk [vmem:[#allocation2 + $0x4] sm:$0xf] %vm245_vm2, %v1517_v20  ;;  %v1523_v60 = vpack.c.bf16 %v212_v58, %v212_v58 }
  0x1c   : > { %248 = vst.msk [vmem:[#allocation2 + $0x8] sm:$0xf] %vm245_vm2, %v1518_v21  ;;  %249 = vst.msk [vmem:[#allocation2 + $0xc] sm:$0xf] %vm245_vm2, %v1519_v22 }
  0x1d   : > { %252 = vst.msk [vmem:[#allocation2 + $0x18] sm:$0xf] %vm245_vm2, %v1522_v28 }
  0x1e   : > { %254 = vst.msk [vmem:[#allocation2 + $0x1c] sm:$0x7] %vm253_vm5, %v1523_v60 }
  0x21   : > { %v1971_v25 = vld [vmem:[#allocation2 + $0x10] sm:$0xf]  ;;  %v265_v26 = vld [vmem:[#allocation2 + $0x14] sm:$0x1] }
  0x22   : > { %v255_v27 = vld [vmem:[#allocation2] sm:$0xf]  ;;  %v1974_v29 = vcombine.low %v1971_v25, %v265_v26  ;;  %v256_v30 = vld [vmem:[#allocation2 + $0x4] sm:$0xf]  ;;  %v1418_v11 = vcombine.low %v1971_v25, %v1971_v25  ;;  %v586_v23 = vld [vmem:[#allocation2 + $0x14] sm:$0xf] }
  0x23   : > { %v1409_v31 = vcombine.low %v255_v27, %v256_v30  ;;  %v1976_v32 = vld [vmem:[#allocation2 + $0x8] sm:$0xff]   ;;  %v478_v52 = vld [vmem:[#allocation2] sm:$0xe]  ;;  %v582_v8 = vld [vmem:[#allocation2 + $0x4] sm:$0xe] }
  0x24   : > { %v304_v33 = vshll.u32 %v1974_v29, 16  ;;  %v308_v34 = vshrl.u32 %v1974_v29, 16  ;;  %v296_v37 = vshll.u32 %v1976_v32, 16  ;;  %v300_v45 = vshrl.u32 %v1976_v32, 16  ;;  %v2056_v9 = vld [vmem:[#allocation2 + $0x8] sm:$0xf] }
  0x25   : > { %v289_v35 = vshrl.u32 %v1409_v31, 16  ;;  %v291_v36 = vshll.u32 %v1409_v31, 16  ;;  %v1430_v55 = vcombine.low %v478_v52, %v256_v30  ;;  %v490_v62 = vrot.slane %v1976_v32, 1  ;;  %v2064_v13 = vld [vmem:[#allocation2 + $0xc] sm:$0xff]   ;;  %v702_v19 = vld [vmem:[#allocation2 + $0x18] sm:$0x3] }
  0x26   : > { %v306_v38 = vrot.slane %v304_v33, 1  ;;  %v298_v41 = vrot.slane %v296_v37, 1  ;;  %v492_v5 = vrot.slane %v1974_v29, 1  ;;  %v1442_v14 = vcombine.low %v582_v8, %v2056_v9  ;;  %v587_v24 = vld [vmem:[#allocation2 + $0x18] sm:$0x1]  ;;  %v1811_v30 = vld [vmem:[%s2241_s1 + $0x64] sm:$0xff]  }
  0x27   : > { %v293_v40 = vrot.slane %v291_v36, 1  ;;  %v489_v61 = vrot.slane %v1430_v55, 1  ;;  %v722_v15 = vshrl.u32 %v2064_v13, 16  ;;  %v725_v18 = vshll.u32 %v2064_v13, 16  ;;  %v1815_v37 = vld [vmem:[%s2241_s1 + $0x6c] sm:$0xff]  }
  0x28   : > { %v310_v42 = vor.u32 %v308_v34, %v306_v38  ;;  %v302_v50 = vor.u32 %v300_v45, %v298_v41  ;;  %v493_v10 = vsel %vm488_vm6, %v490_v62, %v492_v5  ;;  %v714_v16 = vshrl.u32 %v1442_v14, 16  ;;  %v827_v48 = vld [vmem:[#allocation2 + $0x4] sm:$0xc]  ;;  %v931_v52 = vld [vmem:[#allocation2 + $0x8] sm:$0xc] }
  0x29   : > { %v294_v43 = vor.u32 %v293_v40, %v289_v35  ;;  %v491_v2 = vsel %vm488_vm6, %v489_v61, %v490_v62  ;;  %v717_v17 = vshll.u32 %v1442_v14, 16  ;;  %v609_v20 = vrot.slane %v1442_v14, 1  ;;  %v1812_v40 = vld [vmem:[%s2241_s1 + $0x78] sm:$0xff]  }
  0x2a   : > { %1593 = vmatmul.mubr.msk.bf16.vlgmr.msra.gmra.mrb[0].mxu1 %vm326_vm3, %v310_v42  ;;  %v307_v54 = vsel %vm287_vm4, %v302_v50, %v306_v38  ;;  %v610_v21 = vrot.slane %v2064_v13, 1  ;;  %v724_v22 = vrot.slane %v722_v15, 1  ;;  %v716_v25 = vrot.slane %v714_v16, 1  ;;  %v1817_v38 = vld [vmem:[%s2241_s1 + $0x74] ss:$0 sps:$4 sm:$0xff]  }
  0x2b   : > { %1597 = vmatpush3.bf16.msra.mxu1 %v1794_v39  ;;  %v299_v46 = vsel %vm287_vm4, %v294_v43, %v298_v41  ;;  %1602 = vmatprep.mubr.msk.bf16.mxu1 %vm1870_vm1, %v1869_v1  ;;  %v719_v26 = vrot.slane %v717_v17, 2  ;;  %v727_v27 = vrot.slane %v725_v18, 2  ;;  %v2077_v28 = vcombine.low %v586_v23, %v702_v19  ;;  %v935_v62 = vld [vmem:[#allocation2 + $0x18] sm:$0xf]  ;;  %v1051_v16 = vld [vmem:[#allocation2 + $0x1c] sm:$0x7] }
  0x2c   : > { %1585 = vmatmul.mubr.msk.bf16.vlgmr.msra.gmra.mrb[0].mxu0 %vm326_vm3, %v299_v46  ;;  %1598 = vmatprep.subr.bf16.mxu1 %v1869_v1  ;;  %v611_v29 = vsel %vm488_vm6, %v609_v20, %v610_v21  ;;  %v1816_v46 = vld [vmem:[%s2241_s1 + $0x80] sm:$0xff]   ;;  %v1468_v51 = vcombine.low %v827_v48, %v2056_v9  ;;  %v839_v55 = vrot.slane %v2064_v13, 2  ;;  %v1494_v20 = vcombine.low %v935_v62, %v1051_v16 }
  0x2d   : > { %1615 = vmatpush3.bf16.msra.mxu0 %v1797_v44  ;;  %1588 = vmatprep.mubr.msk.bf16.mxu0 %vm1870_vm1, %v1869_v1  ;;  %v728_v33 = vor.u32 %v727_v27, %v724_v22  ;;  %v731_v34 = vshrl.u32 %v2077_v28, 16  ;;  %v734_v35 = vshll.u32 %v2077_v28, 16  ;;  %v868_v44 = vsel %vm336_vm0, %v1817_v38, 0 }
  0x2e   : > { %1616 = vmatprep.subr.bf16.mxu0 %v1869_v1  ;;  %v841_v0 = vrot.slane %v2077_v28, 2  ;;  %v1080_v27 = vshrl.u32 %v1494_v20, 16  ;;  %v1083_v28 = vshll.u32 %v1494_v20, 16  ;;  %v1190_v38 = vrot.slane %v1494_v20, 3 }
  0x2f   : > { %1599 = vmatpush3.bf16.msra.mxu1 %v1798_v47  ;;  %v733_v41 = vrot.slane %v731_v34, 1  ;;  %v736_v42 = vrot.slane %v734_v35, 2  ;;  %v1818_v47 = vld [vmem:[%s2241_s1 + $0x88] ss:$0 sps:$4 sm:$0xff]  }
  0x30   : > { %1600 = vmatprep.subr.bf16.mxu1 %v1869_v1  ;;  %v988_v50 = vsel %vm336_vm0, %v1818_v47, 0  ;;  %v842_v7 = vsel %vm837_vm8, %v839_v55, %v841_v0 }
  0x31   : > { %1617 = vmatpush3.bf16.msra.mxu0 %v1799_v49  ;;  %v737_v45 = vor.u32 %v736_v42, %v733_v41 }
  0x32   : > { %1618 = vmatprep.subr.bf16.mxu0 %v1869_v1 }
  0x33   : > { %1601 = vmatpush3.bf16.msra.mxu1 %v420_v53  ;;  %v738_v49 = vsel %vm712_vm7, %v728_v33, %v737_v45  ;;  %v2128_v53 = vld [vmem:[#allocation2 + $0xc] sm:$0xf] }
  0x34   : > { %1589 = vmatmul.mubr.msk.bf16.gmra.mrb[4].mxu0 %vm326_vm3, %v307_v54  ;;  %1632 = vmatprep.subr.bf16.mxu1 %v1869_v1  ;;  %v838_v54 = vrot.slane %v1468_v51, 2  ;;  %v1480_v56 = vcombine.low %v931_v52, %v2128_v53 }
  0x35   : > { %1619 = vmatpush3.bf16.msra.mxu0 %v519_v57  ;;  %1620 = vmatprep.mubr.msk.bf16.mxu0 %vm1870_vm1, %v1869_v1  ;;  %v2134_v57 = vld [vmem:[#allocation2 + $0x10] sm:$0xff]  }
  0x36   : > { %1603 = vmatmul.mubr.msk.bf16.vlgmr.msra.gmra.mrb[4].mxu1 %vm326_vm3, %v1409_v31  ;;  %1650 = vmatprep.subr.bf16.mxu0 %v1869_v1  ;;  %v1444_v31 = vcombine.low %v586_v23, %v587_v24  ;;  %v840_v58 = vsel %vm837_vm8, %v838_v54, %v839_v55  ;;  %v958_v60 = vrot.slane %v1480_v56, 2  ;;  %v959_v61 = vrot.slane %v2134_v57, 2  ;;  %v1176_v24 = vld [vmem:[#allocation2 + $0x8] sm:$0x8] }
  0x37   : > { %1633 = vmatpush3.bf16.msra.mxu1 %v1802_v59  ;;  %1606 = vmatprep.mubr.msk.bf16.mxu1 %vm1870_vm1, %v1869_v1  ;;  %v1819_v59 = vld [vmem:[%s2241_s1 + $0x8c] sm:$0xff]   ;;  %v1066_v13 = vshll.u32 %v1480_v56, 16  ;;  %v1071_v14 = vshrl.u32 %v2134_v57, 16  ;;  %v1074_v15 = vshll.u32 %v2134_v57, 16  ;;  %v1188_v34 = vrot.slane %v2134_v57, 3 }
  0x38   : > { %1634 = vmatprep.subr.bf16.mxu1 %v1869_v1  ;;  %v612_v36 = vrot.slane %v1444_v31, 1  ;;  %v1082_v31 = vrot.slane %v1080_v27, 2 }
  0x39   : > { %v1073_v22 = vrot.slane %v1071_v14, 2  ;;  %v1076_v23 = vrot.slane %v1074_v15, 3 }
  0x3a   : > { %v613_v43 = vsel %vm488_vm6, %v610_v21, %v612_v36  ;;  %v1068_v21 = vrot.slane %v1066_v13, 3 }
  0x3b   : > { %1635 = vmatpush3.bf16.msra.mxu1 %v1805_v63  ;;  %v936_v63 = vld [vmem:[#allocation2 + $0x1c] sm:$0x3] }
  0x3c   : > { %1621 = vmatmul.mubr.msk.bf16.vlgmr.msra.gmra.mrb[8].mxu0 %vm326_vm3, %v491_v2  ;;  %1636 = vmatprep.subr.bf16.mxu1 %v1869_v1  ;;  %v1823_v2 = vld [vmem:[%s2241_s1 + $0x94] sm:$0xff]  }
  0x3d   : > { %1651 = vmatpush3.bf16.msra.mxu0 %v1804_v3  ;;  %1624 = vmatprep.mubr.msk.bf16.mxu0 %vm1870_vm1, %v1869_v1  ;;  %v1827_v3 = vld [vmem:[%s2241_s1 + $0x9c] ss:$0 sps:$4 sm:$0xff]  }
  0x3e   : > { %1607 = vmatmul.mubr.msk.bf16.gmra.mrb[8].mxu1 %vm326_vm3, %v1976_v32  ;;  %1652 = vmatprep.subr.bf16.mxu0 %v1869_v1  ;;  %v720_v32 = vor.u32 %v719_v26, %v716_v25  ;;  %v1113_v8 = vsel %vm336_vm0, %v1827_v3, 0  ;;  %v1077_v26 = vor.u32 %v1076_v23, %v1073_v22 }
  0x3f   : > { %1610 = vmatprep.mubr.msk.bf16.mxu1 %vm1870_vm1, %v1869_v1  ;;  %1637 = vmatpush3.bf16.msra.mxu1 %v639_v4  ;;  %v960_v4 = vsel %vm837_vm8, %v958_v60, %v959_v61 }
  0x40   : > { %1668 = vmatprep.subr.bf16.mxu1 %v1869_v1  ;;  %v729_v39 = vsel %vm712_vm7, %v720_v32, %v728_v33  ;;  %v1085_v32 = vrot.slane %v1083_v28, 3 }
  0x41   : > { %1653 = vmatpush3.bf16.msra.mxu0 %v1806_v6  ;;  %v1482_v6 = vcombine.low %v935_v62, %v936_v63 }
  0x42   : > { %1654 = vmatprep.subr.bf16.mxu0 %v1869_v1  ;;  %v1086_v35 = vor.u32 %v1085_v32, %v1082_v31 }
  0x43   : > { %v961_v9 = vrot.slane %v1482_v6, 2 }
  0x44   : > { %1625 = vmatmul.mubr.msk.bf16.gmra.mrb[12].mxu0 %vm326_vm3, %v493_v10  ;;  %v1826_v10 = vld [vmem:[%s2241_s1 + $0xa8] sm:$0xff]  }
  0x45   : > { %1628 = vmatprep.mubr.msk.bf16.mxu0 %vm1870_vm1, %v1869_v1  ;;  %1655 = vmatpush3.bf16.msra.mxu0 %v764_v12  ;;  %v1063_v12 = vshrl.u32 %v1480_v56, 16  ;;  %v962_v17 = vsel %vm837_vm8, %v959_v61, %v961_v9 }
  0x46   : > { %1611 = vmatmul.mubr.msk.bf16.gmra.mrb[12].mxu1 %vm326_vm3, %v1418_v11  ;;  %1686 = vmatprep.subr.bf16.mxu0 %v1869_v1  ;;  %v1828_v11 = vld [vmem:[%s2241_s1 + $0xb0] ss:$0 sps:$4 sm:$0xff]  }
  0x47   : > { %1638 = vmatprep.mubr.msk.bf16.mxu1 %vm1870_vm1, %v1869_v1  ;;  %v1217_v18 = vsel %vm336_vm0, %v1828_v11, 0  ;;  %v1065_v19 = vrot.slane %v1063_v12, 2 }
  0x49   : > { %v1069_v25 = vor.u32 %v1068_v21, %v1065_v19 }
  0x4c   : > { %1629 = vmatmul.mubr.msk.bf16.gmra.mrb[16].mxu0 %vm326_vm3, %v492_v5  ;;  %v1822_v5 = vld [vmem:[%s2241_s1 + $0xa0] sm:$0xff]  }
  0x4d   : > { %1656 = vmatprep.mubr.msk.bf16.mxu0 %vm1870_vm1, %v1869_v1 }
  0x4e   : > { %1639 = vmatmul.mubr.msk.bf16.vlgmr.msra.gmra.mrb[16].mxu1 %vm326_vm3, %v611_v29  ;;  %v1506_v29 = vcombine.low %v1176_v24, %v2128_v53 }
  0x4f   : > { %1669 = vmatpush3.bf16.msra.mxu1 %v1811_v30  ;;  %1642 = vmatprep.mubr.msk.bf16.mxu1 %vm1870_vm1, %v1869_v1  ;;  %v1078_v30 = vsel %vm1061_vm9, %v1069_v25, %v1077_v26 }
  0x50   : > { %1670 = vmatprep.subr.bf16.mxu1 %v1869_v1  ;;  %v1187_v33 = vrot.slane %v1506_v29, 3 }
  0x53   : > { %1671 = vmatpush3.bf16.msra.mxu1 %v1815_v37  ;;  %v1087_v37 = vsel %vm1061_vm9, %v1077_v26, %v1086_v35 }
  0x54   : > { %1657 = vmatmul.mubr.msk.bf16.vlgmr.msra.gmra.mrb[20].mxu0 %vm326_vm3, %v729_v39  ;;  %1672 = vmatprep.subr.bf16.mxu1 %v1869_v1  ;;  %v1191_v39 = vsel %vm1186_vm10, %v1188_v34, %v1190_v38 }
  0x55   : > { %1687 = vmatpush3.bf16.msra.mxu0 %v1812_v40  ;;  %1660 = vmatprep.mubr.msk.bf16.mxu0 %vm1870_vm1, %v1869_v1 }
  0x56   : > { %1643 = vmatmul.mubr.msk.bf16.gmra.mrb[20].mxu1 %vm326_vm3, %v613_v43  ;;  %1688 = vmatprep.subr.bf16.mxu0 %v1869_v1 }
  0x57   : > { %1646 = vmatprep.mubr.msk.bf16.mxu1 %vm1870_vm1, %v1869_v1  ;;  %1673 = vmatpush3.bf16.msra.mxu1 %v868_v44 }
  0x58   : > { %1704 = vmatprep.subr.bf16.mxu1 %v1869_v1 }
  0x59   : > { %1689 = vmatpush3.bf16.msra.mxu0 %v1816_v46 }
  0x5a   : > { %1690 = vmatprep.subr.bf16.mxu0 %v1869_v1 }
  0x5c   : > { %1661 = vmatmul.mubr.msk.bf16.gmra.mrb[24].mxu0 %vm326_vm3, %v738_v49 }
  0x5d   : > { %1664 = vmatprep.mubr.msk.bf16.mxu0 %vm1870_vm1, %v1869_v1  ;;  %1691 = vmatpush3.bf16.msra.mxu0 %v988_v50 }
  0x5e   : > { %1647 = vmatmul.mubr.msk.bf16.gmra.mrb[24].mxu1 %vm326_vm3, %v612_v36  ;;  %1722 = vmatprep.subr.bf16.mxu0 %v1869_v1  ;;  %v1189_v36 = vsel %vm1186_vm10, %v1187_v33, %v1188_v34 }
  0x5f   : > { %1674 = vmatprep.mubr.msk.bf16.mxu1 %vm1870_vm1, %v1869_v1 }
  0x64   : > { %1665 = vmatmul.mubr.msk.bf16.gmra.mrb[28].mxu0 %vm326_vm3, %v737_v45 }
  0x65   : > { %1692 = vmatprep.mubr.msk.bf16.mxu0 %vm1870_vm1, %v1869_v1 }
  0x66   : > { %1675 = vmatmul.mubr.msk.bf16.vlgmr.msra.gmra.mrb[28].mxu1 %vm326_vm3, %v840_v58 }
  0x67   : > { %1705 = vmatpush3.bf16.msra.mxu1 %v1819_v59  ;;  %1678 = vmatprep.mubr.msk.bf16.mxu1 %vm1870_vm1, %v1869_v1 }
  0x68   : > { %1706 = vmatprep.subr.bf16.mxu1 %v1869_v1 }
  0x6b   : > { %1707 = vmatpush3.bf16.msra.mxu1 %v1823_v2 }
  0x6c   : > { %1693 = vmatmul.mubr.msk.bf16.vlgmr.msra.gmra.mrb[32].mxu0 %vm326_vm3, %v960_v4  ;;  %1708 = vmatprep.subr.bf16.mxu1 %v1869_v1 }
  0x6d   : > { %1723 = vmatpush3.bf16.msra.mxu0 %v1822_v5  ;;  %1696 = vmatprep.mubr.msk.bf16.mxu0 %vm1870_vm1, %v1869_v1 }
  0x6e   : > { %1679 = vmatmul.mubr.msk.bf16.gmra.mrb[32].mxu1 %vm326_vm3, %v842_v7  ;;  %1724 = vmatprep.subr.bf16.mxu0 %v1869_v1 }
  0x6f   : > { %1682 = vmatprep.mubr.msk.bf16.mxu1 %vm1870_vm1, %v1869_v1  ;;  %1709 = vmatpush3.bf16.msra.mxu1 %v1113_v8 }
  0x71   : > { %1725 = vmatpush3.bf16.msra.mxu0 %v1826_v10 }
  0x72   : > { %1726 = vmatprep.subr.bf16.mxu0 %v1869_v1 }
  0x74   : > { %1697 = vmatmul.mubr.msk.bf16.gmra.mrb[36].mxu0 %vm326_vm3, %v962_v17 }
  0x75   : > { %1700 = vmatprep.mubr.msk.bf16.mxu0 %vm1870_vm1, %v1869_v1  ;;  %1727 = vmatpush3.bf16.msra.mxu0 %v1217_v18 }
  0x76   : > { %1683 = vmatmul.mubr.msk.bf16.gmra.mrb[36].mxu1 %vm326_vm3, %v841_v0 }
  0x77   : > { %1710 = vmatprep.mubr.msk.bf16.mxu1 %vm1870_vm1, %v1869_v1 }
  0x7c   : > { %1701 = vmatmul.mubr.msk.bf16.gmra.mrb[40].mxu0 %vm326_vm3, %v961_v9 }
  0x7d   : > { %1728 = vmatprep.mubr.msk.bf16.mxu0 %vm1870_vm1, %v1869_v1 }
  0x7e   : > { %1711 = vmatmul.mubr.msk.bf16.vlgmr.msra.gmra.mrb[40].mxu1 %vm326_vm3, %v1078_v30 }
  0x7f   : > { %1714 = vmatprep.mubr.msk.bf16.mxu1 %vm1870_vm1, %v1869_v1 }
  0x84   : > { %1729 = vmatmul.mubr.msk.bf16.vlgmr.msra.gmra.mrb[44].mxu0 %vm326_vm3, %v1189_v36 }
  0x85   : > { %1732 = vmatprep.mubr.msk.bf16.mxu0 %vm1870_vm1, %v1869_v1 }
  0x86   : > { %1715 = vmatmul.mubr.msk.bf16.gmra.mrb[44].mxu1 %vm326_vm3, %v1087_v37 }
  0x87   : > { %1718 = vmatprep.mubr.msk.bf16.mxu1 %vm1870_vm1, %v1869_v1 }
  0x8c   : > { %1733 = vmatmul.mubr.msk.bf16.gmra.mrb[48].mxu0 %vm326_vm3, %v1191_v39 }
  0x8d   : > { %1736 = vmatprep.mubr.msk.bf16.mxu0 %vm1870_vm1, %v1869_v1 }
  0x8e   : > { %1719 = vmatmul.mubr.msk.bf16.gmra.mrb[48].mxu1 %vm326_vm3, %v1086_v35 }
  0x94   : > { %1737 = vmatmul.mubr.msk.bf16.gmra.mrb[52].mxu0 %vm326_vm3, %v1190_v38 }
  0xfd   : > { %v390_v40 = vpop.f32.mrb[0].mxu1 }
  0xfe   : > { %v1594_v41 = vpop.f32.mrb[1].mxu1 }
  0xff   : > { %v374_v42 = vpop.f32.mrb[0].mxu0  ;;  %v393_v43 = vpop.f32.mrb[2].mxu1 }
 0x100   : > { %v1586_v44 = vpop.f32.mrb[1].mxu0  ;;  %v1595_v45 = vpop.f32.mrb[3].mxu1 }
 0x101   : > { %v377_v46 = vpop.f32.mrb[2].mxu0 }
 0x102   : > { %v1587_v47 = vpop.f32.mrb[3].mxu0 }
 0x107   : > { %v382_v48 = vpop.f32.mrb[4].mxu0 }
 0x108   : > { %v1590_v49 = vpop.f32.mrb[5].mxu0 }
 0x109   : > { %v385_v50 = vpop.f32.mrb[6].mxu0  ;;  %v456_v51 = vpop.f32.mrb[4].mxu1 }
 0x10a   : > { %v457_v52 = vadd.f32 %v456_v51, %v374_v42  ;;  %v1591_v53 = vpop.f32.mrb[7].mxu0  ;;  %v1604_v54 = vpop.f32.mrb[5].mxu1 }
 0x10b   : > { %v459_v1 = vpop.f32.mrb[6].mxu1 }
 0x10c   : > { %v460_v55 = vadd.f32 %v459_v1, %v377_v46  ;;  %v1605_v56 = vpop.f32.mrb[7].mxu1 }
 0x10f   : > { %v555_v57 = vpop.f32.mrb[8].mxu0 }
 0x110   : > { %v577_v58 = vadd.f32 %v555_v57, %v457_v52  ;;  %v1622_v59 = vpop.f32.mrb[9].mxu0 }
 0x111   : > { %v464_v60 = vpop.f32.mrb[8].mxu1  ;;  %v558_v61 = vpop.f32.mrb[10].mxu0 }
 0x112   : > { %v465_v62 = vadd.f32 %v464_v60, %v382_v48  ;;  %v578_v63 = vadd.f32 %v558_v61, %v460_v55  ;;  %v1608_v0 = vpop.f32.mrb[9].mxu1  ;;  %v1623_v2 = vpop.f32.mrb[11].mxu0 }
 0x113   : > { %v467_v3 = vpop.f32.mrb[10].mxu1 }
 0x114   : > { %v468_v4 = vadd.f32 %v467_v3, %v385_v50  ;;  %v1609_v5 = vpop.f32.mrb[11].mxu1 }
 0x117   : > { %v563_v6 = vpop.f32.mrb[12].mxu0 }
 0x118   : > { %v579_v7 = vadd.f32 %v563_v6, %v465_v62  ;;  %v1626_v8 = vpop.f32.mrb[13].mxu0 }
 0x119   : > { %v472_v9 = vpop.f32.mrb[12].mxu1  ;;  %v566_v10 = vpop.f32.mrb[14].mxu0 }
 0x11a   : > { %v473_v11 = vadd.f32 %v472_v9, %v390_v40  ;;  %v580_v12 = vadd.f32 %v566_v10, %v468_v4  ;;  %v1627_v13 = vpop.f32.mrb[15].mxu0  ;;  %v1612_v14 = vpop.f32.mrb[13].mxu1 }
 0x11b   : > { %v475_v15 = vpop.f32.mrb[14].mxu1 }
 0x11c   : > { %v1613_v16 = vpop.f32.mrb[15].mxu1 }
 0x11f   : > { %v571_v17 = vpop.f32.mrb[16].mxu0 }
 0x120   : > { %v581_v18 = vadd.f32 %v571_v17, %v473_v11  ;;  %v1630_v19 = vpop.f32.mrb[17].mxu0 }
 0x121   : > { %v574_v20 = vpop.f32.mrb[18].mxu0  ;;  %v675_v21 = vpop.f32.mrb[16].mxu1 }
 0x122   : > { %v697_v22 = vadd.f32 %v675_v21, %v577_v58  ;;  %v1631_v23 = vpop.f32.mrb[19].mxu0  ;;  %v1640_v24 = vpop.f32.mrb[17].mxu1 }
 0x123   : > { %v678_v25 = vpop.f32.mrb[18].mxu1 }
 0x124   : > { %v698_v26 = vadd.f32 %v678_v25, %v578_v63  ;;  %v1641_v27 = vpop.f32.mrb[19].mxu1 }
 0x127   : > { %v800_v28 = vpop.f32.mrb[20].mxu0 }
 0x128   : > { %v822_v29 = vadd.f32 %v800_v28, %v697_v22  ;;  %v1658_v30 = vpop.f32.mrb[21].mxu0 }
 0x129   : > { %v683_v31 = vpop.f32.mrb[20].mxu1  ;;  %v803_v32 = vpop.f32.mrb[22].mxu0 }
 0x12a   : > { %v699_v33 = vadd.f32 %v683_v31, %v579_v7  ;;  %v823_v34 = vadd.f32 %v803_v32, %v698_v26  ;;  %v1644_v35 = vpop.f32.mrb[21].mxu1  ;;  %v1659_v36 = vpop.f32.mrb[23].mxu0 }
 0x12b   : > { %v686_v37 = vpop.f32.mrb[22].mxu1 }
 0x12c   : > { %v700_v38 = vadd.f32 %v686_v37, %v580_v12  ;;  %v1645_v39 = vpop.f32.mrb[23].mxu1 }
 0x12f   : > { %v808_v40 = vpop.f32.mrb[24].mxu0 }
 0x130   : > { %v824_v41 = vadd.f32 %v808_v40, %v699_v33  ;;  %v1662_v42 = vpop.f32.mrb[25].mxu0  ;;  %v1513_v33 = vld [vmem:[%s2242_s2] ss:$0 sm:$0xff] }
 0x131   : > { %v691_v43 = vpop.f32.mrb[24].mxu1  ;;  %v811_v44 = vpop.f32.mrb[26].mxu0 }
 0x132   : > { %v701_v45 = vadd.f32 %v691_v43, %v581_v18  ;;  %v825_v46 = vadd.f32 %v811_v44, %v700_v38  ;;  %v1663_v47 = vpop.f32.mrb[27].mxu0  ;;  %v1648_v48 = vpop.f32.mrb[25].mxu1 }
 0x133   : > { %v694_v49 = vpop.f32.mrb[26].mxu1 }
 0x134   : > { %v1649_v50 = vpop.f32.mrb[27].mxu1 }
 0x137   : > { %v816_v51 = vpop.f32.mrb[28].mxu0 }
 0x138   : > { %v826_v52 = vadd.f32 %v816_v51, %v701_v45  ;;  %v1666_v53 = vpop.f32.mrb[29].mxu0 }
 0x139   : > { %v819_v54 = vpop.f32.mrb[30].mxu0  ;;  %v904_v1 = vpop.f32.mrb[28].mxu1 }
 0x13a   : > { %v926_v55 = vadd.f32 %v904_v1, %v822_v29  ;;  %v1667_v56 = vpop.f32.mrb[31].mxu0  ;;  %v1676_v57 = vpop.f32.mrb[29].mxu1 }
 0x13b   : > { %v907_v58 = vpop.f32.mrb[30].mxu1 }
 0x13c   : > { %v927_v59 = vadd.f32 %v907_v58, %v823_v34  ;;  %v1677_v60 = vpop.f32.mrb[31].mxu1 }
 0x13f   : > { %v1024_v61 = vpop.f32.mrb[32].mxu0 }
 0x140   : > { %v1046_v62 = vadd.f32 %v1024_v61, %v926_v55  ;;  %v1694_v63 = vpop.f32.mrb[33].mxu0 }
 0x141   : > { %v912_v0 = vpop.f32.mrb[32].mxu1  ;;  %v1027_v2 = vpop.f32.mrb[34].mxu0 }
 0x142   : > { %v928_v3 = vadd.f32 %v912_v0, %v824_v41  ;;  %v1047_v4 = vadd.f32 %v1027_v2, %v927_v59  ;;  %v1680_v5 = vpop.f32.mrb[33].mxu1  ;;  %v1695_v6 = vpop.f32.mrb[35].mxu0 }
 0x143   : > { %v915_v7 = vpop.f32.mrb[34].mxu1 }
 0x144   : > { %v929_v8 = vadd.f32 %v915_v7, %v825_v46  ;;  %v1681_v9 = vpop.f32.mrb[35].mxu1 }
 0x147   : > { %v1032_v10 = vpop.f32.mrb[36].mxu0 }
 0x148   : > { %v1048_v11 = vadd.f32 %v1032_v10, %v928_v3  ;;  %v1698_v12 = vpop.f32.mrb[37].mxu0 }
 0x149   : > { %v920_v13 = vpop.f32.mrb[36].mxu1  ;;  %v1035_v14 = vpop.f32.mrb[38].mxu0 }
 0x14a   : > { %v930_v15 = vadd.f32 %v920_v13, %v826_v52  ;;  %v1049_v16 = vadd.f32 %v1035_v14, %v929_v8  ;;  %v1699_v17 = vpop.f32.mrb[39].mxu0  ;;  %v1684_v18 = vpop.f32.mrb[37].mxu1 }
 0x14b   : > { %v923_v19 = vpop.f32.mrb[38].mxu1 }
 0x14c   : > { %v1685_v20 = vpop.f32.mrb[39].mxu1 }
 0x14f   : > { %v1040_v21 = vpop.f32.mrb[40].mxu0 }
 0x150   : > { %v1050_v22 = vadd.f32 %v1040_v21, %v930_v15  ;;  %v1702_v23 = vpop.f32.mrb[41].mxu0 }
 0x151   : > { %v1043_v24 = vpop.f32.mrb[42].mxu0  ;;  %v1149_v25 = vpop.f32.mrb[40].mxu1 }
 0x152   : > { %v1171_v26 = vadd.f32 %v1149_v25, %v1046_v62  ;;  %v1703_v27 = vpop.f32.mrb[43].mxu0  ;;  %v1712_v28 = vpop.f32.mrb[41].mxu1 }
 0x153   : > { %v1152_v29 = vpop.f32.mrb[42].mxu1 }
 0x154   : > { %v1172_v30 = vadd.f32 %v1152_v29, %v1047_v4  ;;  %v1713_v31 = vpop.f32.mrb[43].mxu1 }
 0x157   : > { %v1253_v32 = vpop.f32.mrb[44].mxu0 }
 0x158   : > { %v1275_v34 = vadd.f32 %v1253_v32, %v1171_v26  ;;  %v1730_v35 = vpop.f32.mrb[45].mxu0 }
 0x159   : > { %v1157_v36 = vpop.f32.mrb[44].mxu1  ;;  %v1256_v37 = vpop.f32.mrb[46].mxu0 }
 0x15a   : > { %v1287_v38 = vadd.f32 %v1513_v33, %v1275_v34  ;;  %v1173_v39 = vadd.f32 %v1157_v36, %v1048_v11  ;;  %v1276_v40 = vadd.f32 %v1256_v37, %v1172_v30  ;;  %v1716_v41 = vpop.f32.mrb[45].mxu1  ;;  %v1731_v42 = vpop.f32.mrb[47].mxu0 }
 0x15b   : > { %v1160_v43 = vpop.f32.mrb[46].mxu1 }
 0x15c   : > { %v1292_v44 = vmax.f32 %v1287_v38, 0.0  ;;  %v1288_v45 = vadd.f32 %v1513_v33, %v1276_v40  ;;  %v1174_v46 = vadd.f32 %v1160_v43, %v1049_v16  ;;  %v1717_v47 = vpop.f32.mrb[47].mxu1 }
 0x15e   : > { %1298 = vst.msk [vmem:[%s2213_s25] sm:$0xff] %vm1297_vm11, %v1292_v44  ;;  %v1293_v48 = vmax.f32 %v1288_v45, 0.0 }
 0x15f   : > { %v1261_v49 = vpop.f32.mrb[48].mxu0 }
 0x160   : > { %1299 = vst.msk [vmem:[%s2213_s25 + $0x8] sm:$0xff] %vm1297_vm11, %v1293_v48  ;;  %v1277_v50 = vadd.f32 %v1261_v49, %v1173_v39  ;;  %v1734_v51 = vpop.f32.mrb[49].mxu0 }
 0x161   : > { %v1165_v52 = vpop.f32.mrb[48].mxu1  ;;  %v1264_v53 = vpop.f32.mrb[50].mxu0 }
 0x162   : > { %v1289_v54 = vadd.f32 %v1513_v33, %v1277_v50  ;;  %v1175_v1 = vadd.f32 %v1165_v52, %v1050_v22  ;;  %v1278_v55 = vadd.f32 %v1264_v53, %v1174_v46  ;;  %v1735_v56 = vpop.f32.mrb[51].mxu0  ;;  %v1720_v57 = vpop.f32.mrb[49].mxu1 }
 0x163   : > { %v1168_v58 = vpop.f32.mrb[50].mxu1 }
 0x164   : > { %v1294_v59 = vmax.f32 %v1289_v54, 0.0  ;;  %v1290_v60 = vadd.f32 %v1513_v33, %v1278_v55  ;;  %v1721_v61 = vpop.f32.mrb[51].mxu1 }
 0x166   : > { %1300 = vst.msk [vmem:[%s2213_s25 + $0x10] sm:$0xff] %vm1297_vm11, %v1294_v59  ;;  %v1295_v62 = vmax.f32 %v1290_v60, 0.0 }
 0x167   : > { %v1269_v63 = vpop.f32.mrb[52].mxu0 }
 0x168   : > { %1301 = vst.msk [vmem:[%s2213_s25 + $0x18] sm:$0xff] %vm1297_vm11, %v1295_v62  ;;  %v1279_v0 = vadd.f32 %v1269_v63, %v1175_v1  ;;  %v1738_v2 = vpop.f32.mrb[53].mxu0 }
 0x169   : > { %v1272_v3 = vpop.f32.mrb[54].mxu0 }
 0x16a   : > { %v1291_v4 = vadd.f32 %v1513_v33, %v1279_v0  ;;  %v1739_v5 = vpop.f32.mrb[55].mxu0 }
 0x16c   : > { %v1296_v6 = vmax.f32 %v1291_v4, 0.0 }
 0x16e   : > { %1302 = vst.msk [vmem:[%s2213_s25 + $0x20] sm:$0xff] %vm1297_vm11, %v1296_v6 }
 0x16f PF: > { %s13_s16 = sadd.s32 1, %s1867_s16   ;;  %s2244_s12 = smov %s1859_s14 }
 0x170   : > { %p10_p7 = scmp.ge.s32.totalorder %s13_s16, 6   ;;  %s2245_s13 = smov %s1863_s15 }
 0x171   : > { %s2246_s14 = smov %s2249_s17  ;;  %s2247_s15 = smov %s2253_s18 }
 0x172   :  { %12 = sbr.rel (!%p10_p7) target bundleno = 3 (0x3), region = 71 }

// kernel: projector_forward.4
= control target key start
LH: loop header
LB: loop body
LE: loop exit
PB: predicated region body
PF: predicated region fallthrough
CT: control target
= control target key end

     0   :  { %s2170_s12 = smov 0   ;;  %s2172_s13 = smov 0   ;;  %s2588_s0 = inlined_call_operand.vmem [shape: f32[2,110,80], index: 0, kind: input, shape index: {}]   ;;  %s2589_s1 = inlined_call_operand.vmem [shape: bf16[9,80,64], index: 1, kind: input, shape index: {}]   ;;  %s2590_s2 = inlined_call_operand.vmem [shape: f32[1,64], index: 2, kind: input, shape index: {}]   ;;  %s2591_s3 = inlined_call_operand.vmem [shape: f32[2,80,64], index: 3, kind: output, shape index: {}]  }
   0x1   :  { %s2174_s14 = smov 0   ;;  %s2176_s15 = smov 0  }
   0x2   :  { %s2178_s16 = smov 0  }
   0x3 LB: > { %s22_s17 = sadd.s32 1, %s2138_s14  ;;  %s25_s18 = sadd.s32 1, %s2142_s15  ;;  %s2146_s16 = sphi %s2178_s16, %s13_s16   ;;  %s2142_s15 = sphi %s2176_s15, %s2595_s15   ;;  %s2138_s14 = sphi %s2174_s14, %s2594_s14   ;;  %s2134_s13 = sphi %s2172_s13, %s2593_s13   ;;  %s2130_s12 = sphi %s2170_s12, %s2592_s12  }
   0x4   : > { %p23_p0 = scmp.ge.s32.totalorder %s22_s17, 2  ;;  %p1537_p1 = scmp.ge.s32.totalorder %s2146_s16, 1 }
   0x5   : > { %p151_p2 = scmp.lt.s32.totalorder %s2146_s16, 5 }
   0x6   : > { %s2597_s17 = smov (%p23_p0, %s22_s17), 0  ;;  %s2599_s18 = smov (!%p23_p0, %s25_s18), %s2142_s15 }
   0x7   : > { %p152_p3 = pnand %p1537_p1, %p151_p2  ;;  %p27_p4 = scmp.ge.s32.totalorder %s2599_s18, 2 }
   0x8   : > { %v2050_v0 = vld [vmem:[%s2589_s1] sm:$0xff] (!%p152_p3)   ;;  %v2148_v1 = vmov (!%p152_p3), 0.0   ;;  %v2051_v2 = vld [vmem:[%s2589_s1 + $0x8] sm:$0xff] (!%p152_p3)   ;;  %vm2149_vm0 = vmmov (!%p152_p3), 0   ;;  %p179_p5 = scmp.lt.s32.totalorder (!%p152_p3), %s2134_s13, 1  ;;  %v2054_v4 = vld [vmem:[%s2589_s1 + $0x30] sm:$0xff] (!%p152_p3)  }
   0x9   : > { %s2601_s18 = smov (%p27_p4, %s2599_s18), 0  ;;  %155 = sbr.rel (%p152_p3) target bundleno = 358 (0x166), region = 32 }
   0xa   : > { %1820 = vmatprep.subr.bf16.mxu1 (!%p152_p3), %v2148_v1  ;;  %1798 = vmatprep.subr.bf16.mxu0 (!%p152_p3), %v2148_v1  ;;  %v2052_v3 = vld [vmem:[%s2589_s1 + $0x28] sm:$0xff] (!%p152_p3)   ;;  %s195_s27 = smul.u32 (!%p152_p3), 40, %s2130_s12  ;;  %v2053_v5 = vld [vmem:[%s2589_s1 + $0x10] sm:$0xff] (!%p152_p3)   ;;  %v2056_v6 = vld [vmem:[%s2589_s1 + $0x38] sm:$0xff] (!%p152_p3)   ;;  %vm237_vm1 = vcmask (!%p152_p3), 650240   ;;  %vm343_vm2 = vcmask (!%p152_p3), 654336  }
   0xb   : > { %1821 = vmatpush3.bf16.msra.mxu1 (!%p152_p3), %v2050_v0  ;;  %1830 = vmatprep.mubr.msk.bf16.mxu1 (!%p152_p3), %vm2149_vm0, %v2148_v1  ;;  %v2055_v7 = vld [vmem:[%s2589_s1 + $0x18] sm:$0xff] (!%p152_p3)   ;;  %v2058_v10 = vld [vmem:[%s2589_s1 + $0x40] sm:$0xff] (!%p152_p3)   ;;  %v2062_v18 = vld [vmem:[%s2589_s1 + $0x48] sm:$0xff] (!%p152_p3)   ;;  %vm289_vm3 = vsmask.f32 (!%p152_p3), 7424  ;;  %vm518_vm4 = vcmask (!%p152_p3), 1046528  }
   0xc   : > { %1822 = vmatprep.subr.bf16.mxu1 (!%p152_p3), %v2148_v1  ;;  %1808 = vmatprep.mubr.msk.bf16.mxu0 (!%p152_p3), %vm2149_vm0, %v2148_v1  ;;  %v2057_v17 = vld [vmem:[%s2589_s1 + $0x20] sm:$0xff] (!%p152_p3)   ;;  %v2061_v25 = vld [vmem:[%s2589_s1 + $0x78] sm:$0xff] (!%p152_p3)   ;;  %v2065_v37 = vld [vmem:[%s2589_s1 + $0x50] sm:$0xff] (!%p152_p3)   ;;  %vm245_vm5 = vcmask (!%p152_p3), 649216   ;;  %vm918_vm6 = vcmask (!%p152_p3), 1045504   ;;  %vm1318_vm9 = vcmask (!%p152_p3), 1044480  }
   0xd   : > { %1799 = vmatpush3.bf16.msra.mxu0 (!%p152_p3), %v2052_v3  ;;  %v2064_v31 = vld [vmem:[%s2589_s1 + $0x80] sm:$0xff] (!%p152_p3)   ;;  %v2066_v40 = vld [vmem:[%s2589_s1 + $0x88] sm:$0xff] (!%p152_p3)   ;;  %v2067_v43 = vld [vmem:[%s2589_s1 + $0x58] sm:$0xff] (!%p152_p3)   ;;  %vm776_vm7 = vsmask.f32 (!%p152_p3), 6400  ;;  %s184_s9 = smul.u32 (!%p152_p3), 5, %s2130_s12 }
   0xe   : > { %1800 = vmatprep.subr.bf16.mxu0 (!%p152_p3), %v2148_v1  ;;  %v2070_v47 = vld [vmem:[%s2589_s1 + $0x90] sm:$0xff] (!%p152_p3)   ;;  %v2071_v53 = vld [vmem:[%s2589_s1 + $0x60] sm:$0xff] (!%p152_p3)   ;;  %v2072_v56 = vld [vmem:[%s2589_s1 + $0x98] sm:$0xff] (!%p152_p3)   ;;  %vm1176_vm8 = vsmask.f32 (!%p152_p3), 5376  ;;  %vm1441_vm10 = vcmask (!%p152_p3), 523264  }
   0xf   : > { %1823 = vmatpush3.bf16.msra.mxu1 (!%p152_p3), %v2051_v2  ;;  %v2073_v58 = vld [vmem:[%s2589_s1 + $0x68] sm:$0xff] (!%p152_p3)   ;;  %v2077_v3 = vld [vmem:[%s2589_s1 + $0x70] sm:$0xff] (!%p152_p3)   ;;  %p187_p6 = scmp.lt.s32.totalorder (!%p152_p3), %s184_s9, 9 }
  0x10   : > { %s2603_s13 = smov (!%p179_p5, %s2134_s13), 1  ;;  %1824 = vmatprep.subr.bf16.mxu1 %v2148_v1 }
  0x11   : > { %s2006_s30 = smul.u32 112, %s2603_s13  ;;  %1801 = vmatpush3.bf16.msra.mxu0 %v2054_v4  ;;  %s2605_s9 = smov (!%p187_p6, %s184_s9), 9 }
  0x12   : > { %1802 = vmatprep.subr.bf16.mxu0 %v2148_v1  ;;  %s2007_s10 = smul.u32 10, %s2603_s13 }
  0x13   : > { %s183_s8 = scalar_lea.vmem %s2588_s0, %s2006_s30  ;;  %1825 = vmatpush3.bf16.msra.mxu1 %v2053_v5  ;;  %v2076_v5 = vld [vmem:[%s2589_s1 + $0xc8] sm:$0xff]  }
  0x14   : > { %s2240_s11 = scalar_lea.vmem %s183_s8, %s195_s27  ;;  %1826 = vmatprep.subr.bf16.mxu1 %v2148_v1 }
  0x15   : > { %v197_v8 = vld [vmem:[%s2240_s11] sm:$0xff]  ;;  %v198_v9 = vld [vmem:[%s2240_s11 + $0x8] sm:$0xff]  ;;  %v199_v13 = vld [vmem:[%s2240_s11 + $0x10] sm:$0xff]  ;;  %1803 = vmatpush3.bf16.msra.mxu0 %v2056_v6 }
  0x16   : > { %v1718_v11 = vpack.c.bf16 %v197_v8, %v197_v8  ;;  %v1719_v12 = vpack.c.bf16 %v198_v9, %v198_v9  ;;  %v200_v14 = vld [vmem:[%s2240_s11 + $0x18] sm:$0xff]  ;;  %v1720_v15 = vpack.c.bf16 %v199_v13, %v199_v13  ;;  %1804 = vmatprep.subr.bf16.mxu0 %v2148_v1  ;;  %v201_v19 = vld [vmem:[%s2240_s11 + $0x20] sm:$0xff]  ;;  %v202_v20 = vld [vmem:[%s2240_s11 + $0x28] sm:$0xff] }
  0x17   : > { %v1721_v16 = vpack.c.bf16 %v200_v14, %v200_v14  ;;  %1827 = vmatpush3.bf16.msra.mxu1 %v2055_v7  ;;  %v1722_v21 = vpack.c.bf16 %v201_v19, %v201_v19  ;;  %v1723_v22 = vpack.c.bf16 %v202_v20, %v202_v20  ;;  %v203_v44 = vld [vmem:[%s2240_s11 + $0x30] sm:$0xff]  ;;  %v2082_v14 = vld [vmem:[%s2589_s1 + $0xd8] sm:$0xff]  }
  0x18   : > { %238 = vst.msk [vmem:[#allocation2] sm:$0xf] %vm237_vm1, %v1718_v11  ;;  %239 = vst.msk [vmem:[#allocation2 + $0x4] sm:$0xf] %vm237_vm1, %v1719_v12  ;;  %1828 = vmatprep.subr.bf16.mxu1 %v2148_v1  ;;  %v1724_v49 = vpack.c.bf16 %v203_v44, %v203_v44  ;;  %v2078_v9 = vld [vmem:[%s2589_s1 + $0xd0] sm:$0xff]   ;;  %v2079_v12 = vld [vmem:[%s2589_s1 + $0xa0] sm:$0xff]  }
  0x19   : > { %240 = vst.msk [vmem:[#allocation2 + $0x8] sm:$0xf] %vm237_vm1, %v1720_v15  ;;  %241 = vst.msk [vmem:[#allocation2 + $0xc] sm:$0xf] %vm237_vm1, %v1721_v16  ;;  %1805 = vmatpush3.bf16.msra.mxu0 %v2058_v10  ;;  %v2083_v15 = vld [vmem:[%s2589_s1 + $0xa8] sm:$0xff]  }
  0x1a   : > { %1806 = vmatprep.subr.bf16.mxu0 %v2148_v1  ;;  %242 = vst.msk [vmem:[#allocation2 + $0x10] sm:$0xf] %vm237_vm1, %v1722_v21  ;;  %243 = vst.msk [vmem:[#allocation2 + $0x14] sm:$0xf] %vm237_vm1, %v1723_v22  ;;  %v2085_v22 = vld [vmem:[%s2589_s1 + $0xb0] sm:$0xff]  }
  0x1b   : > { %1829 = vmatpush3.bf16.msra.mxu1 %v2057_v17  ;;  %244 = vst.msk [vmem:[#allocation2 + $0x18] sm:$0xf] %vm237_vm1, %v1724_v49  ;;  %v204_v17 = vld [vmem:[%s2240_s11 + $0x38] sm:$0x3f]  ;;  %s190_s11 = sadd.s32 %s2007_s10, %s2605_s9 }
  0x1c   : > { %1864 = vmatprep.subr.bf16.mxu1 %v2148_v1  ;;  %v1725_v19 = vpack.c.bf16 %v204_v17, %v204_v17  ;;  %s1539_s20 = sshll.u32 %s190_s11, 3 }
  0x1d   : > { %1807 = vmatpush3.bf16.msra.mxu0 %v2062_v18  ;;  %v2084_v18 = vld [vmem:[%s2589_s1 + $0xe0] sm:$0xff]   ;;  %s192_s22 = scalar_lea.vmem %s2591_s3, %s1539_s20 }
  0x1e   : > { %1842 = vmatprep.subr.bf16.mxu0 %v2148_v1  ;;  %246 = vst.msk [vmem:[#allocation2 + $0x1c] sm:$0x7] %vm245_vm5, %v1725_v19 }
  0x1f   : > { %v247_v23 = vld [vmem:[#allocation2] sm:$0xf]  ;;  %v2268_v24 = vld [vmem:[#allocation2 + $0x4] sm:$0xf] }
  0x20   : > { %v1558_v26 = vcombine.low %v247_v23, %v2268_v24  ;;  %v2275_v27 = vld [vmem:[#allocation2 + $0x8] sm:$0xff]   ;;  %v624_v48 = vld [vmem:[#allocation2 + $0x4] sm:$0xe]  ;;  %v503_v59 = vld [vmem:[#allocation2] sm:$0xe] }
  0x21   : > { %v298_v30 = vshll.u32 %v2275_v27, 16  ;;  %v251_v34 = vld [vmem:[#allocation2 + $0x10] sm:$0xf]  ;;  %v262_v35 = vld [vmem:[#allocation2 + $0x14] sm:$0x1]  ;;  %v302_v39 = vshrl.u32 %v2275_v27, 16  ;;  %v1588_v2 = vcombine.low %v503_v59, %v2268_v24 }
  0x22   : > { %1831 = vmatmul.mubr.msk.bf16.vlgmr.msra.gmra.mrb[0].mxu1 %vm343_vm2, %v1558_v26  ;;  %v291_v28 = vshrl.u32 %v1558_v26, 16  ;;  %v293_v29 = vshll.u32 %v1558_v26, 16  ;;  %v2288_v38 = vcombine.low %v251_v34, %v262_v35  ;;  %v2312_v50 = vld [vmem:[#allocation2 + $0x8] sm:$0xf]  ;;  %v1569_v52 = vcombine.low %v251_v34, %v251_v34  ;;  %v2324_v55 = vld [vmem:[#allocation2 + $0xc] sm:$0xff]  }
  0x23   : > { %1865 = vmatpush3.bf16.msra.mxu1 %v2061_v25  ;;  %1834 = vmatprep.mubr.msk.bf16.mxu1 %vm2149_vm0, %v2148_v1  ;;  %v300_v33 = vrot.slane %v298_v30, 1  ;;  %v2322_v54 = vcombine.low %v624_v48, %v2312_v50  ;;  %v657_v61 = vrot.slane %v2324_v55, 1  ;;  %v2341_v62 = vld [vmem:[#allocation2 + $0x14] sm:$0xf]  ;;  %v629_v63 = vld [vmem:[#allocation2 + $0x18] sm:$0x1] }
  0x24   : > { %1866 = vmatprep.subr.bf16.mxu1 %v2148_v1  ;;  %v295_v32 = vrot.slane %v293_v29, 1  ;;  %v306_v42 = vshll.u32 %v2288_v38, 16  ;;  %v310_v57 = vshrl.u32 %v2288_v38, 16  ;;  %v1609_v6 = vcombine.low %v2341_v62, %v629_v63  ;;  %v903_v20 = vld [vmem:[#allocation2 + $0x4] sm:$0xc]  ;;  %v2086_v24 = vld [vmem:[%s2589_s1 + $0xe8] sm:$0xff]  }
  0x25   : > { %v304_v45 = vor.u32 %v302_v39, %v300_v33  ;;  %v656_v60 = vrot.slane %v2322_v54, 1  ;;  %v519_v7 = vrot.slane %v1588_v2, 1  ;;  %v520_v8 = vrot.slane %v2275_v27, 1  ;;  %v2087_v25 = vld [vmem:[%s2589_s1 + $0xb8] sm:$0xff]   ;;  %v2435_v48 = vld [vmem:[#allocation2 + $0xc] sm:$0xf] }
  0x26   : > { %v296_v36 = vor.u32 %v295_v32, %v291_v28  ;;  %v308_v46 = vrot.slane %v306_v42, 1  ;;  %v659_v10 = vrot.slane %v1609_v6, 1  ;;  %v522_v16 = vrot.slane %v2288_v38, 1  ;;  %v761_v32 = vld [vmem:[#allocation2 + $0x18] sm:$0x3] }
  0x27   : > { %1867 = vmatpush3.bf16.msra.mxu1 %v2064_v31  ;;  %v658_v4 = vsel %vm518_vm4, %v656_v60, %v657_v61  ;;  %v521_v11 = vsel %vm518_vm4, %v519_v7, %v520_v8  ;;  %v1647_v23 = vcombine.low %v903_v20, %v2312_v50  ;;  %v778_v26 = vshrl.u32 %v2322_v54, 16  ;;  %v2091_v50 = vld [vmem:[%s2589_s1 + $0xf0] sm:$0xff]   ;;  %v1161_v2 = vld [vmem:[#allocation2 + $0x1c] sm:$0x7] }
  0x28   : > { %v301_v41 = vsel %vm289_vm3, %v296_v36, %v300_v33  ;;  %1868 = vmatprep.subr.bf16.mxu1 %v2148_v1  ;;  %v309_v51 = vsel %vm289_vm3, %v304_v45, %v308_v46  ;;  %v312_v0 = vor.u32 %v310_v57, %v308_v46  ;;  %v660_v13 = vsel %vm518_vm4, %v657_v61, %v659_v10  ;;  %v2089_v33 = vld [vmem:[%s2589_s1 + $0xc0] sm:$0xff]   ;;  %v2093_v57 = vld [vmem:[%s2589_s1 + $0xf8] sm:$0xff]   ;;  %v2094_v60 = vld [vmem:[%s2589_s1 + $0x130] sm:$0xff]  }
  0x29   : > { %1809 = vmatmul.mubr.msk.bf16.vlgmr.msra.gmra.mrb[0].mxu0 %vm343_vm2, %v301_v41  ;;  %v523_v21 = vsel %vm518_vm4, %v520_v8, %v522_v16  ;;  %v786_v28 = vshrl.u32 %v2324_v55, 16  ;;  %v789_v29 = vshll.u32 %v2324_v55, 16  ;;  %v919_v30 = vrot.slane %v1647_v23, 2  ;;  %v2090_v45 = vld [vmem:[%s2589_s1 + $0x120] sm:$0xff]   ;;  %v2102_v23 = vld [vmem:[%s2589_s1 + $0x148] sm:$0xff]  }
  0x2a   : > { %1843 = vmatpush3.bf16.msra.mxu0 %v2065_v37  ;;  %1835 = vmatmul.mubr.msk.bf16.gmra.mrb[4].mxu1 %vm343_vm2, %v2275_v27  ;;  %v781_v27 = vshll.u32 %v2322_v54, 16  ;;  %v920_v31 = vrot.slane %v2324_v55, 2  ;;  %v780_v34 = vrot.slane %v778_v26, 1  ;;  %v1628_v38 = vcombine.low %v2341_v62, %v761_v32  ;;  %v2092_v55 = vld [vmem:[%s2589_s1 + $0x128] sm:$0xff]  }
  0x2b   : > { %1844 = vmatprep.subr.bf16.mxu0 %v2148_v1  ;;  %1869 = vmatpush3.bf16.msra.mxu1 %v2066_v40  ;;  %v788_v36 = vrot.slane %v786_v28, 1  ;;  %v791_v37 = vrot.slane %v789_v29, 2  ;;  %v2088_v40 = vld [vmem:[%s2589_s1 + $0x118] sm:$0xff]   ;;  %v2104_v29 = vld [vmem:[%s2589_s1 + $0x150] sm:$0xff]  }
  0x2c   : > { %1812 = vmatprep.mubr.msk.bf16.mxu0 %vm2149_vm0, %v2148_v1  ;;  %1838 = vmatprep.mubr.msk.bf16.mxu1 %vm2149_vm0, %v2148_v1  ;;  %v783_v35 = vrot.slane %v781_v27, 2  ;;  %v921_v39 = vsel %vm918_vm6, %v919_v30, %v920_v31  ;;  %v798_v44 = vshll.u32 %v1628_v38, 16  ;;  %v922_v46 = vrot.slane %v1628_v38, 2 }
  0x2d   : > { %1870 = vmatprep.subr.bf16.mxu1 %v2148_v1  ;;  %v792_v42 = vor.u32 %v791_v37, %v788_v36  ;;  %v1303_v36 = vld [vmem:[#allocation2 + $0x8] sm:$0x8] }
  0x2e   : > { %1845 = vmatpush3.bf16.msra.mxu0 %v2067_v43  ;;  %v784_v41 = vor.u32 %v783_v35, %v780_v34  ;;  %v795_v43 = vshrl.u32 %v1628_v38, 16  ;;  %v923_v54 = vsel %vm918_vm6, %v920_v31, %v922_v46  ;;  %v2106_v31 = vld [vmem:[%s2589_s1 + $0x158] sm:$0xff]   ;;  %v1706_v37 = vcombine.low %v1303_v36, %v2435_v48 }
  0x2f   : > { %1846 = vmatprep.subr.bf16.mxu0 %v2148_v1  ;;  %1871 = vmatpush3.bf16.msra.mxu1 %v2070_v47  ;;  %v1024_v47 = vld [vmem:[#allocation2 + $0x8] sm:$0xc] }
  0x30   : > { %1872 = vmatprep.subr.bf16.mxu1 %v2148_v1  ;;  %v793_v49 = vsel %vm776_vm7, %v784_v41, %v792_v42 }
  0x31   : > { %1813 = vmatmul.mubr.msk.bf16.gmra.mrb[4].mxu0 %vm343_vm2, %v309_v51  ;;  %v797_v51 = vrot.slane %v795_v43, 1 }
  0x32   : > { %1839 = vmatmul.mubr.msk.bf16.gmra.mrb[8].mxu1 %vm343_vm2, %v1569_v52  ;;  %1847 = vmatpush3.bf16.msra.mxu0 %v2071_v53  ;;  %v800_v52 = vrot.slane %v798_v44, 2  ;;  %v2446_v53 = vcombine.low %v1024_v47, %v2435_v48 }
  0x33   : > { %1816 = vmatprep.mubr.msk.bf16.mxu0 %vm2149_vm0, %v2148_v1  ;;  %1848 = vmatprep.subr.bf16.mxu0 %v2148_v1 }
  0x34   : > { %1873 = vmatpush3.bf16.msra.mxu1 %v2072_v56  ;;  %1874 = vmatprep.mubr.msk.bf16.mxu1 %vm2149_vm0, %v2148_v1  ;;  %v2452_v56 = vld [vmem:[#allocation2 + $0x10] sm:$0xff]   ;;  %v1178_v59 = vshrl.u32 %v2446_v53, 16  ;;  %v1181_v61 = vshll.u32 %v2446_v53, 16 }
  0x35   : > { %1908 = vmatprep.subr.bf16.mxu1 %v2148_v1  ;;  %v1186_v62 = vshrl.u32 %v2452_v56, 16  ;;  %v1189_v63 = vshll.u32 %v2452_v56, 16  ;;  %v1320_v34 = vrot.slane %v2452_v56, 3 }
  0x36   : > { %1849 = vmatpush3.bf16.msra.mxu0 %v2073_v58  ;;  %v801_v58 = vor.u32 %v800_v52, %v797_v51  ;;  %v1183_v6 = vrot.slane %v1181_v61, 3 }
  0x37   : > { %1850 = vmatprep.subr.bf16.mxu0 %v2148_v1  ;;  %v1188_v7 = vrot.slane %v1186_v62, 2  ;;  %v1191_v8 = vrot.slane %v1189_v63, 3 }
  0x39   : > { %1817 = vmatmul.mubr.msk.bf16.gmra.mrb[8].mxu0 %vm343_vm2, %v312_v0  ;;  %v1028_v0 = vld [vmem:[#allocation2 + $0x18] sm:$0xf] }
  0x3a   : > { %1875 = vmatmul.mubr.msk.bf16.vlgmr.msra.gmra.mrb[12].mxu1 %vm343_vm2, %v658_v4  ;;  %1851 = vmatpush3.bf16.msra.mxu0 %v2077_v3  ;;  %v802_v3 = vsel %vm776_vm7, %v792_v42, %v801_v58  ;;  %v2095_v4 = vld [vmem:[%s2589_s1 + $0x100] sm:$0xff]  }
  0x3b   : > { %1909 = vmatpush3.bf16.msra.mxu1 %v2076_v5  ;;  %1852 = vmatprep.mubr.msk.bf16.mxu0 %vm2149_vm0, %v2148_v1  ;;  %v1180_v5 = vrot.slane %v1178_v59, 2 }
  0x3c   : > { %1910 = vmatprep.subr.bf16.mxu1 %v2148_v1  ;;  %1886 = vmatprep.subr.bf16.mxu0 %v2148_v1 }
  0x3d   : > { %1878 = vmatprep.mubr.msk.bf16.mxu1 %vm2149_vm0, %v2148_v1 }
  0x3f   : > { %1911 = vmatpush3.bf16.msra.mxu1 %v2078_v9  ;;  %v2478_v9 = vcombine.low %v1028_v0, %v1161_v2 }
  0x40   : > { %1912 = vmatprep.subr.bf16.mxu1 %v2148_v1 }
  0x41   : > { %1853 = vmatmul.mubr.msk.bf16.vlgmr.msra.gmra.mrb[12].mxu0 %vm343_vm2, %v521_v11  ;;  %v2097_v11 = vld [vmem:[%s2589_s1 + $0x108] sm:$0xff]   ;;  %v1322_v35 = vrot.slane %v2478_v9, 3 }
  0x42   : > { %1887 = vmatpush3.bf16.msra.mxu0 %v2079_v12  ;;  %1879 = vmatmul.mubr.msk.bf16.gmra.mrb[16].mxu1 %vm343_vm2, %v660_v13  ;;  %v1184_v12 = vor.u32 %v1183_v6, %v1180_v5  ;;  %v1192_v13 = vor.u32 %v1191_v8, %v1188_v7 }
  0x43   : > { %1888 = vmatprep.subr.bf16.mxu0 %v2148_v1  ;;  %1913 = vmatpush3.bf16.msra.mxu1 %v2082_v14  ;;  %v1195_v14 = vshrl.u32 %v2478_v9, 16  ;;  %v1323_v38 = vsel %vm1318_vm9, %v1320_v34, %v1322_v35 }
  0x44   : > { %1856 = vmatprep.mubr.msk.bf16.mxu0 %vm2149_vm0, %v2148_v1  ;;  %1882 = vmatprep.mubr.msk.bf16.mxu1 %vm2149_vm0, %v2148_v1  ;;  %v1193_v17 = vsel %vm1176_vm8, %v1184_v12, %v1192_v13 }
  0x45   : > { %1914 = vmatprep.subr.bf16.mxu1 %v2148_v1  ;;  %v1197_v19 = vrot.slane %v1195_v14, 2 }
  0x46   : > { %1889 = vmatpush3.bf16.msra.mxu0 %v2083_v15  ;;  %v1198_v15 = vshll.u32 %v2478_v9, 16 }
  0x47   : > { %1890 = vmatprep.subr.bf16.mxu0 %v2148_v1  ;;  %1915 = vmatpush3.bf16.msra.mxu1 %v2084_v18  ;;  %v2100_v18 = vld [vmem:[%s2589_s1 + $0x140] sm:$0xff]  }
  0x48   : > { %1916 = vmatprep.subr.bf16.mxu1 %v2148_v1  ;;  %v1200_v20 = vrot.slane %v1198_v15, 3 }
  0x49   : > { %1857 = vmatmul.mubr.msk.bf16.gmra.mrb[16].mxu0 %vm343_vm2, %v523_v21  ;;  %v1056_v21 = vrot.slane %v2446_v53, 2 }
  0x4a   : > { %1883 = vmatmul.mubr.msk.bf16.gmra.mrb[20].mxu1 %vm343_vm2, %v659_v10  ;;  %1891 = vmatpush3.bf16.msra.mxu0 %v2085_v22  ;;  %v2096_v10 = vld [vmem:[%s2589_s1 + $0x138] sm:$0xff]   ;;  %v1057_v22 = vrot.slane %v2452_v56, 2 }
  0x4b   : > { %1860 = vmatprep.mubr.msk.bf16.mxu0 %vm2149_vm0, %v2148_v1  ;;  %1892 = vmatprep.subr.bf16.mxu0 %v2148_v1 }
  0x4c   : > { %1917 = vmatpush3.bf16.msra.mxu1 %v2086_v24  ;;  %1918 = vmatprep.mubr.msk.bf16.mxu1 %vm2149_vm0, %v2148_v1  ;;  %v1201_v24 = vor.u32 %v1200_v20, %v1197_v19  ;;  %v1058_v26 = vsel %vm918_vm6, %v1056_v21, %v1057_v22 }
  0x4d   : > { %1952 = vmatprep.subr.bf16.mxu1 %v2148_v1 }
  0x4e   : > { %1893 = vmatpush3.bf16.msra.mxu0 %v2087_v25  ;;  %v1029_v25 = vld [vmem:[#allocation2 + $0x1c] sm:$0x3]  ;;  %v1202_v28 = vsel %vm1176_vm8, %v1192_v13, %v1201_v24 }
  0x4f   : > { %1894 = vmatprep.subr.bf16.mxu0 %v2148_v1  ;;  %v1668_v27 = vcombine.low %v1028_v0, %v1029_v25 }
  0x51   : > { %1861 = vmatmul.mubr.msk.bf16.gmra.mrb[20].mxu0 %vm343_vm2, %v522_v16  ;;  %v2101_v16 = vld [vmem:[%s2589_s1 + $0x110] sm:$0xff]   ;;  %v1059_v30 = vrot.slane %v1668_v27, 2 }
  0x52   : > { %1919 = vmatmul.mubr.msk.bf16.vlgmr.msra.gmra.mrb[24].mxu1 %vm343_vm2, %v921_v39  ;;  %1895 = vmatpush3.bf16.msra.mxu0 %v2089_v33  ;;  %v2107_v33 = vld [vmem:[%s2589_s1 + $0x160] sm:$0xff]   ;;  %v1319_v39 = vrot.slane %v1706_v37, 3 }
  0x53   : > { %1953 = vmatpush3.bf16.msra.mxu1 %v2088_v40  ;;  %1896 = vmatprep.mubr.msk.bf16.mxu0 %vm2149_vm0, %v2148_v1  ;;  %v1060_v32 = vsel %vm918_vm6, %v1057_v22, %v1059_v30 }
  0x54   : > { %1954 = vmatprep.subr.bf16.mxu1 %v2148_v1  ;;  %1930 = vmatprep.subr.bf16.mxu0 %v2148_v1  ;;  %v1321_v40 = vsel %vm1318_vm9, %v1319_v39, %v1320_v34 }
  0x55   : > { %1922 = vmatprep.mubr.msk.bf16.mxu1 %vm2149_vm0, %v2148_v1 }
  0x57   : > { %1955 = vmatpush3.bf16.msra.mxu1 %v2090_v45 }
  0x58   : > { %1956 = vmatprep.subr.bf16.mxu1 %v2148_v1 }
  0x59   : > { %1897 = vmatmul.mubr.msk.bf16.vlgmr.msra.gmra.mrb[24].mxu0 %vm343_vm2, %v793_v49 }
  0x5a   : > { %1931 = vmatpush3.bf16.msra.mxu0 %v2091_v50  ;;  %1923 = vmatmul.mubr.msk.bf16.gmra.mrb[28].mxu1 %vm343_vm2, %v923_v54 }
  0x5b   : > { %1932 = vmatprep.subr.bf16.mxu0 %v2148_v1  ;;  %1957 = vmatpush3.bf16.msra.mxu1 %v2092_v55 }
  0x5c   : > { %1900 = vmatprep.mubr.msk.bf16.mxu0 %vm2149_vm0, %v2148_v1  ;;  %1926 = vmatprep.mubr.msk.bf16.mxu1 %vm2149_vm0, %v2148_v1 }
  0x5d   : > { %1958 = vmatprep.subr.bf16.mxu1 %v2148_v1 }
  0x5e   : > { %1933 = vmatpush3.bf16.msra.mxu0 %v2093_v57 }
  0x5f   : > { %1934 = vmatprep.subr.bf16.mxu0 %v2148_v1  ;;  %1959 = vmatpush3.bf16.msra.mxu1 %v2094_v60 }
  0x60   : > { %1960 = vmatprep.subr.bf16.mxu1 %v2148_v1 }
  0x61   : > { %1901 = vmatmul.mubr.msk.bf16.gmra.mrb[28].mxu0 %vm343_vm2, %v802_v3 }
  0x62   : > { %1927 = vmatmul.mubr.msk.bf16.gmra.mrb[32].mxu1 %vm343_vm2, %v922_v46  ;;  %1935 = vmatpush3.bf16.msra.mxu0 %v2095_v4 }
  0x63   : > { %1904 = vmatprep.mubr.msk.bf16.mxu0 %vm2149_vm0, %v2148_v1  ;;  %1936 = vmatprep.subr.bf16.mxu0 %v2148_v1 }
  0x64   : > { %1961 = vmatpush3.bf16.msra.mxu1 %v2096_v10  ;;  %1962 = vmatprep.mubr.msk.bf16.mxu1 %vm2149_vm0, %v2148_v1 }
  0x65   : > { %1996 = vmatprep.subr.bf16.mxu1 %v2148_v1 }
  0x66   : > { %1937 = vmatpush3.bf16.msra.mxu0 %v2097_v11 }
  0x67   : > { %1938 = vmatprep.subr.bf16.mxu0 %v2148_v1 }
  0x69   : > { %1905 = vmatmul.mubr.msk.bf16.gmra.mrb[32].mxu0 %vm343_vm2, %v801_v58 }
  0x6a   : > { %1963 = vmatmul.mubr.msk.bf16.vlgmr.msra.gmra.mrb[36].mxu1 %vm343_vm2, %v1193_v17  ;;  %1939 = vmatpush3.bf16.msra.mxu0 %v2101_v16 }
  0x6b   : > { %2001 = vmatpush3.bf16.msra.mxu1 %v2100_v18  ;;  %1940 = vmatprep.mubr.msk.bf16.mxu0 %vm2149_vm0, %v2148_v1 }
  0x6c   : > { %1997 = vmatprep.subr.bf16.mxu1 %v2148_v1  ;;  %1974 = vmatprep.subr.bf16.mxu0 %v2148_v1 }
  0x6d   : > { %1966 = vmatprep.mubr.msk.bf16.mxu1 %vm2149_vm0, %v2148_v1 }
  0x6f   : > { %2002 = vmatpush3.bf16.msra.mxu1 %v2102_v23 }
  0x70   : > { %1998 = vmatprep.subr.bf16.mxu1 %v2148_v1 }
  0x71   : > { %1941 = vmatmul.mubr.msk.bf16.vlgmr.msra.gmra.mrb[36].mxu0 %vm343_vm2, %v1058_v26 }
  0x72   : > { %1975 = vmatpush3.bf16.msra.mxu0 %v2100_v18  ;;  %1967 = vmatmul.mubr.msk.bf16.gmra.mrb[40].mxu1 %vm343_vm2, %v1202_v28 }
  0x73   : > { %1976 = vmatprep.subr.bf16.mxu0 %v2148_v1  ;;  %2003 = vmatpush3.bf16.msra.mxu1 %v2104_v29 }
  0x74   : > { %1944 = vmatprep.mubr.msk.bf16.mxu0 %vm2149_vm0, %v2148_v1  ;;  %1970 = vmatprep.mubr.msk.bf16.mxu1 %vm2149_vm0, %v2148_v1 }
  0x75   : > { %1999 = vmatprep.subr.bf16.mxu1 %v2148_v1 }
  0x76   : > { %1977 = vmatpush3.bf16.msra.mxu0 %v2102_v23 }
  0x77   : > { %1978 = vmatprep.subr.bf16.mxu0 %v2148_v1  ;;  %2004 = vmatpush3.bf16.msra.mxu1 %v2106_v31 }
  0x78   : > { %2000 = vmatprep.subr.bf16.mxu1 %v2148_v1 }
  0x79   : > { %1945 = vmatmul.mubr.msk.bf16.gmra.mrb[40].mxu0 %vm343_vm2, %v1060_v32 }
  0x7a   : > { %1971 = vmatmul.mubr.msk.bf16.gmra.mrb[44].mxu1 %vm343_vm2, %v1201_v24  ;;  %1979 = vmatpush3.bf16.msra.mxu0 %v2104_v29 }
  0x7b   : > { %1948 = vmatprep.mubr.msk.bf16.mxu0 %vm2149_vm0, %v2148_v1  ;;  %1980 = vmatprep.subr.bf16.mxu0 %v2148_v1 }
  0x7c   : > { %2005 = vmatpush3.bf16.msra.mxu1 %v2107_v33  ;;  %1988 = vmatprep.mubr.msk.bf16.mxu1 %vm2149_vm0, %v2148_v1 }
  0x7e   : > { %1981 = vmatpush3.bf16.msra.mxu0 %v2106_v31 }
  0x7f   : > { %1982 = vmatprep.subr.bf16.mxu0 %v2148_v1 }
  0x81   : > { %1949 = vmatmul.mubr.msk.bf16.gmra.mrb[44].mxu0 %vm343_vm2, %v1059_v30 }
  0x82   : > { %1989 = vmatmul.mubr.msk.bf16.vlgmr.msra.gmra.mrb[48].mxu1 %vm343_vm2, %v1323_v38  ;;  %1983 = vmatpush3.bf16.msra.mxu0 %v2107_v33 }
  0x83   : > { %1984 = vmatprep.mubr.msk.bf16.mxu0 %vm2149_vm0, %v2148_v1  ;;  %1992 = vmatprep.mubr.msk.bf16.mxu1 %vm2149_vm0, %v2148_v1 }
  0x89   : > { %1985 = vmatmul.mubr.msk.bf16.vlgmr.msra.gmra.mrb[48].mxu0 %vm343_vm2, %v1321_v40 }
  0x8a   : > { %1993 = vmatmul.mubr.msk.bf16.gmra.mrb[52].mxu1 %vm343_vm2, %v1322_v35 }
  0xf5   : > { %v481_v41 = vpop.f32.mrb[0].mxu1 }
  0xf6   : > { %v1832_v42 = vpop.f32.mrb[1].mxu1 }
  0xf7   : > { %v484_v43 = vpop.f32.mrb[2].mxu1 }
  0xf8   : > { %v1833_v44 = vpop.f32.mrb[3].mxu1 }
  0xfc   : > { %v387_v45 = vpop.f32.mrb[0].mxu0 }
  0xfd   : > { %v482_v46 = vadd.f32 %v481_v41, %v387_v45  ;;  %v1810_v47 = vpop.f32.mrb[1].mxu0  ;;  %v489_v48 = vpop.f32.mrb[4].mxu1 }
  0xfe   : > { %v390_v49 = vpop.f32.mrb[2].mxu0  ;;  %v1836_v50 = vpop.f32.mrb[5].mxu1 }
  0xff   : > { %v485_v51 = vadd.f32 %v484_v43, %v390_v49  ;;  %v1811_v52 = vpop.f32.mrb[3].mxu0  ;;  %v492_v53 = vpop.f32.mrb[6].mxu1 }
 0x100   : > { %v1837_v54 = vpop.f32.mrb[7].mxu1 }
 0x104   : > { %v395_v1 = vpop.f32.mrb[4].mxu0 }
 0x105   : > { %v490_v55 = vadd.f32 %v489_v48, %v395_v1  ;;  %v1814_v56 = vpop.f32.mrb[5].mxu0  ;;  %v497_v57 = vpop.f32.mrb[8].mxu1 }
 0x106   : > { %v398_v58 = vpop.f32.mrb[6].mxu0  ;;  %v1840_v59 = vpop.f32.mrb[9].mxu1 }
 0x107   : > { %v493_v60 = vadd.f32 %v492_v53, %v398_v58  ;;  %v1815_v61 = vpop.f32.mrb[7].mxu0  ;;  %v500_v62 = vpop.f32.mrb[10].mxu1 }
 0x108   : > { %v1841_v63 = vpop.f32.mrb[11].mxu1 }
 0x10c   : > { %v403_v0 = vpop.f32.mrb[8].mxu0 }
 0x10d   : > { %v498_v2 = vadd.f32 %v497_v57, %v403_v0  ;;  %v1818_v3 = vpop.f32.mrb[9].mxu0  ;;  %v734_v4 = vpop.f32.mrb[12].mxu1 }
 0x10e   : > { %v406_v5 = vpop.f32.mrb[10].mxu0  ;;  %v1876_v6 = vpop.f32.mrb[13].mxu1 }
 0x10f   : > { %v1819_v7 = vpop.f32.mrb[11].mxu0  ;;  %v737_v8 = vpop.f32.mrb[14].mxu1 }
 0x110   : > { %v1877_v9 = vpop.f32.mrb[15].mxu1 }
 0x114   : > { %v597_v10 = vpop.f32.mrb[12].mxu0 }
 0x115   : > { %v619_v11 = vadd.f32 %v597_v10, %v482_v46  ;;  %v1854_v12 = vpop.f32.mrb[13].mxu0  ;;  %v742_v13 = vpop.f32.mrb[16].mxu1 }
 0x116   : > { %v600_v14 = vpop.f32.mrb[14].mxu0  ;;  %v1880_v15 = vpop.f32.mrb[17].mxu1 }
 0x117   : > { %v620_v16 = vadd.f32 %v600_v14, %v485_v51  ;;  %v1855_v17 = vpop.f32.mrb[15].mxu0  ;;  %v745_v18 = vpop.f32.mrb[18].mxu1  ;;  %v756_v19 = vadd.f32 %v734_v4, %v619_v11 }
 0x118   : > { %v1881_v20 = vpop.f32.mrb[19].mxu1 }
 0x119   : > { %v757_v21 = vadd.f32 %v737_v8, %v620_v16 }
 0x11c   : > { %v605_v22 = vpop.f32.mrb[16].mxu0 }
 0x11d   : > { %v621_v23 = vadd.f32 %v605_v22, %v490_v55  ;;  %v1858_v24 = vpop.f32.mrb[17].mxu0  ;;  %v750_v25 = vpop.f32.mrb[20].mxu1 }
 0x11e   : > { %v608_v26 = vpop.f32.mrb[18].mxu0  ;;  %v1884_v27 = vpop.f32.mrb[21].mxu1 }
 0x11f   : > { %v622_v28 = vadd.f32 %v608_v26, %v493_v60  ;;  %v1859_v29 = vpop.f32.mrb[19].mxu0  ;;  %v753_v30 = vpop.f32.mrb[22].mxu1  ;;  %v758_v31 = vadd.f32 %v742_v13, %v621_v23 }
 0x120   : > { %v1885_v32 = vpop.f32.mrb[23].mxu1 }
 0x121   : > { %v759_v33 = vadd.f32 %v745_v18, %v622_v28 }
 0x124   : > { %v613_v34 = vpop.f32.mrb[20].mxu0 }
 0x125   : > { %v623_v35 = vadd.f32 %v613_v34, %v498_v2  ;;  %v1862_v36 = vpop.f32.mrb[21].mxu0  ;;  %v997_v37 = vpop.f32.mrb[24].mxu1 }
 0x126   : > { %v616_v38 = vpop.f32.mrb[22].mxu0  ;;  %v1920_v39 = vpop.f32.mrb[25].mxu1 }
 0x127   : > { %v1863_v40 = vpop.f32.mrb[23].mxu0  ;;  %v1000_v41 = vpop.f32.mrb[26].mxu1  ;;  %v760_v42 = vadd.f32 %v750_v25, %v623_v35 }
 0x128   : > { %v1921_v43 = vpop.f32.mrb[27].mxu1 }
 0x12c   : > { %v876_v44 = vpop.f32.mrb[24].mxu0 }
 0x12d   : > { %v898_v45 = vadd.f32 %v876_v44, %v756_v19  ;;  %v1898_v46 = vpop.f32.mrb[25].mxu0  ;;  %v1005_v47 = vpop.f32.mrb[28].mxu1 }
 0x12e   : > { %v879_v48 = vpop.f32.mrb[26].mxu0  ;;  %v1924_v49 = vpop.f32.mrb[29].mxu1 }
 0x12f   : > { %v899_v50 = vadd.f32 %v879_v48, %v757_v21  ;;  %v1899_v51 = vpop.f32.mrb[27].mxu0  ;;  %v1008_v52 = vpop.f32.mrb[30].mxu1  ;;  %v1019_v53 = vadd.f32 %v997_v37, %v898_v45 }
 0x130   : > { %v1925_v54 = vpop.f32.mrb[31].mxu1 }
 0x131   : > { %v1020_v1 = vadd.f32 %v1000_v41, %v899_v50 }
 0x134   : > { %v884_v55 = vpop.f32.mrb[28].mxu0 }
 0x135   : > { %v900_v56 = vadd.f32 %v884_v55, %v758_v31  ;;  %v1902_v57 = vpop.f32.mrb[29].mxu0  ;;  %v1013_v58 = vpop.f32.mrb[32].mxu1 }
 0x136   : > { %v887_v59 = vpop.f32.mrb[30].mxu0  ;;  %v1928_v60 = vpop.f32.mrb[33].mxu1 }
 0x137   : > { %v901_v61 = vadd.f32 %v887_v59, %v759_v33  ;;  %v1903_v62 = vpop.f32.mrb[31].mxu0  ;;  %v1016_v63 = vpop.f32.mrb[34].mxu1  ;;  %v1021_v0 = vadd.f32 %v1005_v47, %v900_v56 }
 0x138   : > { %v1929_v2 = vpop.f32.mrb[35].mxu1 }
 0x139   : > { %v1022_v3 = vadd.f32 %v1008_v52, %v901_v61 }
 0x13c   : > { %v892_v4 = vpop.f32.mrb[32].mxu0 }
 0x13d   : > { %v902_v5 = vadd.f32 %v892_v4, %v760_v42  ;;  %v1906_v6 = vpop.f32.mrb[33].mxu0  ;;  %v1276_v7 = vpop.f32.mrb[36].mxu1  ;;  %v1715_v42 = vld [vmem:[%s2590_s2] ss:$0 sm:$0xff] }
 0x13e   : > { %v895_v8 = vpop.f32.mrb[34].mxu0  ;;  %v1964_v9 = vpop.f32.mrb[37].mxu1 }
 0x13f   : > { %v1907_v10 = vpop.f32.mrb[35].mxu0  ;;  %v1279_v11 = vpop.f32.mrb[38].mxu1  ;;  %v1023_v12 = vadd.f32 %v1013_v58, %v902_v5 }
 0x140   : > { %v1965_v13 = vpop.f32.mrb[39].mxu1 }
 0x144   : > { %v1134_v14 = vpop.f32.mrb[36].mxu0 }
 0x145   : > { %v1156_v15 = vadd.f32 %v1134_v14, %v1019_v53  ;;  %v1942_v16 = vpop.f32.mrb[37].mxu0  ;;  %v1284_v17 = vpop.f32.mrb[40].mxu1 }
 0x146   : > { %v1137_v18 = vpop.f32.mrb[38].mxu0  ;;  %v1968_v19 = vpop.f32.mrb[41].mxu1 }
 0x147   : > { %v1157_v20 = vadd.f32 %v1137_v18, %v1020_v1  ;;  %v1943_v21 = vpop.f32.mrb[39].mxu0  ;;  %v1287_v22 = vpop.f32.mrb[42].mxu1  ;;  %v1298_v23 = vadd.f32 %v1276_v7, %v1156_v15 }
 0x148   : > { %v1969_v24 = vpop.f32.mrb[43].mxu1 }
 0x149   : > { %v1299_v25 = vadd.f32 %v1279_v11, %v1157_v20 }
 0x14c   : > { %v1142_v26 = vpop.f32.mrb[40].mxu0 }
 0x14d   : > { %v1158_v27 = vadd.f32 %v1142_v26, %v1021_v0  ;;  %v1946_v28 = vpop.f32.mrb[41].mxu0  ;;  %v1292_v29 = vpop.f32.mrb[44].mxu1 }
 0x14e   : > { %v1145_v30 = vpop.f32.mrb[42].mxu0  ;;  %v1972_v31 = vpop.f32.mrb[45].mxu1 }
 0x14f   : > { %v1159_v32 = vadd.f32 %v1145_v30, %v1022_v3  ;;  %v1947_v33 = vpop.f32.mrb[43].mxu0  ;;  %v1295_v34 = vpop.f32.mrb[46].mxu1  ;;  %v1300_v35 = vadd.f32 %v1284_v17, %v1158_v27 }
 0x150   : > { %v1973_v36 = vpop.f32.mrb[47].mxu1 }
 0x151   : > { %v1301_v37 = vadd.f32 %v1287_v22, %v1159_v32 }
 0x154   : > { %v1150_v38 = vpop.f32.mrb[44].mxu0 }
 0x155   : > { %v1160_v39 = vadd.f32 %v1150_v38, %v1023_v12  ;;  %v1950_v40 = vpop.f32.mrb[45].mxu0  ;;  %v1405_v41 = vpop.f32.mrb[48].mxu1 }
 0x156   : > { %v1153_v43 = vpop.f32.mrb[46].mxu0  ;;  %v1421_v44 = vadd.f32 %v1405_v41, %v1300_v35  ;;  %v1990_v45 = vpop.f32.mrb[49].mxu1 }
 0x157   : > { %v1951_v46 = vpop.f32.mrb[47].mxu0  ;;  %v1408_v47 = vpop.f32.mrb[50].mxu1  ;;  %v1302_v48 = vadd.f32 %v1292_v29, %v1160_v39 }
 0x158   : > { %v1433_v49 = vadd.f32 %v1715_v42, %v1421_v44  ;;  %v1422_v50 = vadd.f32 %v1408_v47, %v1301_v37  ;;  %v1991_v51 = vpop.f32.mrb[51].mxu1 }
 0x15a   : > { %v1438_v52 = vmax.f32 %v1433_v49, 0.0  ;;  %v1434_v53 = vadd.f32 %v1715_v42, %v1422_v50 }
 0x15c   : > { %1444 = vst.msk [vmem:[%s192_s22 + $0x10] sm:$0xff] %vm1441_vm10, %v1438_v52  ;;  %v1439_v54 = vmax.f32 %v1434_v53, 0.0  ;;  %v1397_v1 = vpop.f32.mrb[48].mxu0 }
 0x15d   : > { %v1419_v55 = vadd.f32 %v1397_v1, %v1298_v23  ;;  %v1986_v56 = vpop.f32.mrb[49].mxu0  ;;  %v1413_v57 = vpop.f32.mrb[52].mxu1 }
 0x15e   : > { %1445 = vst.msk [vmem:[%s192_s22 + $0x18] sm:$0xff] %vm1441_vm10, %v1439_v54  ;;  %v1400_v58 = vpop.f32.mrb[50].mxu0  ;;  %v1423_v59 = vadd.f32 %v1413_v57, %v1302_v48  ;;  %v1994_v60 = vpop.f32.mrb[53].mxu1 }
 0x15f   : > { %v1431_v61 = vadd.f32 %v1715_v42, %v1419_v55  ;;  %v1420_v62 = vadd.f32 %v1400_v58, %v1299_v25  ;;  %v1987_v63 = vpop.f32.mrb[51].mxu0  ;;  %v1416_v0 = vpop.f32.mrb[54].mxu1 }
 0x160   : > { %v1435_v2 = vadd.f32 %v1715_v42, %v1423_v59  ;;  %v1995_v3 = vpop.f32.mrb[55].mxu1 }
 0x161   : > { %v1436_v4 = vmax.f32 %v1431_v61, 0.0  ;;  %v1432_v5 = vadd.f32 %v1715_v42, %v1420_v62 }
 0x162   : > { %v1440_v6 = vmax.f32 %v1435_v2, 0.0 }
 0x163   : > { %1442 = vst.msk [vmem:[%s192_s22] sm:$0xff] %vm1441_vm10, %v1436_v4  ;;  %v1437_v7 = vmax.f32 %v1432_v5, 0.0 }
 0x164   : > { %1446 = vst.msk [vmem:[%s192_s22 + $0x20] sm:$0xff] %vm1441_vm10, %v1440_v6 }
 0x165   : > { %1443 = vst.msk [vmem:[%s192_s22 + $0x8] sm:$0xff] %vm1441_vm10, %v1437_v7 }
 0x166 PF: > { %s13_s16 = sadd.s32 1, %s2146_s16   ;;  %s2592_s12 = smov %s2138_s14 }
 0x167   : > { %p10_p7 = scmp.ge.s32.totalorder %s13_s16, 6   ;;  %s2593_s13 = smov %s2142_s15 }
 0x168   : > { %s2594_s14 = smov %s2597_s17  ;;  %s2595_s15 = smov %s2601_s18 }
 0x169   :  { %12 = sbr.rel (!%p10_p7) target bundleno = 3 (0x3), region = 71 }

// kernel: projector_forward.5
= control target key start
LH: loop header
LB: loop body
LE: loop exit
PB: predicated region body
PF: predicated region fallthrough
CT: control target
= control target key end

     0   :  { %s2165_s12 = smov 0   ;;  %s2167_s13 = smov 0   ;;  %s2583_s0 = inlined_call_operand.vmem [shape: f32[2,110,80], index: 0, kind: input, shape index: {}]   ;;  %s2584_s1 = inlined_call_operand.vmem [shape: bf16[9,80,32], index: 1, kind: input, shape index: {}]   ;;  %s2585_s2 = inlined_call_operand.vmem [shape: f32[1,32], index: 2, kind: input, shape index: {}]   ;;  %s2586_s3 = inlined_call_operand.vmem [shape: f32[2,80,32], index: 3, kind: output, shape index: {}]  }
   0x1   :  { %s2169_s14 = smov 0   ;;  %s2171_s15 = smov 0  }
   0x2   :  { %s2173_s16 = smov 0  }
   0x3 LB: > { %s22_s17 = sadd.s32 1, %s2133_s14  ;;  %s25_s18 = sadd.s32 1, %s2137_s15  ;;  %s2141_s16 = sphi %s2173_s16, %s13_s16   ;;  %s2137_s15 = sphi %s2171_s15, %s2590_s15   ;;  %s2133_s14 = sphi %s2169_s14, %s2589_s14   ;;  %s2129_s13 = sphi %s2167_s13, %s2588_s13   ;;  %s2125_s12 = sphi %s2165_s12, %s2587_s12  }
   0x4   : > { %p23_p0 = scmp.ge.s32.totalorder %s22_s17, 2  ;;  %p1532_p1 = scmp.ge.s32.totalorder %s2141_s16, 1 }
   0x5   : > { %p151_p2 = scmp.lt.s32.totalorder %s2141_s16, 5 }
   0x6   : > { %s2592_s17 = smov (%p23_p0, %s22_s17), 0  ;;  %s2594_s18 = smov (!%p23_p0, %s25_s18), %s2137_s15 }
   0x7   : > { %p152_p3 = pnand %p1532_p1, %p151_p2  ;;  %p27_p4 = scmp.ge.s32.totalorder %s2594_s18, 2 }
   0x8   : > { %v2045_v0 = vld [vmem:[%s2584_s1] sm:$0xff] (!%p152_p3)   ;;  %v2143_v1 = vmov (!%p152_p3), 0.0   ;;  %v2046_v2 = vld [vmem:[%s2584_s1 + $0x8] sm:$0xff] (!%p152_p3)   ;;  %vm2144_vm0 = vmmov (!%p152_p3), 0   ;;  %p179_p5 = scmp.lt.s32.totalorder (!%p152_p3), %s2129_s13, 1  ;;  %v2049_v4 = vld [vmem:[%s2584_s1 + $0x30] sm:$0xff] (!%p152_p3)  }
   0x9   : > { %s2596_s18 = smov (%p27_p4, %s2594_s18), 0  ;;  %155 = sbr.rel (%p152_p3) target bundleno = 356 (0x164), region = 32 }
   0xa   : > { %1815 = vmatprep.subr.bf16.mxu1 (!%p152_p3), %v2143_v1  ;;  %1793 = vmatprep.subr.bf16.mxu0 (!%p152_p3), %v2143_v1  ;;  %v2047_v3 = vld [vmem:[%s2584_s1 + $0x28] sm:$0xff] (!%p152_p3)   ;;  %s195_s27 = smul.u32 (!%p152_p3), 40, %s2125_s12  ;;  %v2048_v5 = vld [vmem:[%s2584_s1 + $0x10] sm:$0xff] (!%p152_p3)   ;;  %v2051_v6 = vld [vmem:[%s2584_s1 + $0x38] sm:$0xff] (!%p152_p3)   ;;  %vm237_vm1 = vcmask (!%p152_p3), 650240   ;;  %vm343_vm2 = vcmask (!%p152_p3), 654336  }
   0xb   : > { %1816 = vmatpush3.bf16.msra.mxu1 (!%p152_p3), %v2045_v0  ;;  %1825 = vmatprep.mubr.msk.bf16.mxu1 (!%p152_p3), %vm2144_vm0, %v2143_v1  ;;  %v2050_v7 = vld [vmem:[%s2584_s1 + $0x18] sm:$0xff] (!%p152_p3)   ;;  %v2053_v10 = vld [vmem:[%s2584_s1 + $0x40] sm:$0xff] (!%p152_p3)   ;;  %v2057_v18 = vld [vmem:[%s2584_s1 + $0x48] sm:$0xff] (!%p152_p3)   ;;  %vm289_vm3 = vsmask.f32 (!%p152_p3), 7424  ;;  %vm518_vm4 = vcmask (!%p152_p3), 1046528  }
   0xc   : > { %1817 = vmatprep.subr.bf16.mxu1 (!%p152_p3), %v2143_v1  ;;  %1803 = vmatprep.mubr.msk.bf16.mxu0 (!%p152_p3), %vm2144_vm0, %v2143_v1  ;;  %v2052_v17 = vld [vmem:[%s2584_s1 + $0x20] sm:$0xff] (!%p152_p3)   ;;  %v2056_v25 = vld [vmem:[%s2584_s1 + $0x78] sm:$0xff] (!%p152_p3)   ;;  %v2060_v37 = vld [vmem:[%s2584_s1 + $0x50] sm:$0xff] (!%p152_p3)   ;;  %vm245_vm5 = vcmask (!%p152_p3), 649216   ;;  %vm918_vm6 = vcmask (!%p152_p3), 1045504   ;;  %vm1318_vm9 = vcmask (!%p152_p3), 1044480  }
   0xd   : > { %1794 = vmatpush3.bf16.msra.mxu0 (!%p152_p3), %v2047_v3  ;;  %v2059_v31 = vld [vmem:[%s2584_s1 + $0x80] sm:$0xff] (!%p152_p3)   ;;  %v2061_v40 = vld [vmem:[%s2584_s1 + $0x88] sm:$0xff] (!%p152_p3)   ;;  %v2062_v43 = vld [vmem:[%s2584_s1 + $0x58] sm:$0xff] (!%p152_p3)   ;;  %vm776_vm7 = vsmask.f32 (!%p152_p3), 6400  ;;  %s184_s9 = smul.u32 (!%p152_p3), 5, %s2125_s12 }
   0xe   : > { %1795 = vmatprep.subr.bf16.mxu0 (!%p152_p3), %v2143_v1  ;;  %v2065_v47 = vld [vmem:[%s2584_s1 + $0x90] sm:$0xff] (!%p152_p3)   ;;  %v2066_v53 = vld [vmem:[%s2584_s1 + $0x60] sm:$0xff] (!%p152_p3)   ;;  %v2067_v56 = vld [vmem:[%s2584_s1 + $0x98] sm:$0xff] (!%p152_p3)   ;;  %vm1176_vm8 = vsmask.f32 (!%p152_p3), 5376  ;;  %vm1436_vm10 = vcmask (!%p152_p3), 261120  }
   0xf   : > { %1818 = vmatpush3.bf16.msra.mxu1 (!%p152_p3), %v2046_v2  ;;  %v2068_v58 = vld [vmem:[%s2584_s1 + $0x68] sm:$0xff] (!%p152_p3)   ;;  %v2072_v3 = vld [vmem:[%s2584_s1 + $0x70] sm:$0xff] (!%p152_p3)   ;;  %p187_p6 = scmp.lt.s32.totalorder (!%p152_p3), %s184_s9, 9 }
  0x10   : > { %s2598_s13 = smov (!%p179_p5, %s2129_s13), 1  ;;  %1819 = vmatprep.subr.bf16.mxu1 %v2143_v1 }
  0x11   : > { %s2001_s30 = smul.u32 112, %s2598_s13  ;;  %1796 = vmatpush3.bf16.msra.mxu0 %v2049_v4  ;;  %s2600_s9 = smov (!%p187_p6, %s184_s9), 9 }
  0x12   : > { %1797 = vmatprep.subr.bf16.mxu0 %v2143_v1  ;;  %s2002_s10 = smul.u32 10, %s2598_s13 }
  0x13   : > { %s183_s8 = scalar_lea.vmem %s2583_s0, %s2001_s30  ;;  %1820 = vmatpush3.bf16.msra.mxu1 %v2048_v5  ;;  %v2071_v5 = vld [vmem:[%s2584_s1 + $0xc8] sm:$0xff]  }
  0x14   : > { %s2235_s11 = scalar_lea.vmem %s183_s8, %s195_s27  ;;  %1821 = vmatprep.subr.bf16.mxu1 %v2143_v1  ;;  %s190_s12 = sadd.s32 %s2002_s10, %s2600_s9 }
  0x15   : > { %v197_v8 = vld [vmem:[%s2235_s11] sm:$0xff]  ;;  %v198_v9 = vld [vmem:[%s2235_s11 + $0x8] sm:$0xff]  ;;  %v199_v13 = vld [vmem:[%s2235_s11 + $0x10] sm:$0xff]  ;;  %1798 = vmatpush3.bf16.msra.mxu0 %v2051_v6 }
  0x16   : > { %v1713_v11 = vpack.c.bf16 %v197_v8, %v197_v8  ;;  %v1714_v12 = vpack.c.bf16 %v198_v9, %v198_v9  ;;  %v200_v14 = vld [vmem:[%s2235_s11 + $0x18] sm:$0xff]  ;;  %v1715_v15 = vpack.c.bf16 %v199_v13, %v199_v13  ;;  %1799 = vmatprep.subr.bf16.mxu0 %v2143_v1  ;;  %v201_v19 = vld [vmem:[%s2235_s11 + $0x20] sm:$0xff]  ;;  %v202_v20 = vld [vmem:[%s2235_s11 + $0x28] sm:$0xff] }
  0x17   : > { %v1716_v16 = vpack.c.bf16 %v200_v14, %v200_v14  ;;  %1822 = vmatpush3.bf16.msra.mxu1 %v2050_v7  ;;  %v1717_v21 = vpack.c.bf16 %v201_v19, %v201_v19  ;;  %v1718_v22 = vpack.c.bf16 %v202_v20, %v202_v20  ;;  %v203_v44 = vld [vmem:[%s2235_s11 + $0x30] sm:$0xff]  ;;  %v2077_v14 = vld [vmem:[%s2584_s1 + $0xd8] sm:$0xff]  }
  0x18   : > { %238 = vst.msk [vmem:[#allocation2] sm:$0xf] %vm237_vm1, %v1713_v11  ;;  %239 = vst.msk [vmem:[#allocation2 + $0x4] sm:$0xf] %vm237_vm1, %v1714_v12  ;;  %1823 = vmatprep.subr.bf16.mxu1 %v2143_v1  ;;  %v1719_v49 = vpack.c.bf16 %v203_v44, %v203_v44  ;;  %v2073_v9 = vld [vmem:[%s2584_s1 + $0xd0] sm:$0xff]   ;;  %v2074_v12 = vld [vmem:[%s2584_s1 + $0xa0] sm:$0xff]  }
  0x19   : > { %240 = vst.msk [vmem:[#allocation2 + $0x8] sm:$0xf] %vm237_vm1, %v1715_v15  ;;  %241 = vst.msk [vmem:[#allocation2 + $0xc] sm:$0xf] %vm237_vm1, %v1716_v16  ;;  %1800 = vmatpush3.bf16.msra.mxu0 %v2053_v10  ;;  %v2078_v15 = vld [vmem:[%s2584_s1 + $0xa8] sm:$0xff]  }
  0x1a   : > { %1801 = vmatprep.subr.bf16.mxu0 %v2143_v1  ;;  %242 = vst.msk [vmem:[#allocation2 + $0x10] sm:$0xf] %vm237_vm1, %v1717_v21  ;;  %243 = vst.msk [vmem:[#allocation2 + $0x14] sm:$0xf] %vm237_vm1, %v1718_v22  ;;  %v2080_v22 = vld [vmem:[%s2584_s1 + $0xb0] sm:$0xff]  }
  0x1b   : > { %1824 = vmatpush3.bf16.msra.mxu1 %v2052_v17  ;;  %244 = vst.msk [vmem:[#allocation2 + $0x18] sm:$0xf] %vm237_vm1, %v1719_v49  ;;  %v204_v17 = vld [vmem:[%s2235_s11 + $0x38] sm:$0x3f]  ;;  %s1534_s11 = sshll.u32 %s190_s12, 3 }
  0x1c   : > { %1859 = vmatprep.subr.bf16.mxu1 %v2143_v1  ;;  %v1720_v19 = vpack.c.bf16 %v204_v17, %v204_v17  ;;  %s192_s22 = scalar_lea.vmem %s2586_s3, %s1534_s11 }
  0x1d   : > { %1802 = vmatpush3.bf16.msra.mxu0 %v2057_v18  ;;  %v2079_v18 = vld [vmem:[%s2584_s1 + $0xe0] sm:$0xff]  }
  0x1e   : > { %1837 = vmatprep.subr.bf16.mxu0 %v2143_v1  ;;  %246 = vst.msk [vmem:[#allocation2 + $0x1c] sm:$0x7] %vm245_vm5, %v1720_v19 }
  0x1f   : > { %v247_v23 = vld [vmem:[#allocation2] sm:$0xf]  ;;  %v2263_v24 = vld [vmem:[#allocation2 + $0x4] sm:$0xf] }
  0x20   : > { %v1553_v26 = vcombine.low %v247_v23, %v2263_v24  ;;  %v2270_v27 = vld [vmem:[#allocation2 + $0x8] sm:$0xff]   ;;  %v624_v48 = vld [vmem:[#allocation2 + $0x4] sm:$0xe]  ;;  %v503_v59 = vld [vmem:[#allocation2] sm:$0xe] }
  0x21   : > { %v298_v30 = vshll.u32 %v2270_v27, 16  ;;  %v251_v34 = vld [vmem:[#allocation2 + $0x10] sm:$0xf]  ;;  %v262_v35 = vld [vmem:[#allocation2 + $0x14] sm:$0x1]  ;;  %v302_v39 = vshrl.u32 %v2270_v27, 16  ;;  %v1583_v2 = vcombine.low %v503_v59, %v2263_v24 }
  0x22   : > { %1826 = vmatmul.mubr.msk.bf16.vlgmr.msra.gmra.mrb[0].mxu1 %vm343_vm2, %v1553_v26  ;;  %v291_v28 = vshrl.u32 %v1553_v26, 16  ;;  %v293_v29 = vshll.u32 %v1553_v26, 16  ;;  %v2283_v38 = vcombine.low %v251_v34, %v262_v35  ;;  %v2307_v50 = vld [vmem:[#allocation2 + $0x8] sm:$0xf]  ;;  %v1564_v52 = vcombine.low %v251_v34, %v251_v34  ;;  %v2319_v55 = vld [vmem:[#allocation2 + $0xc] sm:$0xff]  }
  0x23   : > { %1860 = vmatpush3.bf16.msra.mxu1 %v2056_v25  ;;  %1829 = vmatprep.mubr.msk.bf16.mxu1 %vm2144_vm0, %v2143_v1  ;;  %v300_v33 = vrot.slane %v298_v30, 1  ;;  %v2317_v54 = vcombine.low %v624_v48, %v2307_v50  ;;  %v657_v61 = vrot.slane %v2319_v55, 1  ;;  %v2336_v62 = vld [vmem:[#allocation2 + $0x14] sm:$0xf]  ;;  %v629_v63 = vld [vmem:[#allocation2 + $0x18] sm:$0x1] }
  0x24   : > { %1861 = vmatprep.subr.bf16.mxu1 %v2143_v1  ;;  %v295_v32 = vrot.slane %v293_v29, 1  ;;  %v306_v42 = vshll.u32 %v2283_v38, 16  ;;  %v310_v57 = vshrl.u32 %v2283_v38, 16  ;;  %v1604_v6 = vcombine.low %v2336_v62, %v629_v63  ;;  %v903_v20 = vld [vmem:[#allocation2 + $0x4] sm:$0xc]  ;;  %v2081_v24 = vld [vmem:[%s2584_s1 + $0xe8] sm:$0xff]  }
  0x25   : > { %v304_v45 = vor.u32 %v302_v39, %v300_v33  ;;  %v656_v60 = vrot.slane %v2317_v54, 1  ;;  %v519_v7 = vrot.slane %v1583_v2, 1  ;;  %v520_v8 = vrot.slane %v2270_v27, 1  ;;  %v2082_v25 = vld [vmem:[%s2584_s1 + $0xb8] sm:$0xff]   ;;  %v2430_v48 = vld [vmem:[#allocation2 + $0xc] sm:$0xf] }
  0x26   : > { %v296_v36 = vor.u32 %v295_v32, %v291_v28  ;;  %v308_v46 = vrot.slane %v306_v42, 1  ;;  %v659_v10 = vrot.slane %v1604_v6, 1  ;;  %v522_v16 = vrot.slane %v2283_v38, 1  ;;  %v761_v32 = vld [vmem:[#allocation2 + $0x18] sm:$0x3] }
  0x27   : > { %1862 = vmatpush3.bf16.msra.mxu1 %v2059_v31  ;;  %v658_v4 = vsel %vm518_vm4, %v656_v60, %v657_v61  ;;  %v521_v11 = vsel %vm518_vm4, %v519_v7, %v520_v8  ;;  %v1642_v23 = vcombine.low %v903_v20, %v2307_v50  ;;  %v778_v26 = vshrl.u32 %v2317_v54, 16  ;;  %v2086_v50 = vld [vmem:[%s2584_s1 + $0xf0] sm:$0xff]   ;;  %v1161_v2 = vld [vmem:[#allocation2 + $0x1c] sm:$0x7] }
  0x28   : > { %v301_v41 = vsel %vm289_vm3, %v296_v36, %v300_v33  ;;  %1863 = vmatprep.subr.bf16.mxu1 %v2143_v1  ;;  %v309_v51 = vsel %vm289_vm3, %v304_v45, %v308_v46  ;;  %v312_v0 = vor.u32 %v310_v57, %v308_v46  ;;  %v660_v13 = vsel %vm518_vm4, %v657_v61, %v659_v10  ;;  %v2084_v33 = vld [vmem:[%s2584_s1 + $0xc0] sm:$0xff]   ;;  %v2088_v57 = vld [vmem:[%s2584_s1 + $0xf8] sm:$0xff]   ;;  %v2089_v60 = vld [vmem:[%s2584_s1 + $0x130] sm:$0xff]  }
  0x29   : > { %1804 = vmatmul.mubr.msk.bf16.vlgmr.msra.gmra.mrb[0].mxu0 %vm343_vm2, %v301_v41  ;;  %v523_v21 = vsel %vm518_vm4, %v520_v8, %v522_v16  ;;  %v786_v28 = vshrl.u32 %v2319_v55, 16  ;;  %v789_v29 = vshll.u32 %v2319_v55, 16  ;;  %v919_v30 = vrot.slane %v1642_v23, 2  ;;  %v2085_v45 = vld [vmem:[%s2584_s1 + $0x120] sm:$0xff]   ;;  %v2097_v23 = vld [vmem:[%s2584_s1 + $0x148] sm:$0xff]  }
  0x2a   : > { %1838 = vmatpush3.bf16.msra.mxu0 %v2060_v37  ;;  %1830 = vmatmul.mubr.msk.bf16.gmra.mrb[4].mxu1 %vm343_vm2, %v2270_v27  ;;  %v781_v27 = vshll.u32 %v2317_v54, 16  ;;  %v920_v31 = vrot.slane %v2319_v55, 2  ;;  %v780_v34 = vrot.slane %v778_v26, 1  ;;  %v1623_v38 = vcombine.low %v2336_v62, %v761_v32  ;;  %v2087_v55 = vld [vmem:[%s2584_s1 + $0x128] sm:$0xff]  }
  0x2b   : > { %1839 = vmatprep.subr.bf16.mxu0 %v2143_v1  ;;  %1864 = vmatpush3.bf16.msra.mxu1 %v2061_v40  ;;  %v788_v36 = vrot.slane %v786_v28, 1  ;;  %v791_v37 = vrot.slane %v789_v29, 2  ;;  %v2083_v40 = vld [vmem:[%s2584_s1 + $0x118] sm:$0xff]   ;;  %v2099_v29 = vld [vmem:[%s2584_s1 + $0x150] sm:$0xff]  }
  0x2c   : > { %1807 = vmatprep.mubr.msk.bf16.mxu0 %vm2144_vm0, %v2143_v1  ;;  %1833 = vmatprep.mubr.msk.bf16.mxu1 %vm2144_vm0, %v2143_v1  ;;  %v783_v35 = vrot.slane %v781_v27, 2  ;;  %v921_v39 = vsel %vm918_vm6, %v919_v30, %v920_v31  ;;  %v798_v44 = vshll.u32 %v1623_v38, 16  ;;  %v922_v46 = vrot.slane %v1623_v38, 2 }
  0x2d   : > { %1865 = vmatprep.subr.bf16.mxu1 %v2143_v1  ;;  %v792_v42 = vor.u32 %v791_v37, %v788_v36  ;;  %v1303_v36 = vld [vmem:[#allocation2 + $0x8] sm:$0x8] }
  0x2e   : > { %1840 = vmatpush3.bf16.msra.mxu0 %v2062_v43  ;;  %v784_v41 = vor.u32 %v783_v35, %v780_v34  ;;  %v795_v43 = vshrl.u32 %v1623_v38, 16  ;;  %v923_v54 = vsel %vm918_vm6, %v920_v31, %v922_v46  ;;  %v2101_v31 = vld [vmem:[%s2584_s1 + $0x158] sm:$0xff]   ;;  %v1701_v37 = vcombine.low %v1303_v36, %v2430_v48 }
  0x2f   : > { %1841 = vmatprep.subr.bf16.mxu0 %v2143_v1  ;;  %1866 = vmatpush3.bf16.msra.mxu1 %v2065_v47  ;;  %v1024_v47 = vld [vmem:[#allocation2 + $0x8] sm:$0xc] }
  0x30   : > { %1867 = vmatprep.subr.bf16.mxu1 %v2143_v1  ;;  %v793_v49 = vsel %vm776_vm7, %v784_v41, %v792_v42 }
  0x31   : > { %1808 = vmatmul.mubr.msk.bf16.gmra.mrb[4].mxu0 %vm343_vm2, %v309_v51  ;;  %v797_v51 = vrot.slane %v795_v43, 1 }
  0x32   : > { %1834 = vmatmul.mubr.msk.bf16.gmra.mrb[8].mxu1 %vm343_vm2, %v1564_v52  ;;  %1842 = vmatpush3.bf16.msra.mxu0 %v2066_v53  ;;  %v800_v52 = vrot.slane %v798_v44, 2  ;;  %v2441_v53 = vcombine.low %v1024_v47, %v2430_v48 }
  0x33   : > { %1811 = vmatprep.mubr.msk.bf16.mxu0 %vm2144_vm0, %v2143_v1  ;;  %1843 = vmatprep.subr.bf16.mxu0 %v2143_v1 }
  0x34   : > { %1868 = vmatpush3.bf16.msra.mxu1 %v2067_v56  ;;  %1869 = vmatprep.mubr.msk.bf16.mxu1 %vm2144_vm0, %v2143_v1  ;;  %v2447_v56 = vld [vmem:[#allocation2 + $0x10] sm:$0xff]   ;;  %v1178_v59 = vshrl.u32 %v2441_v53, 16  ;;  %v1181_v61 = vshll.u32 %v2441_v53, 16 }
  0x35   : > { %1903 = vmatprep.subr.bf16.mxu1 %v2143_v1  ;;  %v1186_v62 = vshrl.u32 %v2447_v56, 16  ;;  %v1189_v63 = vshll.u32 %v2447_v56, 16  ;;  %v1320_v34 = vrot.slane %v2447_v56, 3 }
  0x36   : > { %1844 = vmatpush3.bf16.msra.mxu0 %v2068_v58  ;;  %v801_v58 = vor.u32 %v800_v52, %v797_v51  ;;  %v1183_v6 = vrot.slane %v1181_v61, 3 }
  0x37   : > { %1845 = vmatprep.subr.bf16.mxu0 %v2143_v1  ;;  %v1188_v7 = vrot.slane %v1186_v62, 2  ;;  %v1191_v8 = vrot.slane %v1189_v63, 3 }
  0x39   : > { %1812 = vmatmul.mubr.msk.bf16.gmra.mrb[8].mxu0 %vm343_vm2, %v312_v0  ;;  %v1028_v0 = vld [vmem:[#allocation2 + $0x18] sm:$0xf] }
  0x3a   : > { %1870 = vmatmul.mubr.msk.bf16.vlgmr.msra.gmra.mrb[12].mxu1 %vm343_vm2, %v658_v4  ;;  %1846 = vmatpush3.bf16.msra.mxu0 %v2072_v3  ;;  %v802_v3 = vsel %vm776_vm7, %v792_v42, %v801_v58  ;;  %v2090_v4 = vld [vmem:[%s2584_s1 + $0x100] sm:$0xff]  }
  0x3b   : > { %1904 = vmatpush3.bf16.msra.mxu1 %v2071_v5  ;;  %1847 = vmatprep.mubr.msk.bf16.mxu0 %vm2144_vm0, %v2143_v1  ;;  %v1180_v5 = vrot.slane %v1178_v59, 2 }
  0x3c   : > { %1905 = vmatprep.subr.bf16.mxu1 %v2143_v1  ;;  %1881 = vmatprep.subr.bf16.mxu0 %v2143_v1 }
  0x3d   : > { %1873 = vmatprep.mubr.msk.bf16.mxu1 %vm2144_vm0, %v2143_v1 }
  0x3f   : > { %1906 = vmatpush3.bf16.msra.mxu1 %v2073_v9  ;;  %v2473_v9 = vcombine.low %v1028_v0, %v1161_v2 }
  0x40   : > { %1907 = vmatprep.subr.bf16.mxu1 %v2143_v1 }
  0x41   : > { %1848 = vmatmul.mubr.msk.bf16.vlgmr.msra.gmra.mrb[12].mxu0 %vm343_vm2, %v521_v11  ;;  %v2092_v11 = vld [vmem:[%s2584_s1 + $0x108] sm:$0xff]   ;;  %v1322_v35 = vrot.slane %v2473_v9, 3 }
  0x42   : > { %1882 = vmatpush3.bf16.msra.mxu0 %v2074_v12  ;;  %1874 = vmatmul.mubr.msk.bf16.gmra.mrb[16].mxu1 %vm343_vm2, %v660_v13  ;;  %v1184_v12 = vor.u32 %v1183_v6, %v1180_v5  ;;  %v1192_v13 = vor.u32 %v1191_v8, %v1188_v7 }
  0x43   : > { %1883 = vmatprep.subr.bf16.mxu0 %v2143_v1  ;;  %1908 = vmatpush3.bf16.msra.mxu1 %v2077_v14  ;;  %v1195_v14 = vshrl.u32 %v2473_v9, 16  ;;  %v1323_v38 = vsel %vm1318_vm9, %v1320_v34, %v1322_v35 }
  0x44   : > { %1851 = vmatprep.mubr.msk.bf16.mxu0 %vm2144_vm0, %v2143_v1  ;;  %1877 = vmatprep.mubr.msk.bf16.mxu1 %vm2144_vm0, %v2143_v1  ;;  %v1193_v17 = vsel %vm1176_vm8, %v1184_v12, %v1192_v13 }
  0x45   : > { %1909 = vmatprep.subr.bf16.mxu1 %v2143_v1  ;;  %v1197_v19 = vrot.slane %v1195_v14, 2 }
  0x46   : > { %1884 = vmatpush3.bf16.msra.mxu0 %v2078_v15  ;;  %v1198_v15 = vshll.u32 %v2473_v9, 16 }
  0x47   : > { %1885 = vmatprep.subr.bf16.mxu0 %v2143_v1  ;;  %1910 = vmatpush3.bf16.msra.mxu1 %v2079_v18  ;;  %v2095_v18 = vld [vmem:[%s2584_s1 + $0x140] sm:$0xff]  }
  0x48   : > { %1911 = vmatprep.subr.bf16.mxu1 %v2143_v1  ;;  %v1200_v20 = vrot.slane %v1198_v15, 3 }
  0x49   : > { %1852 = vmatmul.mubr.msk.bf16.gmra.mrb[16].mxu0 %vm343_vm2, %v523_v21  ;;  %v1056_v21 = vrot.slane %v2441_v53, 2 }
  0x4a   : > { %1878 = vmatmul.mubr.msk.bf16.gmra.mrb[20].mxu1 %vm343_vm2, %v659_v10  ;;  %1886 = vmatpush3.bf16.msra.mxu0 %v2080_v22  ;;  %v2091_v10 = vld [vmem:[%s2584_s1 + $0x138] sm:$0xff]   ;;  %v1057_v22 = vrot.slane %v2447_v56, 2 }
  0x4b   : > { %1855 = vmatprep.mubr.msk.bf16.mxu0 %vm2144_vm0, %v2143_v1  ;;  %1887 = vmatprep.subr.bf16.mxu0 %v2143_v1 }
  0x4c   : > { %1912 = vmatpush3.bf16.msra.mxu1 %v2081_v24  ;;  %1913 = vmatprep.mubr.msk.bf16.mxu1 %vm2144_vm0, %v2143_v1  ;;  %v1201_v24 = vor.u32 %v1200_v20, %v1197_v19  ;;  %v1058_v26 = vsel %vm918_vm6, %v1056_v21, %v1057_v22 }
  0x4d   : > { %1947 = vmatprep.subr.bf16.mxu1 %v2143_v1 }
  0x4e   : > { %1888 = vmatpush3.bf16.msra.mxu0 %v2082_v25  ;;  %v1029_v25 = vld [vmem:[#allocation2 + $0x1c] sm:$0x3]  ;;  %v1202_v28 = vsel %vm1176_vm8, %v1192_v13, %v1201_v24 }
  0x4f   : > { %1889 = vmatprep.subr.bf16.mxu0 %v2143_v1  ;;  %v1663_v27 = vcombine.low %v1028_v0, %v1029_v25 }
  0x51   : > { %1856 = vmatmul.mubr.msk.bf16.gmra.mrb[20].mxu0 %vm343_vm2, %v522_v16  ;;  %v2096_v16 = vld [vmem:[%s2584_s1 + $0x110] sm:$0xff]   ;;  %v1059_v30 = vrot.slane %v1663_v27, 2 }
  0x52   : > { %1914 = vmatmul.mubr.msk.bf16.vlgmr.msra.gmra.mrb[24].mxu1 %vm343_vm2, %v921_v39  ;;  %1890 = vmatpush3.bf16.msra.mxu0 %v2084_v33  ;;  %v2102_v33 = vld [vmem:[%s2584_s1 + $0x160] sm:$0xff]   ;;  %v1319_v39 = vrot.slane %v1701_v37, 3 }
  0x53   : > { %1948 = vmatpush3.bf16.msra.mxu1 %v2083_v40  ;;  %1891 = vmatprep.mubr.msk.bf16.mxu0 %vm2144_vm0, %v2143_v1  ;;  %v1060_v32 = vsel %vm918_vm6, %v1057_v22, %v1059_v30 }
  0x54   : > { %1949 = vmatprep.subr.bf16.mxu1 %v2143_v1  ;;  %1925 = vmatprep.subr.bf16.mxu0 %v2143_v1  ;;  %v1321_v40 = vsel %vm1318_vm9, %v1319_v39, %v1320_v34 }
  0x55   : > { %1917 = vmatprep.mubr.msk.bf16.mxu1 %vm2144_vm0, %v2143_v1 }
  0x57   : > { %1950 = vmatpush3.bf16.msra.mxu1 %v2085_v45 }
  0x58   : > { %1951 = vmatprep.subr.bf16.mxu1 %v2143_v1 }
  0x59   : > { %1892 = vmatmul.mubr.msk.bf16.vlgmr.msra.gmra.mrb[24].mxu0 %vm343_vm2, %v793_v49 }
  0x5a   : > { %1926 = vmatpush3.bf16.msra.mxu0 %v2086_v50  ;;  %1918 = vmatmul.mubr.msk.bf16.gmra.mrb[28].mxu1 %vm343_vm2, %v923_v54 }
  0x5b   : > { %1927 = vmatprep.subr.bf16.mxu0 %v2143_v1  ;;  %1952 = vmatpush3.bf16.msra.mxu1 %v2087_v55 }
  0x5c   : > { %1895 = vmatprep.mubr.msk.bf16.mxu0 %vm2144_vm0, %v2143_v1  ;;  %1921 = vmatprep.mubr.msk.bf16.mxu1 %vm2144_vm0, %v2143_v1 }
  0x5d   : > { %1953 = vmatprep.subr.bf16.mxu1 %v2143_v1 }
  0x5e   : > { %1928 = vmatpush3.bf16.msra.mxu0 %v2088_v57 }
  0x5f   : > { %1929 = vmatprep.subr.bf16.mxu0 %v2143_v1  ;;  %1954 = vmatpush3.bf16.msra.mxu1 %v2089_v60 }
  0x60   : > { %1955 = vmatprep.subr.bf16.mxu1 %v2143_v1 }
  0x61   : > { %1896 = vmatmul.mubr.msk.bf16.gmra.mrb[28].mxu0 %vm343_vm2, %v802_v3 }
  0x62   : > { %1922 = vmatmul.mubr.msk.bf16.gmra.mrb[32].mxu1 %vm343_vm2, %v922_v46  ;;  %1930 = vmatpush3.bf16.msra.mxu0 %v2090_v4 }
  0x63   : > { %1899 = vmatprep.mubr.msk.bf16.mxu0 %vm2144_vm0, %v2143_v1  ;;  %1931 = vmatprep.subr.bf16.mxu0 %v2143_v1 }
  0x64   : > { %1956 = vmatpush3.bf16.msra.mxu1 %v2091_v10  ;;  %1957 = vmatprep.mubr.msk.bf16.mxu1 %vm2144_vm0, %v2143_v1 }
  0x65   : > { %1991 = vmatprep.subr.bf16.mxu1 %v2143_v1 }
  0x66   : > { %1932 = vmatpush3.bf16.msra.mxu0 %v2092_v11 }
  0x67   : > { %1933 = vmatprep.subr.bf16.mxu0 %v2143_v1 }
  0x69   : > { %1900 = vmatmul.mubr.msk.bf16.gmra.mrb[32].mxu0 %vm343_vm2, %v801_v58 }
  0x6a   : > { %1958 = vmatmul.mubr.msk.bf16.vlgmr.msra.gmra.mrb[36].mxu1 %vm343_vm2, %v1193_v17  ;;  %1934 = vmatpush3.bf16.msra.mxu0 %v2096_v16 }
  0x6b   : > { %1996 = vmatpush3.bf16.msra.mxu1 %v2095_v18  ;;  %1935 = vmatprep.mubr.msk.bf16.mxu0 %vm2144_vm0, %v2143_v1 }
  0x6c   : > { %1992 = vmatprep.subr.bf16.mxu1 %v2143_v1  ;;  %1969 = vmatprep.subr.bf16.mxu0 %v2143_v1 }
  0x6d   : > { %1961 = vmatprep.mubr.msk.bf16.mxu1 %vm2144_vm0, %v2143_v1 }
  0x6f   : > { %1997 = vmatpush3.bf16.msra.mxu1 %v2097_v23 }
  0x70   : > { %1993 = vmatprep.subr.bf16.mxu1 %v2143_v1 }
  0x71   : > { %1936 = vmatmul.mubr.msk.bf16.vlgmr.msra.gmra.mrb[36].mxu0 %vm343_vm2, %v1058_v26 }
  0x72   : > { %1970 = vmatpush3.bf16.msra.mxu0 %v2095_v18  ;;  %1962 = vmatmul.mubr.msk.bf16.gmra.mrb[40].mxu1 %vm343_vm2, %v1202_v28 }
  0x73   : > { %1971 = vmatprep.subr.bf16.mxu0 %v2143_v1  ;;  %1998 = vmatpush3.bf16.msra.mxu1 %v2099_v29 }
  0x74   : > { %1939 = vmatprep.mubr.msk.bf16.mxu0 %vm2144_vm0, %v2143_v1  ;;  %1965 = vmatprep.mubr.msk.bf16.mxu1 %vm2144_vm0, %v2143_v1 }
  0x75   : > { %1994 = vmatprep.subr.bf16.mxu1 %v2143_v1 }
  0x76   : > { %1972 = vmatpush3.bf16.msra.mxu0 %v2097_v23 }
  0x77   : > { %1973 = vmatprep.subr.bf16.mxu0 %v2143_v1  ;;  %1999 = vmatpush3.bf16.msra.mxu1 %v2101_v31 }
  0x78   : > { %1995 = vmatprep.subr.bf16.mxu1 %v2143_v1 }
  0x79   : > { %1940 = vmatmul.mubr.msk.bf16.gmra.mrb[40].mxu0 %vm343_vm2, %v1060_v32 }
  0x7a   : > { %1966 = vmatmul.mubr.msk.bf16.gmra.mrb[44].mxu1 %vm343_vm2, %v1201_v24  ;;  %1974 = vmatpush3.bf16.msra.mxu0 %v2099_v29 }
  0x7b   : > { %1943 = vmatprep.mubr.msk.bf16.mxu0 %vm2144_vm0, %v2143_v1  ;;  %1975 = vmatprep.subr.bf16.mxu0 %v2143_v1 }
  0x7c   : > { %2000 = vmatpush3.bf16.msra.mxu1 %v2102_v33  ;;  %1983 = vmatprep.mubr.msk.bf16.mxu1 %vm2144_vm0, %v2143_v1 }
  0x7e   : > { %1976 = vmatpush3.bf16.msra.mxu0 %v2101_v31 }
  0x7f   : > { %1977 = vmatprep.subr.bf16.mxu0 %v2143_v1 }
  0x81   : > { %1944 = vmatmul.mubr.msk.bf16.gmra.mrb[44].mxu0 %vm343_vm2, %v1059_v30 }
  0x82   : > { %1984 = vmatmul.mubr.msk.bf16.vlgmr.msra.gmra.mrb[48].mxu1 %vm343_vm2, %v1323_v38  ;;  %1978 = vmatpush3.bf16.msra.mxu0 %v2102_v33 }
  0x83   : > { %1979 = vmatprep.mubr.msk.bf16.mxu0 %vm2144_vm0, %v2143_v1  ;;  %1987 = vmatprep.mubr.msk.bf16.mxu1 %vm2144_vm0, %v2143_v1 }
  0x89   : > { %1980 = vmatmul.mubr.msk.bf16.vlgmr.msra.gmra.mrb[48].mxu0 %vm343_vm2, %v1321_v40 }
  0x8a   : > { %1988 = vmatmul.mubr.msk.bf16.gmra.mrb[52].mxu1 %vm343_vm2, %v1322_v35 }
  0xf5   : > { %v481_v41 = vpop.f32.mrb[0].mxu1 }
  0xf6   : > { %v1827_v42 = vpop.f32.mrb[1].mxu1 }
  0xf7   : > { %v484_v43 = vpop.f32.mrb[2].mxu1 }
  0xf8   : > { %v1828_v44 = vpop.f32.mrb[3].mxu1 }
  0xfc   : > { %v387_v45 = vpop.f32.mrb[0].mxu0 }
  0xfd   : > { %v482_v46 = vadd.f32 %v481_v41, %v387_v45  ;;  %v1805_v47 = vpop.f32.mrb[1].mxu0  ;;  %v489_v48 = vpop.f32.mrb[4].mxu1 }
  0xfe   : > { %v390_v49 = vpop.f32.mrb[2].mxu0  ;;  %v1831_v50 = vpop.f32.mrb[5].mxu1 }
  0xff   : > { %v485_v51 = vadd.f32 %v484_v43, %v390_v49  ;;  %v1806_v52 = vpop.f32.mrb[3].mxu0  ;;  %v492_v53 = vpop.f32.mrb[6].mxu1 }
 0x100   : > { %v1832_v54 = vpop.f32.mrb[7].mxu1 }
 0x104   : > { %v395_v1 = vpop.f32.mrb[4].mxu0 }
 0x105   : > { %v490_v55 = vadd.f32 %v489_v48, %v395_v1  ;;  %v1809_v56 = vpop.f32.mrb[5].mxu0  ;;  %v497_v57 = vpop.f32.mrb[8].mxu1 }
 0x106   : > { %v398_v58 = vpop.f32.mrb[6].mxu0  ;;  %v1835_v59 = vpop.f32.mrb[9].mxu1 }
 0x107   : > { %v493_v60 = vadd.f32 %v492_v53, %v398_v58  ;;  %v1810_v61 = vpop.f32.mrb[7].mxu0  ;;  %v500_v62 = vpop.f32.mrb[10].mxu1 }
 0x108   : > { %v1836_v63 = vpop.f32.mrb[11].mxu1 }
 0x10c   : > { %v403_v0 = vpop.f32.mrb[8].mxu0 }
 0x10d   : > { %v498_v2 = vadd.f32 %v497_v57, %v403_v0  ;;  %v1813_v3 = vpop.f32.mrb[9].mxu0  ;;  %v734_v4 = vpop.f32.mrb[12].mxu1 }
 0x10e   : > { %v406_v5 = vpop.f32.mrb[10].mxu0  ;;  %v1871_v6 = vpop.f32.mrb[13].mxu1 }
 0x10f   : > { %v1814_v7 = vpop.f32.mrb[11].mxu0  ;;  %v737_v8 = vpop.f32.mrb[14].mxu1 }
 0x110   : > { %v1872_v9 = vpop.f32.mrb[15].mxu1 }
 0x114   : > { %v597_v10 = vpop.f32.mrb[12].mxu0 }
 0x115   : > { %v619_v11 = vadd.f32 %v597_v10, %v482_v46  ;;  %v1849_v12 = vpop.f32.mrb[13].mxu0  ;;  %v742_v13 = vpop.f32.mrb[16].mxu1 }
 0x116   : > { %v600_v14 = vpop.f32.mrb[14].mxu0  ;;  %v1875_v15 = vpop.f32.mrb[17].mxu1 }
 0x117   : > { %v620_v16 = vadd.f32 %v600_v14, %v485_v51  ;;  %v1850_v17 = vpop.f32.mrb[15].mxu0  ;;  %v745_v18 = vpop.f32.mrb[18].mxu1  ;;  %v756_v19 = vadd.f32 %v734_v4, %v619_v11 }
 0x118   : > { %v1876_v20 = vpop.f32.mrb[19].mxu1 }
 0x119   : > { %v757_v21 = vadd.f32 %v737_v8, %v620_v16 }
 0x11c   : > { %v605_v22 = vpop.f32.mrb[16].mxu0 }
 0x11d   : > { %v621_v23 = vadd.f32 %v605_v22, %v490_v55  ;;  %v1853_v24 = vpop.f32.mrb[17].mxu0  ;;  %v750_v25 = vpop.f32.mrb[20].mxu1 }
 0x11e   : > { %v608_v26 = vpop.f32.mrb[18].mxu0  ;;  %v1879_v27 = vpop.f32.mrb[21].mxu1 }
 0x11f   : > { %v622_v28 = vadd.f32 %v608_v26, %v493_v60  ;;  %v1854_v29 = vpop.f32.mrb[19].mxu0  ;;  %v753_v30 = vpop.f32.mrb[22].mxu1  ;;  %v758_v31 = vadd.f32 %v742_v13, %v621_v23 }
 0x120   : > { %v1880_v32 = vpop.f32.mrb[23].mxu1 }
 0x121   : > { %v759_v33 = vadd.f32 %v745_v18, %v622_v28 }
 0x124   : > { %v613_v34 = vpop.f32.mrb[20].mxu0 }
 0x125   : > { %v623_v35 = vadd.f32 %v613_v34, %v498_v2  ;;  %v1857_v36 = vpop.f32.mrb[21].mxu0  ;;  %v997_v37 = vpop.f32.mrb[24].mxu1 }
 0x126   : > { %v616_v38 = vpop.f32.mrb[22].mxu0  ;;  %v1915_v39 = vpop.f32.mrb[25].mxu1 }
 0x127   : > { %v1858_v40 = vpop.f32.mrb[23].mxu0  ;;  %v1000_v41 = vpop.f32.mrb[26].mxu1  ;;  %v760_v42 = vadd.f32 %v750_v25, %v623_v35 }
 0x128   : > { %v1916_v43 = vpop.f32.mrb[27].mxu1 }
 0x12c   : > { %v876_v44 = vpop.f32.mrb[24].mxu0 }
 0x12d   : > { %v898_v45 = vadd.f32 %v876_v44, %v756_v19  ;;  %v1893_v46 = vpop.f32.mrb[25].mxu0  ;;  %v1005_v47 = vpop.f32.mrb[28].mxu1 }
 0x12e   : > { %v879_v48 = vpop.f32.mrb[26].mxu0  ;;  %v1919_v49 = vpop.f32.mrb[29].mxu1 }
 0x12f   : > { %v899_v50 = vadd.f32 %v879_v48, %v757_v21  ;;  %v1894_v51 = vpop.f32.mrb[27].mxu0  ;;  %v1008_v52 = vpop.f32.mrb[30].mxu1  ;;  %v1019_v53 = vadd.f32 %v997_v37, %v898_v45 }
 0x130   : > { %v1920_v54 = vpop.f32.mrb[31].mxu1 }
 0x131   : > { %v1020_v1 = vadd.f32 %v1000_v41, %v899_v50 }
 0x134   : > { %v884_v55 = vpop.f32.mrb[28].mxu0 }
 0x135   : > { %v900_v56 = vadd.f32 %v884_v55, %v758_v31  ;;  %v1897_v57 = vpop.f32.mrb[29].mxu0  ;;  %v1013_v58 = vpop.f32.mrb[32].mxu1 }
 0x136   : > { %v887_v59 = vpop.f32.mrb[30].mxu0  ;;  %v1923_v60 = vpop.f32.mrb[33].mxu1 }
 0x137   : > { %v901_v61 = vadd.f32 %v887_v59, %v759_v33  ;;  %v1898_v62 = vpop.f32.mrb[31].mxu0  ;;  %v1016_v63 = vpop.f32.mrb[34].mxu1  ;;  %v1021_v0 = vadd.f32 %v1005_v47, %v900_v56 }
 0x138   : > { %v1924_v2 = vpop.f32.mrb[35].mxu1 }
 0x139   : > { %v1022_v3 = vadd.f32 %v1008_v52, %v901_v61 }
 0x13c   : > { %v892_v4 = vpop.f32.mrb[32].mxu0 }
 0x13d   : > { %v902_v5 = vadd.f32 %v892_v4, %v760_v42  ;;  %v1901_v6 = vpop.f32.mrb[33].mxu0  ;;  %v1276_v7 = vpop.f32.mrb[36].mxu1  ;;  %v1710_v42 = vld [vmem:[%s2585_s2] ss:$0 sm:$0xff] }
 0x13e   : > { %v895_v8 = vpop.f32.mrb[34].mxu0  ;;  %v1959_v9 = vpop.f32.mrb[37].mxu1 }
 0x13f   : > { %v1902_v10 = vpop.f32.mrb[35].mxu0  ;;  %v1279_v11 = vpop.f32.mrb[38].mxu1  ;;  %v1023_v12 = vadd.f32 %v1013_v58, %v902_v5 }
 0x140   : > { %v1960_v13 = vpop.f32.mrb[39].mxu1 }
 0x144   : > { %v1134_v14 = vpop.f32.mrb[36].mxu0 }
 0x145   : > { %v1156_v15 = vadd.f32 %v1134_v14, %v1019_v53  ;;  %v1937_v16 = vpop.f32.mrb[37].mxu0  ;;  %v1284_v17 = vpop.f32.mrb[40].mxu1 }
 0x146   : > { %v1137_v18 = vpop.f32.mrb[38].mxu0  ;;  %v1963_v19 = vpop.f32.mrb[41].mxu1 }
 0x147   : > { %v1157_v20 = vadd.f32 %v1137_v18, %v1020_v1  ;;  %v1938_v21 = vpop.f32.mrb[39].mxu0  ;;  %v1287_v22 = vpop.f32.mrb[42].mxu1  ;;  %v1298_v23 = vadd.f32 %v1276_v7, %v1156_v15 }
 0x148   : > { %v1964_v24 = vpop.f32.mrb[43].mxu1 }
 0x149   : > { %v1299_v25 = vadd.f32 %v1279_v11, %v1157_v20 }
 0x14c   : > { %v1142_v26 = vpop.f32.mrb[40].mxu0 }
 0x14d   : > { %v1158_v27 = vadd.f32 %v1142_v26, %v1021_v0  ;;  %v1941_v28 = vpop.f32.mrb[41].mxu0  ;;  %v1292_v29 = vpop.f32.mrb[44].mxu1 }
 0x14e   : > { %v1145_v30 = vpop.f32.mrb[42].mxu0  ;;  %v1967_v31 = vpop.f32.mrb[45].mxu1 }
 0x14f   : > { %v1159_v32 = vadd.f32 %v1145_v30, %v1022_v3  ;;  %v1942_v33 = vpop.f32.mrb[43].mxu0  ;;  %v1295_v34 = vpop.f32.mrb[46].mxu1  ;;  %v1300_v35 = vadd.f32 %v1284_v17, %v1158_v27 }
 0x150   : > { %v1968_v36 = vpop.f32.mrb[47].mxu1 }
 0x151   : > { %v1301_v37 = vadd.f32 %v1287_v22, %v1159_v32 }
 0x154   : > { %v1150_v38 = vpop.f32.mrb[44].mxu0 }
 0x155   : > { %v1160_v39 = vadd.f32 %v1150_v38, %v1023_v12  ;;  %v1945_v40 = vpop.f32.mrb[45].mxu0  ;;  %v1405_v41 = vpop.f32.mrb[48].mxu1 }
 0x156   : > { %v1153_v43 = vpop.f32.mrb[46].mxu0  ;;  %v1421_v44 = vadd.f32 %v1405_v41, %v1300_v35  ;;  %v1985_v45 = vpop.f32.mrb[49].mxu1 }
 0x157   : > { %v1946_v46 = vpop.f32.mrb[47].mxu0  ;;  %v1408_v47 = vpop.f32.mrb[50].mxu1  ;;  %v1302_v48 = vadd.f32 %v1292_v29, %v1160_v39 }
 0x158   : > { %v1433_v49 = vadd.f32 %v1710_v42, %v1421_v44  ;;  %v1422_v50 = vadd.f32 %v1408_v47, %v1301_v37  ;;  %v1986_v51 = vpop.f32.mrb[51].mxu1 }
 0x15a   : > { %1439 = vst.msk [vmem:[%s192_s22 + $0x10] sm:$0xff] %vm1436_vm10, %v1433_v49  ;;  %v1434_v52 = vadd.f32 %v1710_v42, %v1422_v50 }
 0x15c   : > { %1440 = vst.msk [vmem:[%s192_s22 + $0x18] sm:$0xff] %vm1436_vm10, %v1434_v52  ;;  %v1397_v53 = vpop.f32.mrb[48].mxu0 }
 0x15d   : > { %v1419_v54 = vadd.f32 %v1397_v53, %v1298_v23  ;;  %v1981_v1 = vpop.f32.mrb[49].mxu0  ;;  %v1413_v55 = vpop.f32.mrb[52].mxu1 }
 0x15e   : > { %v1400_v56 = vpop.f32.mrb[50].mxu0  ;;  %v1423_v57 = vadd.f32 %v1413_v55, %v1302_v48  ;;  %v1989_v58 = vpop.f32.mrb[53].mxu1 }
 0x15f   : > { %v1431_v59 = vadd.f32 %v1710_v42, %v1419_v54  ;;  %v1420_v60 = vadd.f32 %v1400_v56, %v1299_v25  ;;  %v1982_v61 = vpop.f32.mrb[51].mxu0  ;;  %v1416_v62 = vpop.f32.mrb[54].mxu1 }
 0x160   : > { %v1435_v63 = vadd.f32 %v1710_v42, %v1423_v57  ;;  %v1990_v0 = vpop.f32.mrb[55].mxu1 }
 0x161   : > { %1437 = vst.msk [vmem:[%s192_s22] sm:$0xff] %vm1436_vm10, %v1431_v59  ;;  %v1432_v2 = vadd.f32 %v1710_v42, %v1420_v60 }
 0x162   : > { %1441 = vst.msk [vmem:[%s192_s22 + $0x20] sm:$0xff] %vm1436_vm10, %v1435_v63 }
 0x163   : > { %1438 = vst.msk [vmem:[%s192_s22 + $0x8] sm:$0xff] %vm1436_vm10, %v1432_v2 }
 0x164 PF: > { %s13_s16 = sadd.s32 1, %s2141_s16   ;;  %s2587_s12 = smov %s2133_s14 }
 0x165   : > { %p10_p7 = scmp.ge.s32.totalorder %s13_s16, 6   ;;  %s2588_s13 = smov %s2137_s15 }
 0x166   : > { %s2589_s14 = smov %s2592_s17  ;;  %s2590_s15 = smov %s2596_s18 }
 0x167   :  { %12 = sbr.rel (!%p10_p7) target bundleno = 3 (0x3), region = 71 }

</bundles_post_ra>
